<compile_context>
chip_gen: v7x
topology: tpu7x:2x2x1
jax: 0.10.0
libtpu: 0.0.40
codegen_flags: <defaults>
</compile_context>

<pallas_src>
import functools

import jax
import jax.numpy as jnp
from jax.experimental import pallas as pl
from jax.experimental.pallas import tpu as pltpu


def _feature_renderer_kernel(feat_ref, alpha_ref, sky_ref,
                             w1_ref, b1_ref, w2_ref, b2_ref,
                             out_ref):
    """One tile of pixels: blend foreground with sky, then decode to RGB.

    feat_ref  : (TM, C)  bf16  rendered gaussian features for TM pixels
    alpha_ref : (TM, 1)  f32   rendered alphas
    sky_ref   : (TM, C)  bf16  skybox features
    w1_ref    : (C, CH)  f32   decoder_head layer-1 weight (1x1 conv == matmul)
    b1_ref    : (1, CH)  f32
    w2_ref    : (CH, 3)  f32   decoder_head layer-2 weight
    b2_ref    : (1, 3)   f32
    out_ref   : (TM, 3)  f32   decoded RGB
    """
    # Upcast the bf16 feature streams in-register; blend math stays f32
    # (v5e has no bf16 VPU datapath, and it is free on v6e/v7x).
    feat = feat_ref[...].astype(jnp.float32)
    sky = sky_ref[...].astype(jnp.float32)
    alpha = alpha_ref[...]

    # render_features + (1 - render_alphas) * sky_features
    full = feat + (1.0 - alpha) * sky

    # decoder_head: 1x1 conv -> ReLU -> 1x1 conv  (per-pixel MLP), f32 accumulation
    h = jnp.dot(full, w1_ref[...], preferred_element_type=jnp.float32) + b1_ref[...]
    h = jnp.maximum(h, 0.0)
    out = jnp.dot(h, w2_ref[...], preferred_element_type=jnp.float32) + b2_ref[...]
    out_ref[...] = out.astype(out_ref.dtype)


def _round_up(x, m):
    return ((x + m - 1) // m) * m


@functools.partial(jax.jit, static_argnames=("tile_m",))
def _decode_blend(render_features, render_alphas, sky_features,
                  w1, b1, w2, b2, *, tile_m=1024):
    """Run the fused blend+decode Pallas kernel over all pixels.

    render_features: (B, N, H, W, C)
    render_alphas  : (B, N, H, W, 1)
    sky_features   : (B, N, H, W, C)
    returns        : (B, N, H, W, 3) float32
    """
    B, N, H, W, C = render_features.shape
    CH = w1.shape[1]
    COUT = w2.shape[1]
    P = B * N * H * W

    # Dominant HBM traffic is the two C-wide feature reads per pixel; feed them
    # as bf16 to halve it. Matmul accumulation / blend stay f32 in the kernel.
    # TODO(synk): ideally the upstream rasterizer / skybox sampler emit bf16
    # directly so this cast does not cost an extra HBM round-trip.
    feat2d = render_features.reshape(P, C).astype(jnp.bfloat16)
    sky2d = sky_features.reshape(P, C).astype(jnp.bfloat16)
    alpha2d = render_alphas.reshape(P, 1).astype(jnp.float32)
    w1 = w1.astype(jnp.float32)
    w2 = w2.astype(jnp.float32)
    b1_2d = b1.reshape(1, CH).astype(jnp.float32)
    b2_2d = b2.reshape(1, COUT).astype(jnp.float32)

    # Clamp the tile for tiny inputs; always a multiple of 16 (bf16 sublane tile).
    tile_m = max(16, min(tile_m, _round_up(P, 256)))
    grid = (pl.cdiv(P, tile_m),)   # ragged last tile handled by Pallas masking

    # Advisory cost estimate: this call is mem-bound, let XLA schedule around it.
    bytes_accessed = int(P * (2 * C * 2 + 1 * 4 + COUT * 4)
                         + (C * CH + CH + CH * COUT + COUT) * 4)
    flops = int(P * (3 * C + 2 * C * CH + CH + 2 * CH * COUT + COUT))

    out2d = pl.pallas_call(
        _feature_renderer_kernel,
        out_shape=jax.ShapeDtypeStruct((P, COUT), jnp.float32),
        grid_spec=pltpu.PrefetchScalarGridSpec(
            num_scalar_prefetch=0,
            grid=grid,
            in_specs=[
                pl.BlockSpec((tile_m, C), lambda i: (i, 0)),   # features tile (bf16)
                pl.BlockSpec((tile_m, 1), lambda i: (i, 0)),   # alpha tile (f32)
                pl.BlockSpec((tile_m, C), lambda i: (i, 0)),   # sky tile (bf16)
                pl.BlockSpec((C, CH), lambda i: (0, 0)),       # w1 (resident)
                pl.BlockSpec((1, CH), lambda i: (0, 0)),       # b1
                pl.BlockSpec((CH, COUT), lambda i: (0, 0)),    # w2
                pl.BlockSpec((1, COUT), lambda i: (0, 0)),     # b2
            ],
            out_specs=pl.BlockSpec((tile_m, COUT), lambda i: (i, 0)),
        ),
        compiler_params=pltpu.CompilerParams(
            dimension_semantics=("parallel",)),
        cost_estimate=pl.CostEstimate(flops=flops, transcendentals=0,
                                      bytes_accessed=bytes_accessed),
    )(feat2d, alpha2d, sky2d, w1, b1_2d, w2, b2_2d)

    return out2d.reshape(B, N, H, W, COUT)


class FeatureRendererJAX:
    """JAX/Pallas reimplementation of FeatureRenderer.forward (decoder_for_sky_only=False)."""

    def __init__(self, feature_dim=32, hidden_dim=32, rasterizing_downsample=4.0, seed=0):
        self.rasterizing_downsample = rasterizing_downsample
        k = jax.random.PRNGKey(seed)
        k1, k2 = jax.random.split(k)
        # decoder_head parameters (1x1-conv MLP head), deterministic init.
        self.w1 = (jax.random.normal(k1, (feature_dim, hidden_dim), jnp.float32)
                   * (1.0 / jnp.sqrt(feature_dim)))
        self.b1 = jnp.zeros((hidden_dim,), jnp.float32)
        self.w2 = (jax.random.normal(k2, (hidden_dim, 3), jnp.float32)
                   * (1.0 / jnp.sqrt(hidden_dim)))
        self.b2 = jnp.zeros((3,), jnp.float32)

    def prepare_rasterizing_params(self, batch):
        target_intrinsics = jnp.stack(batch["images_intrinsic"])          # (B, N, 6)
        rasterizing_target_intrinsics = target_intrinsics / self.rasterizing_downsample
        target_poses = jnp.stack(batch["images_pose"])                    # (B, N, 4, 4)
        return {"target_poses": target_poses,
                "rasterizing_target_intrinsics": rasterizing_target_intrinsics}

    def forward(self, batch, network_output):
        rasterizing_params = self.prepare_rasterizing_params(batch)
        _ = rasterizing_params  # consumed by the external rasterizer (see TODO below)

        # TODO(synk): render_gsplat_api (gaussian splatting rasterizer) and
        # skybox.sample_batch have no Pallas equivalent; their outputs are taken
        # as precomputed kernel inputs in network_output.
        render_features = network_output["render_features"]   # (B, N, H, W, C)
        render_alphas = network_output["render_alphas"]        # (B, N, H, W, 1)
        render_depths = network_output["render_depths"]        # (B, N, H, W, 1)
        sky_features = network_output["sky_features"]          # (B, N, H, W, C)

        pd_images = _decode_blend(render_features, render_alphas, sky_features,
                                  self.w1, self.b1, self.w2, self.b2)
        # decoder_for_sky_only == False branch: fg image is all-ones. Use a
        # broadcast constant instead of materializing a full ones_like write.
        pd_images_fg = jnp.broadcast_to(jnp.ones((), pd_images.dtype), pd_images.shape)

        return {
            "pd_images": pd_images,        # (B, N, H, W, 3)
            "pd_images_fg": pd_images_fg,  # (B, N, H, W, 3)
            "pd_depths": render_depths,    # (B, N, H, W, 1)
            "pd_alphas": render_alphas,    # (B, N, H, W, 1)
        }


def _reference(render_features, render_alphas, sky_features, w1, b1, w2, b2):
    full = render_features + (1.0 - render_alphas) * sky_features
    h = jnp.maximum(jnp.einsum("bnhwc,cd->bnhwd", full, w1) + b1, 0.0)
    return jnp.einsum("bnhwc,cd->bnhwd", h, w2) + b2


def _check(renderer, render_features, render_alphas, sky_features, out_images, tol=1e-3):
    # Reference uses the same bf16-rounded feature inputs the kernel sees.
    feat = render_features.astype(jnp.bfloat16).astype(jnp.float32)
    sky = sky_features.astype(jnp.bfloat16).astype(jnp.float32)
    ref = _reference(feat, render_alphas, sky,
                     renderer.w1, renderer.b1, renderer.w2, renderer.b2)
    err = jnp.max(jnp.abs(out_images - ref))
    assert err < tol, f"max abs err {err}"


if __name__ == "__main__":
    B, N, H, W, C = 2, 2, 16, 16, 32

    key = jax.random.PRNGKey(0)
    k_feat, k_alpha, k_sky, k_depth, k_pose, k_intr = jax.random.split(key, 6)

    render_features = jax.random.normal(k_feat, (B, N, H, W, C), jnp.float32)
    render_alphas = jax.nn.sigmoid(jax.random.normal(k_alpha, (B, N, H, W, 1), jnp.float32))
    sky_features = jax.random.normal(k_sky, (B, N, H, W, C), jnp.float32)
    render_depths = jnp.abs(jax.random.normal(k_depth, (B, N, H, W, 1), jnp.float32)) * 10.0

    batch = {
        "images_pose": [jax.random.normal(k_pose, (N, 4, 4), jnp.float32) for _ in range(B)],
        "images_intrinsic": [jnp.abs(jax.random.normal(k_intr, (N, 6), jnp.float32)) * 100.0
                             for _ in range(B)],
    }
    network_output = {
        "render_features": render_features,
        "render_alphas": render_alphas,
        "render_depths": render_depths,
        "sky_features": sky_features,
    }

    renderer = FeatureRendererJAX(feature_dim=C, hidden_dim=32,
                                  rasterizing_downsample=4.0, seed=0)
    out = renderer.forward(batch, network_output)
    jax.block_until_ready(out)

    assert out["pd_images"].shape == (B, N, H, W, 3)
    assert out["pd_images_fg"].shape == (B, N, H, W, 3)
    assert out["pd_depths"].shape == (B, N, H, W, 1)
    assert out["pd_alphas"].shape == (B, N, H, W, 1)
    _check(renderer, render_features, render_alphas, sky_features, out["pd_images"])

    # Second call with a pixel count that does NOT divide tile_m, exercising the
    # cdiv grid + masked partial last tile (replaces the old hard assert).
    Hr, Wr = 36, 50   # P = 1*1*36*50 = 1800 -> tiles of 1024 + partial 776
    kr1, kr2, kr3 = jax.random.split(jax.random.PRNGKey(1), 3)
    rf = jax.random.normal(kr1, (1, 1, Hr, Wr, C), jnp.float32)
    ra = jax.nn.sigmoid(jax.random.normal(kr2, (1, 1, Hr, Wr, 1), jnp.float32))
    sf = jax.random.normal(kr3, (1, 1, Hr, Wr, C), jnp.float32)
    out_ragged = _decode_blend(rf, ra, sf, renderer.w1, renderer.b1,
                               renderer.w2, renderer.b2)
    jax.block_until_ready(out_ragged)
    assert out_ragged.shape == (1, 1, Hr, Wr, 3)
    _check(renderer, rf, ra, sf, out_ragged)

    print("KERNEL_OK")
</pallas_src>

<mosaic_0001>
module attributes {stable_mosaic.version = 11 : i64} {
  func.func @_feature_renderer_kernel(%arg0: i32, %arg1: memref<1024x32xbf16, #tpu.memory_space<vmem>>, %arg2: memref<1024x1xf32, #tpu.memory_space<vmem>>, %arg3: memref<1024x32xbf16, #tpu.memory_space<vmem>>, %arg4: memref<32x32xf32, #tpu.memory_space<vmem>>, %arg5: memref<1x32xf32, #tpu.memory_space<vmem>>, %arg6: memref<32x3xf32, #tpu.memory_space<vmem>>, %arg7: memref<1x3xf32, #tpu.memory_space<vmem>>, %arg8: memref<1024x3xf32, #tpu.memory_space<vmem>>) attributes {dimension_semantics = [#tpu.dimension_semantics<parallel>], iteration_bounds = array<i64: 1>, scalar_prefetch = 0 : i64, scratch_operands = 0 : i64, tpu.core_type = #tpu.core_type<tc>, window_params = [{transform_indices = @transform_0, window_bounds = array<i64: 1024, 32>}, {transform_indices = @transform_1, window_bounds = array<i64: 1024, 1>}, {transform_indices = @transform_2, window_bounds = array<i64: 1024, 32>}, {pipeline_mode = #tpu.pipeline_mode<synchronous>, transform_indices = @transform_3, window_bounds = array<i64: 32, 32>}, {pipeline_mode = #tpu.pipeline_mode<synchronous>, transform_indices = @transform_4, window_bounds = array<i64: 1, 32>}, {pipeline_mode = #tpu.pipeline_mode<synchronous>, transform_indices = @transform_5, window_bounds = array<i64: 32, 3>}, {pipeline_mode = #tpu.pipeline_mode<synchronous>, transform_indices = @transform_6, window_bounds = array<i64: 1, 3>}, {transform_indices = @transform_7, window_bounds = array<i64: 1024, 3>}]} {
    %c0 = arith.constant 0 : index
    %c0_0 = arith.constant 0 : index
    %0 = vector.load %arg1[%c0, %c0_0] : memref<1024x32xbf16, #tpu.memory_space<vmem>>, vector<1024x32xbf16>
    %1 = arith.extf %0 : vector<1024x32xbf16> to vector<1024x32xf32>
    %c0_1 = arith.constant 0 : index
    %c0_2 = arith.constant 0 : index
    %2 = vector.load %arg3[%c0_1, %c0_2] : memref<1024x32xbf16, #tpu.memory_space<vmem>>, vector<1024x32xbf16>
    %3 = arith.extf %2 : vector<1024x32xbf16> to vector<1024x32xf32>
    %c0_3 = arith.constant 0 : index
    %c0_4 = arith.constant 0 : index
    %4 = vector.load %arg2[%c0_3, %c0_4] : memref<1024x1xf32, #tpu.memory_space<vmem>>, vector<1024x1xf32>
    %cst = arith.constant 1.000000e+00 : f32
    %5 = vector.broadcast %cst : f32 to vector<1024x1xf32>
    %6 = arith.subf %5, %4 : vector<1024x1xf32>
    %7 = vector.broadcast %6 : vector<1024x1xf32> to vector<1024x32xf32>
    %8 = arith.mulf %7, %3 : vector<1024x32xf32>
    %9 = arith.addf %1, %8 : vector<1024x32xf32>
    %c0_5 = arith.constant 0 : index
    %c0_6 = arith.constant 0 : index
    %10 = vector.load %arg4[%c0_5, %c0_6] : memref<32x32xf32, #tpu.memory_space<vmem>>, vector<32x32xf32>
    %cst_7 = arith.constant dense<0.000000e+00> : vector<1024x32xf32>
    %11 = tpu.matmul %9, %10, %cst_7 {dimension_numbers = #tpu.dot_dimension_numbers<[1], [0], [0], [1], [0, 0, 1, 1], [], []>} : vector<1024x32xf32>, vector<32x32xf32>, vector<1024x32xf32> -> vector<1024x32xf32>
    %c0_8 = arith.constant 0 : index
    %c0_9 = arith.constant 0 : index
    %12 = vector.load %arg5[%c0_8, %c0_9] : memref<1x32xf32, #tpu.memory_space<vmem>>, vector<1x32xf32>
    %13 = vector.broadcast %12 : vector<1x32xf32> to vector<1024x32xf32>
    %14 = arith.addf %11, %13 : vector<1024x32xf32>
    %cst_10 = arith.constant 0.000000e+00 : f32
    %15 = vector.broadcast %cst_10 : f32 to vector<1024x32xf32>
    %16 = arith.maximumf %14, %15 : vector<1024x32xf32>
    %c0_11 = arith.constant 0 : index
    %c0_12 = arith.constant 0 : index
    %17 = vector.load %arg6[%c0_11, %c0_12] : memref<32x3xf32, #tpu.memory_space<vmem>>, vector<32x3xf32>
    %cst_13 = arith.constant dense<0.000000e+00> : vector<1024x3xf32>
    %18 = tpu.matmul %16, %17, %cst_13 {dimension_numbers = #tpu.dot_dimension_numbers<[1], [0], [0], [1], [0, 0, 1, 1], [], []>} : vector<1024x32xf32>, vector<32x3xf32>, vector<1024x3xf32> -> vector<1024x3xf32>
    %c0_14 = arith.constant 0 : index
    %c0_15 = arith.constant 0 : index
    %19 = vector.load %arg7[%c0_14, %c0_15] : memref<1x3xf32, #tpu.memory_space<vmem>>, vector<1x3xf32>
    %20 = vector.broadcast %19 : vector<1x3xf32> to vector<1024x3xf32>
    %21 = arith.addf %18, %20 : vector<1024x3xf32>
    %c0_16 = arith.constant 0 : index
    %c0_17 = arith.constant 0 : index
    %22 = vector.load %arg8[%c0_16, %c0_17] : memref<1024x3xf32, #tpu.memory_space<vmem>>, vector<1024x3xf32>
    tpu.vector_store %arg8[%c0_16, %c0_17], %21 {strides = array<i32>} : memref<1024x3xf32, #tpu.memory_space<vmem>>, vector<1024x3xf32>,
    return
  }
  func.func @transform_0(%arg0: i32) -> (i32, i32) {
    %c0_i32 = arith.constant 0 : i32
    %c0_i32_0 = arith.constant 0 : i32
    return %arg0, %c0_i32 : i32, i32
  }
  func.func @transform_1(%arg0: i32) -> (i32, i32) {
    %c0_i32 = arith.constant 0 : i32
    %c0_i32_0 = arith.constant 0 : i32
    return %arg0, %c0_i32 : i32, i32
  }
  func.func @transform_2(%arg0: i32) -> (i32, i32) {
    %c0_i32 = arith.constant 0 : i32
    %c0_i32_0 = arith.constant 0 : i32
    return %arg0, %c0_i32 : i32, i32
  }
  func.func @transform_3(%arg0: i32) -> (i32, i32) {
    %c0_i32 = arith.constant 0 : i32
    %c0_i32_0 = arith.constant 0 : i32
    %c0_i32_1 = arith.constant 0 : i32
    return %c0_i32, %c0_i32_0 : i32, i32
  }
  func.func @transform_4(%arg0: i32) -> (i32, i32) {
    %c0_i32 = arith.constant 0 : i32
    %c0_i32_0 = arith.constant 0 : i32
    %c0_i32_1 = arith.constant 0 : i32
    return %c0_i32, %c0_i32_0 : i32, i32
  }
  func.func @transform_5(%arg0: i32) -> (i32, i32) {
    %c0_i32 = arith.constant 0 : i32
    %c0_i32_0 = arith.constant 0 : i32
    %c0_i32_1 = arith.constant 0 : i32
    return %c0_i32, %c0_i32_0 : i32, i32
  }
  func.func @transform_6(%arg0: i32) -> (i32, i32) {
    %c0_i32 = arith.constant 0 : i32
    %c0_i32_0 = arith.constant 0 : i32
    %c0_i32_1 = arith.constant 0 : i32
    return %c0_i32, %c0_i32_0 : i32, i32
  }
  func.func @transform_7(%arg0: i32) -> (i32, i32) {
    %c0_i32 = arith.constant 0 : i32
    %c0_i32_0 = arith.constant 0 : i32
    return %arg0, %c0_i32 : i32, i32
  }
}

</mosaic_0001>

<bundles_post_ra>
// kernel: _decode_blend.1
= control target key start
LH: loop header
LB: loop body
LE: loop exit
PB: predicated region body
PF: predicated region fallthrough
CT: control target
= control target key end

     0   :  { %v5732_v0 = vmov 0   ;;  %vm1701_vm0 = vcmask 261120   ;;  %vm4019_vm1 = vcmask 23552   ;;  %s7612_s1 = inlined_call_operand.vmem [shape: f32[1024,1], index: 1, kind: input, shape index: {}]   ;;  %s7613_s3 = inlined_call_operand.vmem [shape: f32[32,32], index: 3, kind: input, shape index: {}]   ;;  %s7614_s2 = inlined_call_operand.vmem [shape: bf16[1024,32], index: 2, kind: input, shape index: {}]   ;;  %s7615_s0 = inlined_call_operand.vmem [shape: bf16[1024,32], index: 0, kind: input, shape index: {}]   ;;  %s7616_s5 = inlined_call_operand.vmem [shape: f32[32,3], index: 5, kind: input, shape index: {}]   ;;  %s7617_s4 = inlined_call_operand.vmem [shape: f32[1,32], index: 4, kind: input, shape index: {}]   ;;  %s7618_s6 = inlined_call_operand.vmem [shape: f32[1,3], index: 6, kind: input, shape index: {}]   ;;  %s7619_s7 = inlined_call_operand.vmem [shape: f32[1024,3], index: 7, kind: output, shape index: {}]  }
   0x1   :  { %5730 = vset.pattern.permute.xlu1 %v5732_v0  ;;  %5729 = vset.pattern.permute.xlu0 %v5732_v0  ;;  %v540_v1 = vld [vmem:[%s7612_s1 + $0x10] sm:$0xff]  ;;  %v538_v2 = vld [vmem:[%s7612_s1] sm:$0xff]  ;;  %v541_v3 = vld [vmem:[%s7612_s1 + $0x18] sm:$0xff] }
   0x2   :  { %v668_v4 = vsub.f32 1.0, %v540_v1  ;;  %v666_v5 = vsub.f32 1.0, %v538_v2  ;;  %v539_v6 = vld [vmem:[%s7612_s1 + $0x8] sm:$0xff]  ;;  %v669_v7 = vsub.f32 1.0, %v541_v3  ;;  %v542_v10 = vld [vmem:[%s7612_s1 + $0x20] sm:$0xff]  ;;  %v545_v13 = vld [vmem:[%s7612_s1 + $0x38] sm:$0xff] }
   0x3   :  { %v667_v8 = vsub.f32 1.0, %v539_v6  ;;  %v543_v9 = vld [vmem:[%s7612_s1 + $0x28] sm:$0xff]  ;;  %v670_v12 = vsub.f32 1.0, %v542_v10  ;;  %v544_v14 = vld [vmem:[%s7612_s1 + $0x30] sm:$0xff]  ;;  %v673_v15 = vsub.f32 1.0, %v545_v13  ;;  %v546_v18 = vld [vmem:[%s7612_s1 + $0x40] sm:$0xff] }
   0x4   :  { %806 = vperm.xlu1 %5730, %v668_v4   ;;  %796 = vperm.xlu0 %5729, %v666_v5   ;;  %v671_v11 = vsub.f32 1.0, %v543_v9  ;;  %v672_v16 = vsub.f32 1.0, %v544_v14  ;;  %v547_v17 = vld [vmem:[%s7612_s1 + $0x48] sm:$0xff]  ;;  %v674_v20 = vsub.f32 1.0, %v546_v18  ;;  %v549_v21 = vld [vmem:[%s7612_s1 + $0x58] sm:$0xff]  ;;  %v548_v22 = vld [vmem:[%s7612_s1 + $0x50] sm:$0xff] }
   0x5   :  { %v675_v19 = vsub.f32 1.0, %v547_v17  ;;  %v677_v23 = vsub.f32 1.0, %v549_v21  ;;  %v676_v24 = vsub.f32 1.0, %v548_v22  ;;  %v551_v25 = vld [vmem:[%s7612_s1 + $0x68] sm:$0xff]  ;;  %v550_v26 = vld [vmem:[%s7612_s1 + $0x60] sm:$0xff]  ;;  %v553_v31 = vld [vmem:[%s7612_s1 + $0x78] sm:$0xff] }
   0x6   :  { %v1690_v27 = vld [vmem:[%s7613_s3] sm:$0xff]  ;;  %v1691_v28 = vld [vmem:[%s7613_s3 + $0x8] sm:$0xff]  ;;  %v679_v29 = vsub.f32 1.0, %v551_v25  ;;  %v678_v30 = vsub.f32 1.0, %v550_v26  ;;  %v552_v33 = vld [vmem:[%s7612_s1 + $0x70] sm:$0xff]  ;;  %v681_v37 = vsub.f32 1.0, %v553_v31 }
   0x7   :  { %v5712_v32 = vpack.c.bf16 %v1691_v28, %v1690_v27  ;;  %v1692_v34 = vld [vmem:[%s7613_s3 + $0x10] sm:$0xff]  ;;  %v1693_v35 = vld [vmem:[%s7613_s3 + $0x18] sm:$0xff]  ;;  %v680_v38 = vsub.f32 1.0, %v552_v33  ;;  %v555_v39 = vld [vmem:[%s7612_s1 + $0x88] sm:$0xff] }
   0x8   :  { %811 = vperm.xlu1 %5730, %v669_v7   ;;  %801 = vperm.xlu0 %5729, %v667_v8   ;;  %v5716_v36 = vpack.c.bf16 %v1693_v35, %v1692_v34  ;;  %v554_v40 = vld [vmem:[%s7612_s1 + $0x80] sm:$0xff]  ;;  %v683_v41 = vsub.f32 1.0, %v555_v39  ;;  %v557_v43 = vld [vmem:[%s7612_s1 + $0x98] sm:$0xff]  ;;  %v556_v44 = vld [vmem:[%s7612_s1 + $0x90] sm:$0xff] }
   0x9   :  { %5713 = vmatprep.subr.bf16.mxu0 %v5712_v32  ;;  %v682_v42 = vsub.f32 1.0, %v554_v40  ;;  %v685_v45 = vsub.f32 1.0, %v557_v43  ;;  %v684_v46 = vsub.f32 1.0, %v556_v44  ;;  %v559_v47 = vld [vmem:[%s7612_s1 + $0xa8] sm:$0xff]  ;;  %v558_v48 = vld [vmem:[%s7612_s1 + $0xa0] sm:$0xff]  ;;  %v561_v51 = vld [vmem:[%s7612_s1 + $0xb8] sm:$0xff] }
   0xa   :  { %5715 = vmatpush3.bf16.msra.mxu0 %v5712_v32  ;;  %v687_v49 = vsub.f32 1.0, %v559_v47  ;;  %v686_v50 = vsub.f32 1.0, %v558_v48  ;;  %v560_v52 = vld [vmem:[%s7612_s1 + $0xb0] sm:$0xff]  ;;  %v689_v53 = vsub.f32 1.0, %v561_v51  ;;  %v563_v55 = vld [vmem:[%s7612_s1 + $0xc8] sm:$0xff]  ;;  %v562_v56 = vld [vmem:[%s7612_s1 + $0xc0] sm:$0xff] }
   0xb   :  { %5717 = vmatprep.subr.bf16.mxu0 %v5716_v36  ;;  %v688_v54 = vsub.f32 1.0, %v560_v52  ;;  %v691_v57 = vsub.f32 1.0, %v563_v55  ;;  %v690_v58 = vsub.f32 1.0, %v562_v56  ;;  %v565_v59 = vld [vmem:[%s7612_s1 + $0xd8] sm:$0xff]  ;;  %v564_v60 = vld [vmem:[%s7612_s1 + $0xd0] sm:$0xff]  ;;  %v567_v63 = vld [vmem:[%s7612_s1 + $0xe8] sm:$0xff] }
   0xc   :  { %821 = vperm.xlu1 %5730, %v671_v11   ;;  %816 = vperm.xlu0 %5729, %v670_v12   ;;  %v693_v61 = vsub.f32 1.0, %v565_v59  ;;  %v692_v62 = vsub.f32 1.0, %v564_v60  ;;  %v566_v0 = vld [vmem:[%s7612_s1 + $0xe0] sm:$0xff]  ;;  %v695_v1 = vsub.f32 1.0, %v567_v63  ;;  %v569_v3 = vld [vmem:[%s7612_s1 + $0xf8] sm:$0xff]  ;;  %v568_v4 = vld [vmem:[%s7612_s1 + $0xf0] sm:$0xff] }
   0xd   :  { %v694_v2 = vsub.f32 1.0, %v566_v0  ;;  %v697_v5 = vsub.f32 1.0, %v569_v3  ;;  %v696_v6 = vsub.f32 1.0, %v568_v4  ;;  %v571_v7 = vld [vmem:[%s7612_s1 + $0x108] sm:$0xff]  ;;  %v570_v8 = vld [vmem:[%s7612_s1 + $0x100] sm:$0xff]  ;;  %v573_v11 = vld [vmem:[%s7612_s1 + $0x118] sm:$0xff] }
   0xe   :  { %5719 = vmatpush3.bf16.msra.mxu0 %v5716_v36  ;;  %v699_v9 = vsub.f32 1.0, %v571_v7  ;;  %v698_v10 = vsub.f32 1.0, %v570_v8  ;;  %v572_v12 = vld [vmem:[%s7612_s1 + $0x110] sm:$0xff]  ;;  %v701_v13 = vsub.f32 1.0, %v573_v11  ;;  %v581_v27 = vld [vmem:[%s7612_s1 + $0x158] sm:$0xff]  ;;  %v583_v31 = vld [vmem:[%s7612_s1 + $0x168] sm:$0xff] }
   0xf   :  { %v700_v14 = vsub.f32 1.0, %v572_v12  ;;  %v580_v28 = vld [vmem:[%s7612_s1 + $0x150] sm:$0xff]  ;;  %v582_v32 = vld [vmem:[%s7612_s1 + $0x160] sm:$0xff]  ;;  %v711_v33 = vsub.f32 1.0, %v583_v31  ;;  %v585_v35 = vld [vmem:[%s7612_s1 + $0x178] sm:$0xff] }
  0x10   :  { %831 = vperm.xlu1 %5730, %v673_v15   ;;  %826 = vperm.xlu0 %5729, %v672_v16   ;;  %v575_v15 = vld [vmem:[%s7612_s1 + $0x128] sm:$0xff]  ;;  %v574_v16 = vld [vmem:[%s7612_s1 + $0x120] sm:$0xff]  ;;  %v710_v34 = vsub.f32 1.0, %v582_v32  ;;  %v584_v36 = vld [vmem:[%s7612_s1 + $0x170] sm:$0xff] }
  0x11   :  { %v703_v17 = vsub.f32 1.0, %v575_v15  ;;  %v702_v18 = vsub.f32 1.0, %v574_v16  ;;  %v587_v39 = vld [vmem:[%s7612_s1 + $0x188] sm:$0xff]  ;;  %v586_v40 = vld [vmem:[%s7612_s1 + $0x180] sm:$0xff]  ;;  %v589_v43 = vld [vmem:[%s7612_s1 + $0x198] sm:$0xff] }
  0x12   :  { %v588_v44 = vld [vmem:[%s7612_s1 + $0x190] sm:$0xff]  ;;  %v591_v47 = vld [vmem:[%s7612_s1 + $0x1a8] sm:$0xff]  ;;  %v590_v48 = vld [vmem:[%s7612_s1 + $0x1a0] sm:$0xff] }
  0x13   :  { %v593_v51 = vld [vmem:[%s7612_s1 + $0x1b8] sm:$0xff]  ;;  %v592_v52 = vld [vmem:[%s7612_s1 + $0x1b0] sm:$0xff]  ;;  %v595_v55 = vld [vmem:[%s7612_s1 + $0x1c8] sm:$0xff] }
  0x14   :  { %841 = vperm.xlu1 %5730, %v675_v19   ;;  %836 = vperm.xlu0 %5729, %v674_v20   ;;  %v577_v19 = vld [vmem:[%s7612_s1 + $0x138] sm:$0xff]  ;;  %v576_v20 = vld [vmem:[%s7612_s1 + $0x130] sm:$0xff]  ;;  %v594_v56 = vld [vmem:[%s7612_s1 + $0x1c0] sm:$0xff] }
  0x15   :  { %v705_v21 = vsub.f32 1.0, %v577_v19  ;;  %v704_v22 = vsub.f32 1.0, %v576_v20  ;;  %v597_v59 = vld [vmem:[%s7612_s1 + $0x1d8] sm:$0xff]  ;;  %v596_v60 = vld [vmem:[%s7612_s1 + $0x1d0] sm:$0xff]  ;;  %v599_v63 = vld [vmem:[%s7612_s1 + $0x1e8] sm:$0xff] }
  0x16   :  { %v598_v0 = vld [vmem:[%s7612_s1 + $0x1e0] sm:$0xff]  ;;  %v601_v3 = vld [vmem:[%s7612_s1 + $0x1f8] sm:$0xff]  ;;  %v600_v4 = vld [vmem:[%s7612_s1 + $0x1f0] sm:$0xff] }
  0x17   :  { %v4667_v7 = vld [vmem:[%s7614_s2] sm:$0xff]   ;;  %v603_v8 = vld [vmem:[%s7612_s1 + $0x208] sm:$0xff]  ;;  %v605_v15 = vld [vmem:[%s7612_s1 + $0x218] sm:$0xff] }
  0x18   :  { %851 = vperm.xlu1 %5730, %v677_v23   ;;  %846 = vperm.xlu0 %5729, %v676_v24   ;;  %v579_v23 = vld [vmem:[%s7612_s1 + $0x148] sm:$0xff]  ;;  %v578_v24 = vld [vmem:[%s7612_s1 + $0x140] sm:$0xff]  ;;  %v4668_v12 = vunpack.c.l.bf16 %v4667_v7  ;;  %v604_v16 = vld [vmem:[%s7612_s1 + $0x210] sm:$0xff] }
  0x19   :  { %v707_v25 = vsub.f32 1.0, %v579_v23  ;;  %v706_v26 = vsub.f32 1.0, %v578_v24  ;;  %v4411_v11 = vld [vmem:[%s7615_s0] sm:$0xff]   ;;  %v4669_v23 = vunpack.c.h.bf16 %v4667_v7  ;;  %v733_v24 = vsub.f32 1.0, %v605_v15 }
  0x1a   :  { %v4412_v19 = vunpack.c.l.bf16 %v4411_v11  ;;  %v4413_v31 = vunpack.c.h.bf16 %v4411_v11  ;;  %v612_v11 = vld [vmem:[%s7612_s1 + $0x250] sm:$0xff] }
  0x1c   :  { %861 = vperm.xlu1 %5730, %v679_v29   ;;  %856 = vperm.xlu0 %5729, %v678_v30   ;;  %v709_v29 = vsub.f32 1.0, %v581_v27  ;;  %v708_v30 = vsub.f32 1.0, %v580_v28  ;;  %v4986_v27 = vld [vmem:[%s7614_s2 + $0x10] sm:$0xff]   ;;  %v607_v28 = vld [vmem:[%s7612_s1 + $0x228] sm:$0xff] }
  0x20   :  { %871 = vperm.xlu1 %5730, %v681_v37   ;;  %866 = vperm.xlu0 %5729, %v680_v38   ;;  %v713_v37 = vsub.f32 1.0, %v585_v35  ;;  %v712_v38 = vsub.f32 1.0, %v584_v36  ;;  %v4923_v36 = vld [vmem:[%s7615_s0 + $0x10] sm:$0xff]  }
  0x24   :  { %881 = vperm.xlu1 %5730, %v683_v41   ;;  %876 = vperm.xlu0 %5729, %v682_v42   ;;  %v715_v41 = vsub.f32 1.0, %v587_v39  ;;  %v714_v42 = vsub.f32 1.0, %v586_v40  ;;  %v735_v39 = vsub.f32 1.0, %v607_v28 }
  0x28   :  { %891 = vperm.xlu1 %5730, %v685_v45   ;;  %886 = vperm.xlu0 %5729, %v684_v46   ;;  %v717_v45 = vsub.f32 1.0, %v589_v43  ;;  %v716_v46 = vsub.f32 1.0, %v588_v44  ;;  %v608_v43 = vld [vmem:[%s7612_s1 + $0x230] sm:$0xff] }
  0x2c   :  { %901 = vperm.xlu1 %5730, %v687_v49   ;;  %896 = vperm.xlu0 %5729, %v686_v50   ;;  %v719_v49 = vsub.f32 1.0, %v591_v47  ;;  %v718_v50 = vsub.f32 1.0, %v590_v48 }
  0x30   :  { %911 = vperm.xlu1 %5730, %v689_v53   ;;  %906 = vperm.xlu0 %5729, %v688_v54   ;;  %v721_v53 = vsub.f32 1.0, %v593_v51  ;;  %v720_v54 = vsub.f32 1.0, %v592_v52  ;;  %v4924_v52 = vld [vmem:[%s7615_s0 + $0x18] sm:$0xff]  }
  0x31   :  { %v4425_v15 = vunpack.c.h.bf16 %v4924_v52 }
  0x34   :  { %921 = vperm.xlu1 %5730, %v691_v57   ;;  %916 = vperm.xlu0 %5729, %v690_v58   ;;  %v723_v57 = vsub.f32 1.0, %v595_v55  ;;  %v722_v58 = vsub.f32 1.0, %v594_v56  ;;  %v736_v56 = vsub.f32 1.0, %v608_v43  ;;  %v616_v43 = vld [vmem:[%s7612_s1 + $0x270] sm:$0xff] }
  0x38   :  { %931 = vperm.xlu1 %5730, %v693_v61   ;;  %926 = vperm.xlu0 %5729, %v692_v62   ;;  %v725_v61 = vsub.f32 1.0, %v597_v59  ;;  %v724_v62 = vsub.f32 1.0, %v596_v60  ;;  %v610_v59 = vld [vmem:[%s7612_s1 + $0x240] sm:$0xff] }
  0x3c   :  { %941 = vperm.xlu1 %5730, %v695_v1   ;;  %936 = vperm.xlu0 %5729, %v694_v2   ;;  %v727_v1 = vsub.f32 1.0, %v599_v63  ;;  %v726_v2 = vsub.f32 1.0, %v598_v0  ;;  %v4421_v63 = vunpack.c.h.bf16 %v4923_v36 }
  0x40   :  { %951 = vperm.xlu1 %5730, %v697_v5   ;;  %946 = vperm.xlu0 %5729, %v696_v6   ;;  %v729_v5 = vsub.f32 1.0, %v601_v3  ;;  %v728_v6 = vsub.f32 1.0, %v600_v4  ;;  %v4925_v4 = vld [vmem:[%s7615_s0 + $0x20] sm:$0xff]  }
  0x44   :  { %961 = vperm.xlu1 %5730, %v699_v9   ;;  %956 = vperm.xlu0 %5729, %v698_v10   ;;  %v602_v9 = vld [vmem:[%s7612_s1 + $0x200] sm:$0xff]  ;;  %v4985_v10 = vld [vmem:[%s7614_s2 + $0x8] sm:$0xff]  }
  0x48   :  { %971 = vperm.xlu1 %5730, %v701_v13   ;;  %966 = vperm.xlu0 %5729, %v700_v14   ;;  %v731_v13 = vsub.f32 1.0, %v603_v8  ;;  %v730_v14 = vsub.f32 1.0, %v602_v9  ;;  %v738_v8 = vsub.f32 1.0, %v610_v59  ;;  %v4989_v9 = vld [vmem:[%s7614_s2 + $0x28] sm:$0xff]   ;;  %v618_v59 = vld [vmem:[%s7612_s1 + $0x280] sm:$0xff] }
  0x4c   :  { %981 = vperm.xlu1 %5730, %v703_v17   ;;  %976 = vperm.xlu0 %5729, %v702_v18   ;;  %v4672_v17 = vunpack.c.l.bf16 %v4985_v10  ;;  %v4922_v18 = vld [vmem:[%s7615_s0 + $0x8] sm:$0xff]  }
  0x4d   :  { %v4417_v47 = vunpack.c.h.bf16 %v4922_v18 }
  0x50   :  { %991 = vperm.xlu1 %5730, %v705_v21   ;;  %986 = vperm.xlu0 %5729, %v704_v22  }
  0x54   :  { %1001 = vperm.xlu1 %5730, %v707_v25   ;;  %996 = vperm.xlu0 %5729, %v706_v26   ;;  %v732_v25 = vsub.f32 1.0, %v604_v16  ;;  %v4416_v26 = vunpack.c.l.bf16 %v4922_v18 }
  0x58   :  { %1011 = vperm.xlu1 %5730, %v709_v29   ;;  %1006 = vperm.xlu0 %5729, %v708_v30   ;;  %v606_v29 = vld [vmem:[%s7612_s1 + $0x220] sm:$0xff] }
  0x59   :  { %v734_v40 = vsub.f32 1.0, %v606_v29 }
  0x5c   :  { %1021 = vperm.xlu1 %5730, %v711_v33   ;;  %1016 = vperm.xlu0 %5729, %v710_v34   ;;  %v4673_v33 = vunpack.c.h.bf16 %v4985_v10  ;;  %v613_v10 = vld [vmem:[%s7612_s1 + $0x258] sm:$0xff] }
  0x60   :  { %1031 = vperm.xlu1 %5730, %v713_v37   ;;  %1026 = vperm.xlu0 %5729, %v712_v38   ;;  %v4676_v38 = vunpack.c.l.bf16 %v4986_v27 }
  0x64   :  { %1041 = vperm.xlu1 %5730, %v715_v41   ;;  %1036 = vperm.xlu0 %5729, %v714_v42   ;;  %v4987_v41 = vld [vmem:[%s7614_s2 + $0x18] sm:$0xff]  }
  0x65   :  { %v609_v42 = vld [vmem:[%s7612_s1 + $0x238] sm:$0xff] }
  0x66   :  { %v737_v55 = vsub.f32 1.0, %v609_v42  ;;  %v617_v42 = vld [vmem:[%s7612_s1 + $0x278] sm:$0xff] }
  0x68   :  { %1051 = vperm.xlu1 %5730, %v717_v45   ;;  %1046 = vperm.xlu0 %5729, %v716_v46   ;;  %v4420_v46 = vunpack.c.l.bf16 %v4923_v36  ;;  %v4927_v36 = vld [vmem:[%s7615_s0 + $0x30] sm:$0xff]  }
  0x6c   :  { %1061 = vperm.xlu1 %5730, %v719_v49   ;;  %1056 = vperm.xlu0 %5729, %v718_v50   ;;  %v4677_v49 = vunpack.c.h.bf16 %v4986_v27  ;;  %v614_v27 = vld [vmem:[%s7612_s1 + $0x260] sm:$0xff] }
  0x70   :  { %1071 = vperm.xlu1 %5730, %v721_v53   ;;  %1066 = vperm.xlu0 %5729, %v720_v54   ;;  %v4680_v54 = vunpack.c.l.bf16 %v4987_v41 }
  0x74   :  { %1081 = vperm.xlu1 %5730, %v723_v57   ;;  %1076 = vperm.xlu0 %5729, %v722_v58   ;;  %v4988_v57 = vld [vmem:[%s7614_s2 + $0x20] sm:$0xff]   ;;  %v611_v58 = vld [vmem:[%s7612_s1 + $0x248] sm:$0xff] }
  0x75   :  { %v739_v7 = vsub.f32 1.0, %v611_v58  ;;  %v619_v58 = vld [vmem:[%s7612_s1 + $0x288] sm:$0xff] }
  0x78   :  { %1091 = vperm.xlu1 %5730, %v725_v61   ;;  %1086 = vperm.xlu0 %5729, %v724_v62   ;;  %v4424_v61 = vunpack.c.l.bf16 %v4924_v52  ;;  %v4928_v52 = vld [vmem:[%s7615_s0 + $0x38] sm:$0xff]  }
  0x7c   :  { %1101 = vperm.xlu1 %5730, %v727_v1   ;;  %1096 = vperm.xlu0 %5729, %v726_v2   ;;  %v4681_v1 = vunpack.c.h.bf16 %v4987_v41  ;;  %v4991_v41 = vld [vmem:[%s7614_s2 + $0x38] sm:$0xff]  }
  0x80   :  { %1111 = vperm.xlu1 %5730, %v729_v5   ;;  %1106 = vperm.xlu0 %5729, %v728_v6   ;;  %v4684_v6 = vunpack.c.l.bf16 %v4988_v57 }
  0x83   :  { %v807_v20 = vpop.permute.xlu1 %806  ;;  %v797_v21 = vpop.permute.xlu0 %796 }
  0x84   :  { %v1434_v22 = vmul.f32 %v4668_v12, %v797_v21  ;;  %1121 = vperm.xlu1 %5730, %v731_v13   ;;  %1116 = vperm.xlu0 %5729, %v730_v14   ;;  %v1436_v30 = vmul.f32 %v4672_v17, %v807_v20  ;;  %v4428_v13 = vunpack.c.l.bf16 %v4925_v4  ;;  %v4685_v17 = vunpack.c.h.bf16 %v4988_v57  ;;  %v4926_v20 = vld [vmem:[%s7615_s0 + $0x28] sm:$0xff]   ;;  %v4992_v57 = vld [vmem:[%s7614_s2 + $0x40] sm:$0xff]  }
  0x85   :  { %v4432_v29 = vunpack.c.l.bf16 %v4926_v20 }
  0x86   :  { %v1562_v32 = vadd.f32 %v4412_v19, %v1434_v22  ;;  %v1564_v44 = vadd.f32 %v4416_v26, %v1436_v30  ;;  %v4688_v22 = vunpack.c.l.bf16 %v4989_v9  ;;  %v615_v26 = vld [vmem:[%s7612_s1 + $0x268] sm:$0xff] }
  0x87   :  { %v812_v34 = vpop.permute.xlu1 %811  ;;  %v802_v35 = vpop.permute.xlu0 %801 }
  0x88   :  { %v1435_v37 = vmul.f32 %v4669_v23, %v802_v35  ;;  %1131 = vperm.xlu1 %5730, %v733_v24   ;;  %1126 = vperm.xlu0 %5729, %v732_v25   ;;  %v1437_v48 = vmul.f32 %v4673_v33, %v812_v34  ;;  %v741_v23 = vsub.f32 1.0, %v613_v10  ;;  %v740_v24 = vsub.f32 1.0, %v612_v11  ;;  %v4990_v25 = vld [vmem:[%s7614_s2 + $0x30] sm:$0xff]   ;;  %v621_v10 = vld [vmem:[%s7612_s1 + $0x298] sm:$0xff] }
  0x89   :  { %5320 = vmatprep.mubr.msk.f32.mxu0 %vm1701_vm0, %v1562_v32  ;;  %v4689_v33 = vunpack.c.h.bf16 %v4989_v9  ;;  %v4993_v9 = vld [vmem:[%s7614_s2 + $0x48] sm:$0xff]   ;;  %v620_v11 = vld [vmem:[%s7612_s1 + $0x290] sm:$0xff] }
  0x8a   :  { %v1563_v45 = vadd.f32 %v4413_v31, %v1435_v37  ;;  %v1565_v62 = vadd.f32 %v4417_v47, %v1437_v48  ;;  %v4429_v31 = vunpack.c.h.bf16 %v4925_v4  ;;  %v4433_v47 = vunpack.c.h.bf16 %v4926_v20  ;;  %v4929_v4 = vld [vmem:[%s7615_s0 + $0x40] sm:$0xff]   ;;  %v4930_v20 = vld [vmem:[%s7615_s0 + $0x48] sm:$0xff]  }
  0x8b   :  { %v822_v50 = vpop.permute.xlu1 %821  ;;  %v817_v51 = vpop.permute.xlu0 %816 }
  0x8c   :  { %v1438_v53 = vmul.f32 %v4676_v38, %v817_v51  ;;  %1141 = vperm.xlu1 %5730, %v735_v39   ;;  %1136 = vperm.xlu0 %5729, %v734_v40   ;;  %v1439_v0 = vmul.f32 %v4677_v49, %v822_v50  ;;  %v4692_v38 = vunpack.c.l.bf16 %v4990_v25  ;;  %v743_v39 = vsub.f32 1.0, %v615_v26  ;;  %v623_v26 = vld [vmem:[%s7612_s1 + $0x2a8] sm:$0xff] }
  0x8d   :  { %5321 = vmatmul.mubr.msk.f32.vlgmr.msra.gmra.mrb[0].mxu0 %vm1701_vm0, %v1563_v45  ;;  %v742_v40 = vsub.f32 1.0, %v614_v27  ;;  %v4436_v45 = vunpack.c.l.bf16 %v4927_v36  ;;  %v4693_v49 = vunpack.c.h.bf16 %v4990_v25  ;;  %v4994_v25 = vld [vmem:[%s7614_s2 + $0x50] sm:$0xff]   ;;  %v622_v27 = vld [vmem:[%s7612_s1 + $0x2a0] sm:$0xff] }
  0x8e   :  { %v1566_v60 = vadd.f32 %v4420_v46, %v1438_v53  ;;  %5323 = vmatprep.mubr.msk.f32.mxu0 %vm1701_vm0, %v1564_v44  ;;  %v1567_v14 = vadd.f32 %v4421_v63, %v1439_v0  ;;  %v4437_v63 = vunpack.c.h.bf16 %v4927_v36  ;;  %v4931_v36 = vld [vmem:[%s7615_s0 + $0x50] sm:$0xff]  }
  0x8f   :  { %v832_v2 = vpop.permute.xlu1 %831  ;;  %v827_v3 = vpop.permute.xlu0 %826 }
  0x90   :  { %v1440_v5 = vmul.f32 %v4680_v54, %v827_v3  ;;  %1151 = vperm.xlu1 %5730, %v737_v55   ;;  %1146 = vperm.xlu0 %5729, %v736_v56   ;;  %v1441_v16 = vmul.f32 %v4681_v1, %v832_v2  ;;  %v4696_v54 = vunpack.c.l.bf16 %v4991_v41  ;;  %v745_v55 = vsub.f32 1.0, %v617_v42  ;;  %v625_v42 = vld [vmem:[%s7612_s1 + $0x2b8] sm:$0xff] }
  0x91   :  { %5324 = vmatmul.mubr.msk.f32.gmra.mrb[2].mxu0 %vm1701_vm0, %v1565_v62  ;;  %v744_v56 = vsub.f32 1.0, %v616_v43  ;;  %v4697_v1 = vunpack.c.h.bf16 %v4991_v41  ;;  %v4995_v41 = vld [vmem:[%s7614_s2 + $0x58] sm:$0xff]   ;;  %v624_v43 = vld [vmem:[%s7612_s1 + $0x2b0] sm:$0xff] }
  0x92   :  { %v1568_v12 = vadd.f32 %v4424_v61, %v1440_v5  ;;  %5326 = vmatprep.mubr.msk.f32.mxu0 %vm1701_vm0, %v1566_v60  ;;  %v1569_v30 = vadd.f32 %v4425_v15, %v1441_v16  ;;  %v4440_v61 = vunpack.c.l.bf16 %v4928_v52  ;;  %v4441_v15 = vunpack.c.h.bf16 %v4928_v52  ;;  %v4932_v52 = vld [vmem:[%s7615_s0 + $0x58] sm:$0xff]  }
  0x93   :  { %v842_v18 = vpop.permute.xlu1 %841  ;;  %v837_v19 = vpop.permute.xlu0 %836 }
  0x94   :  { %v1442_v21 = vmul.f32 %v4684_v6, %v837_v19  ;;  %1161 = vperm.xlu1 %5730, %v739_v7   ;;  %1156 = vperm.xlu0 %5729, %v738_v8   ;;  %v1443_v32 = vmul.f32 %v4685_v17, %v842_v18  ;;  %v4700_v6 = vunpack.c.l.bf16 %v4992_v57  ;;  %v747_v7 = vsub.f32 1.0, %v619_v58  ;;  %v627_v58 = vld [vmem:[%s7612_s1 + $0x2c8] sm:$0xff] }
  0x95   :  { %5327 = vmatmul.mubr.msk.f32.gmra.mrb[4].mxu0 %vm1701_vm0, %v1567_v14  ;;  %v746_v8 = vsub.f32 1.0, %v618_v59  ;;  %v4701_v17 = vunpack.c.h.bf16 %v4992_v57  ;;  %v4996_v57 = vld [vmem:[%s7614_s2 + $0x60] sm:$0xff]  }
  0x96   :  { %v1570_v28 = vadd.f32 %v4428_v13, %v1442_v21  ;;  %5329 = vmatprep.mubr.msk.f32.mxu0 %vm1701_vm0, %v1568_v12  ;;  %v1571_v46 = vadd.f32 %v4429_v31, %v1443_v32  ;;  %v4444_v13 = vunpack.c.l.bf16 %v4929_v4  ;;  %v4445_v31 = vunpack.c.h.bf16 %v4929_v4  ;;  %v626_v59 = vld [vmem:[%s7612_s1 + $0x2c0] sm:$0xff] }
  0x97   :  { %v852_v34 = vpop.permute.xlu1 %851  ;;  %v847_v35 = vpop.permute.xlu0 %846  ;;  %v4933_v4 = vld [vmem:[%s7615_s0 + $0x60] sm:$0xff]  }
  0x98   :  { %v1444_v37 = vmul.f32 %v4688_v22, %v847_v35  ;;  %1171 = vperm.xlu1 %5730, %v741_v23   ;;  %1166 = vperm.xlu0 %5729, %v740_v24   ;;  %v1445_v48 = vmul.f32 %v4689_v33, %v852_v34  ;;  %v4704_v22 = vunpack.c.l.bf16 %v4993_v9  ;;  %v749_v23 = vsub.f32 1.0, %v621_v10  ;;  %v629_v10 = vld [vmem:[%s7612_s1 + $0x2d8] sm:$0xff] }
  0x99   :  { %5330 = vmatmul.mubr.msk.f32.gmra.mrb[6].mxu0 %vm1701_vm0, %v1569_v30  ;;  %v748_v24 = vsub.f32 1.0, %v620_v11  ;;  %v4705_v33 = vunpack.c.h.bf16 %v4993_v9  ;;  %v4997_v9 = vld [vmem:[%s7614_s2 + $0x68] sm:$0xff]   ;;  %v628_v11 = vld [vmem:[%s7612_s1 + $0x2d0] sm:$0xff] }
  0x9a   :  { %v1572_v44 = vadd.f32 %v4432_v29, %v1444_v37  ;;  %5332 = vmatprep.mubr.msk.f32.mxu0 %vm1701_vm0, %v1570_v28  ;;  %v1573_v62 = vadd.f32 %v4433_v47, %v1445_v48  ;;  %v4448_v29 = vunpack.c.l.bf16 %v4930_v20  ;;  %v4449_v47 = vunpack.c.h.bf16 %v4930_v20  ;;  %v4934_v20 = vld [vmem:[%s7615_s0 + $0x68] sm:$0xff]  }
  0x9b   :  { %v862_v50 = vpop.permute.xlu1 %861  ;;  %v857_v51 = vpop.permute.xlu0 %856 }
  0x9c   :  { %v1446_v53 = vmul.f32 %v4692_v38, %v857_v51  ;;  %1181 = vperm.xlu1 %5730, %v743_v39   ;;  %1176 = vperm.xlu0 %5729, %v742_v40   ;;  %v1447_v0 = vmul.f32 %v4693_v49, %v862_v50  ;;  %v4708_v38 = vunpack.c.l.bf16 %v4994_v25  ;;  %v751_v39 = vsub.f32 1.0, %v623_v26  ;;  %v631_v26 = vld [vmem:[%s7612_s1 + $0x2e8] sm:$0xff] }
  0x9d   :  { %5333 = vmatmul.mubr.msk.f32.gmra.mrb[8].mxu0 %vm1701_vm0, %v1571_v46  ;;  %v750_v40 = vsub.f32 1.0, %v622_v27  ;;  %v4709_v49 = vunpack.c.h.bf16 %v4994_v25  ;;  %v4998_v25 = vld [vmem:[%s7614_s2 + $0x70] sm:$0xff]   ;;  %v630_v27 = vld [vmem:[%s7612_s1 + $0x2e0] sm:$0xff] }
  0x9e   :  { %v1574_v60 = vadd.f32 %v4436_v45, %v1446_v53  ;;  %5335 = vmatprep.mubr.msk.f32.mxu0 %vm1701_vm0, %v1572_v44  ;;  %v1575_v14 = vadd.f32 %v4437_v63, %v1447_v0  ;;  %v4452_v45 = vunpack.c.l.bf16 %v4931_v36  ;;  %v4453_v63 = vunpack.c.h.bf16 %v4931_v36  ;;  %v4935_v36 = vld [vmem:[%s7615_s0 + $0x70] sm:$0xff]  }
  0x9f   :  { %v872_v2 = vpop.permute.xlu1 %871  ;;  %v867_v3 = vpop.permute.xlu0 %866 }
  0xa0   :  { %v1448_v5 = vmul.f32 %v4696_v54, %v867_v3  ;;  %1191 = vperm.xlu1 %5730, %v745_v55   ;;  %1186 = vperm.xlu0 %5729, %v744_v56   ;;  %v1449_v16 = vmul.f32 %v4697_v1, %v872_v2  ;;  %v4712_v54 = vunpack.c.l.bf16 %v4995_v41  ;;  %v753_v55 = vsub.f32 1.0, %v625_v42  ;;  %v633_v42 = vld [vmem:[%s7612_s1 + $0x2f8] sm:$0xff] }
  0xa1   :  { %5336 = vmatmul.mubr.msk.f32.gmra.mrb[10].mxu0 %vm1701_vm0, %v1573_v62  ;;  %v752_v56 = vsub.f32 1.0, %v624_v43  ;;  %v4713_v1 = vunpack.c.h.bf16 %v4995_v41  ;;  %v4999_v41 = vld [vmem:[%s7614_s2 + $0x78] sm:$0xff]   ;;  %v632_v43 = vld [vmem:[%s7612_s1 + $0x2f0] sm:$0xff] }
  0xa2   :  { %v1576_v12 = vadd.f32 %v4440_v61, %v1448_v5  ;;  %5338 = vmatprep.mubr.msk.f32.mxu0 %vm1701_vm0, %v1574_v60  ;;  %v1577_v30 = vadd.f32 %v4441_v15, %v1449_v16  ;;  %v4456_v61 = vunpack.c.l.bf16 %v4932_v52  ;;  %v4457_v15 = vunpack.c.h.bf16 %v4932_v52  ;;  %v4936_v52 = vld [vmem:[%s7615_s0 + $0x78] sm:$0xff]  }
  0xa3   :  { %v882_v18 = vpop.permute.xlu1 %881  ;;  %v877_v19 = vpop.permute.xlu0 %876 }
  0xa4   :  { %v1450_v21 = vmul.f32 %v4700_v6, %v877_v19  ;;  %1201 = vperm.xlu1 %5730, %v747_v7   ;;  %1196 = vperm.xlu0 %5729, %v746_v8   ;;  %v1451_v32 = vmul.f32 %v4701_v17, %v882_v18  ;;  %v4716_v6 = vunpack.c.l.bf16 %v4996_v57  ;;  %v755_v7 = vsub.f32 1.0, %v627_v58  ;;  %v635_v58 = vld [vmem:[%s7612_s1 + $0x308] sm:$0xff] }
  0xa5   :  { %5339 = vmatmul.mubr.msk.f32.gmra.mrb[12].mxu0 %vm1701_vm0, %v1575_v14  ;;  %v754_v8 = vsub.f32 1.0, %v626_v59  ;;  %v4717_v17 = vunpack.c.h.bf16 %v4996_v57  ;;  %v5000_v57 = vld [vmem:[%s7614_s2 + $0x80] sm:$0xff]  }
  0xa6   :  { %v1578_v28 = vadd.f32 %v4444_v13, %v1450_v21  ;;  %5341 = vmatprep.mubr.msk.f32.mxu0 %vm1701_vm0, %v1576_v12  ;;  %v1579_v46 = vadd.f32 %v4445_v31, %v1451_v32  ;;  %v4460_v13 = vunpack.c.l.bf16 %v4933_v4  ;;  %v4461_v31 = vunpack.c.h.bf16 %v4933_v4  ;;  %v634_v59 = vld [vmem:[%s7612_s1 + $0x300] sm:$0xff] }
  0xa7   :  { %v892_v34 = vpop.permute.xlu1 %891  ;;  %v887_v35 = vpop.permute.xlu0 %886  ;;  %v4937_v4 = vld [vmem:[%s7615_s0 + $0x80] sm:$0xff]  }
  0xa8   :  { %v1452_v37 = vmul.f32 %v4704_v22, %v887_v35  ;;  %1211 = vperm.xlu1 %5730, %v749_v23   ;;  %1206 = vperm.xlu0 %5729, %v748_v24   ;;  %v1453_v48 = vmul.f32 %v4705_v33, %v892_v34  ;;  %v4720_v22 = vunpack.c.l.bf16 %v4997_v9  ;;  %v757_v23 = vsub.f32 1.0, %v629_v10  ;;  %v637_v10 = vld [vmem:[%s7612_s1 + $0x318] sm:$0xff] }
  0xa9   :  { %5342 = vmatmul.mubr.msk.f32.gmra.mrb[14].mxu0 %vm1701_vm0, %v1577_v30  ;;  %v756_v24 = vsub.f32 1.0, %v628_v11  ;;  %v4721_v33 = vunpack.c.h.bf16 %v4997_v9  ;;  %v5001_v9 = vld [vmem:[%s7614_s2 + $0x88] sm:$0xff]   ;;  %v636_v11 = vld [vmem:[%s7612_s1 + $0x310] sm:$0xff] }
  0xaa   :  { %v1580_v44 = vadd.f32 %v4448_v29, %v1452_v37  ;;  %5344 = vmatprep.mubr.msk.f32.mxu0 %vm1701_vm0, %v1578_v28  ;;  %v1581_v62 = vadd.f32 %v4449_v47, %v1453_v48  ;;  %v4464_v29 = vunpack.c.l.bf16 %v4934_v20  ;;  %v4465_v47 = vunpack.c.h.bf16 %v4934_v20  ;;  %v4938_v20 = vld [vmem:[%s7615_s0 + $0x88] sm:$0xff]  }
  0xab   :  { %v902_v50 = vpop.permute.xlu1 %901  ;;  %v897_v51 = vpop.permute.xlu0 %896 }
  0xac   :  { %v1454_v53 = vmul.f32 %v4708_v38, %v897_v51  ;;  %1221 = vperm.xlu1 %5730, %v751_v39   ;;  %1216 = vperm.xlu0 %5729, %v750_v40   ;;  %v1455_v0 = vmul.f32 %v4709_v49, %v902_v50  ;;  %v4724_v38 = vunpack.c.l.bf16 %v4998_v25  ;;  %v759_v39 = vsub.f32 1.0, %v631_v26  ;;  %v639_v26 = vld [vmem:[%s7612_s1 + $0x328] sm:$0xff] }
  0xad   :  { %5345 = vmatmul.mubr.msk.f32.gmra.mrb[16].mxu0 %vm1701_vm0, %v1579_v46  ;;  %v758_v40 = vsub.f32 1.0, %v630_v27  ;;  %v4725_v49 = vunpack.c.h.bf16 %v4998_v25  ;;  %v5002_v25 = vld [vmem:[%s7614_s2 + $0x90] sm:$0xff]   ;;  %v638_v27 = vld [vmem:[%s7612_s1 + $0x320] sm:$0xff] }
  0xae   :  { %v1582_v60 = vadd.f32 %v4452_v45, %v1454_v53  ;;  %5347 = vmatprep.mubr.msk.f32.mxu0 %vm1701_vm0, %v1580_v44  ;;  %v1583_v14 = vadd.f32 %v4453_v63, %v1455_v0  ;;  %v4468_v45 = vunpack.c.l.bf16 %v4935_v36  ;;  %v4469_v63 = vunpack.c.h.bf16 %v4935_v36  ;;  %v4939_v36 = vld [vmem:[%s7615_s0 + $0x90] sm:$0xff]  }
  0xaf   :  { %v912_v2 = vpop.permute.xlu1 %911  ;;  %v907_v3 = vpop.permute.xlu0 %906 }
  0xb0   :  { %v1456_v5 = vmul.f32 %v4712_v54, %v907_v3  ;;  %1231 = vperm.xlu1 %5730, %v753_v55   ;;  %1226 = vperm.xlu0 %5729, %v752_v56   ;;  %v1457_v16 = vmul.f32 %v4713_v1, %v912_v2  ;;  %v4728_v54 = vunpack.c.l.bf16 %v4999_v41  ;;  %v761_v55 = vsub.f32 1.0, %v633_v42  ;;  %v641_v42 = vld [vmem:[%s7612_s1 + $0x338] sm:$0xff] }
  0xb1   :  { %5348 = vmatmul.mubr.msk.f32.gmra.mrb[18].mxu0 %vm1701_vm0, %v1581_v62  ;;  %v760_v56 = vsub.f32 1.0, %v632_v43  ;;  %v4729_v1 = vunpack.c.h.bf16 %v4999_v41  ;;  %v5003_v41 = vld [vmem:[%s7614_s2 + $0x98] sm:$0xff]   ;;  %v640_v43 = vld [vmem:[%s7612_s1 + $0x330] sm:$0xff] }
  0xb2   :  { %v1584_v12 = vadd.f32 %v4456_v61, %v1456_v5  ;;  %5350 = vmatprep.mubr.msk.f32.mxu0 %vm1701_vm0, %v1582_v60  ;;  %v1585_v30 = vadd.f32 %v4457_v15, %v1457_v16  ;;  %v4472_v61 = vunpack.c.l.bf16 %v4936_v52  ;;  %v4473_v15 = vunpack.c.h.bf16 %v4936_v52  ;;  %v4940_v52 = vld [vmem:[%s7615_s0 + $0x98] sm:$0xff]  }
  0xb3   :  { %v922_v18 = vpop.permute.xlu1 %921  ;;  %v917_v19 = vpop.permute.xlu0 %916 }
  0xb4   :  { %v1458_v21 = vmul.f32 %v4716_v6, %v917_v19  ;;  %1241 = vperm.xlu1 %5730, %v755_v7   ;;  %1236 = vperm.xlu0 %5729, %v754_v8   ;;  %v1459_v32 = vmul.f32 %v4717_v17, %v922_v18  ;;  %v4732_v6 = vunpack.c.l.bf16 %v5000_v57  ;;  %v763_v7 = vsub.f32 1.0, %v635_v58  ;;  %v643_v58 = vld [vmem:[%s7612_s1 + $0x348] sm:$0xff] }
  0xb5   :  { %5351 = vmatmul.mubr.msk.f32.gmra.mrb[20].mxu0 %vm1701_vm0, %v1583_v14  ;;  %v762_v8 = vsub.f32 1.0, %v634_v59  ;;  %v4733_v17 = vunpack.c.h.bf16 %v5000_v57  ;;  %v5004_v57 = vld [vmem:[%s7614_s2 + $0xa0] sm:$0xff]  }
  0xb6   :  { %v1586_v28 = vadd.f32 %v4460_v13, %v1458_v21  ;;  %5353 = vmatprep.mubr.msk.f32.mxu0 %vm1701_vm0, %v1584_v12  ;;  %v1587_v46 = vadd.f32 %v4461_v31, %v1459_v32  ;;  %v4476_v13 = vunpack.c.l.bf16 %v4937_v4  ;;  %v4477_v31 = vunpack.c.h.bf16 %v4937_v4  ;;  %v642_v59 = vld [vmem:[%s7612_s1 + $0x340] sm:$0xff] }
  0xb7   :  { %v932_v34 = vpop.permute.xlu1 %931  ;;  %v927_v35 = vpop.permute.xlu0 %926  ;;  %v4941_v4 = vld [vmem:[%s7615_s0 + $0xa0] sm:$0xff]  }
  0xb8   :  { %v1460_v37 = vmul.f32 %v4720_v22, %v927_v35  ;;  %1251 = vperm.xlu1 %5730, %v757_v23   ;;  %1246 = vperm.xlu0 %5729, %v756_v24   ;;  %v1461_v48 = vmul.f32 %v4721_v33, %v932_v34  ;;  %v4736_v22 = vunpack.c.l.bf16 %v5001_v9  ;;  %v765_v23 = vsub.f32 1.0, %v637_v10  ;;  %v645_v10 = vld [vmem:[%s7612_s1 + $0x358] sm:$0xff] }
  0xb9   :  { %5354 = vmatmul.mubr.msk.f32.gmra.mrb[22].mxu0 %vm1701_vm0, %v1585_v30  ;;  %v764_v24 = vsub.f32 1.0, %v636_v11  ;;  %v4737_v33 = vunpack.c.h.bf16 %v5001_v9  ;;  %v5005_v9 = vld [vmem:[%s7614_s2 + $0xa8] sm:$0xff]   ;;  %v644_v11 = vld [vmem:[%s7612_s1 + $0x350] sm:$0xff] }
  0xba   :  { %v1588_v44 = vadd.f32 %v4464_v29, %v1460_v37  ;;  %5356 = vmatprep.mubr.msk.f32.mxu0 %vm1701_vm0, %v1586_v28  ;;  %v1589_v62 = vadd.f32 %v4465_v47, %v1461_v48  ;;  %v4480_v29 = vunpack.c.l.bf16 %v4938_v20  ;;  %v4481_v47 = vunpack.c.h.bf16 %v4938_v20  ;;  %v4942_v20 = vld [vmem:[%s7615_s0 + $0xa8] sm:$0xff]  }
  0xbb   :  { %v942_v50 = vpop.permute.xlu1 %941  ;;  %v937_v51 = vpop.permute.xlu0 %936 }
  0xbc   :  { %v1462_v53 = vmul.f32 %v4724_v38, %v937_v51  ;;  %1261 = vperm.xlu1 %5730, %v759_v39   ;;  %1256 = vperm.xlu0 %5729, %v758_v40   ;;  %v1463_v0 = vmul.f32 %v4725_v49, %v942_v50  ;;  %v4740_v38 = vunpack.c.l.bf16 %v5002_v25  ;;  %v767_v39 = vsub.f32 1.0, %v639_v26  ;;  %v647_v26 = vld [vmem:[%s7612_s1 + $0x368] sm:$0xff] }
  0xbd   :  { %5357 = vmatmul.mubr.msk.f32.gmra.mrb[24].mxu0 %vm1701_vm0, %v1587_v46  ;;  %v766_v40 = vsub.f32 1.0, %v638_v27  ;;  %v4741_v49 = vunpack.c.h.bf16 %v5002_v25  ;;  %v5006_v25 = vld [vmem:[%s7614_s2 + $0xb0] sm:$0xff]   ;;  %v646_v27 = vld [vmem:[%s7612_s1 + $0x360] sm:$0xff] }
  0xbe   :  { %v1590_v60 = vadd.f32 %v4468_v45, %v1462_v53  ;;  %5359 = vmatprep.mubr.msk.f32.mxu0 %vm1701_vm0, %v1588_v44  ;;  %v1591_v14 = vadd.f32 %v4469_v63, %v1463_v0  ;;  %v4484_v45 = vunpack.c.l.bf16 %v4939_v36  ;;  %v4485_v63 = vunpack.c.h.bf16 %v4939_v36  ;;  %v6292_v36 = vld [vmem:[%s7615_s0 + $0xb0] sm:$0xff]  }
  0xbf   :  { %v952_v2 = vpop.permute.xlu1 %951  ;;  %v947_v3 = vpop.permute.xlu0 %946 }
  0xc0   :  { %v1464_v5 = vmul.f32 %v4728_v54, %v947_v3  ;;  %1271 = vperm.xlu1 %5730, %v761_v55   ;;  %1266 = vperm.xlu0 %5729, %v760_v56   ;;  %v1465_v16 = vmul.f32 %v4729_v1, %v952_v2  ;;  %v4744_v54 = vunpack.c.l.bf16 %v5003_v41  ;;  %v769_v55 = vsub.f32 1.0, %v641_v42  ;;  %v649_v42 = vld [vmem:[%s7612_s1 + $0x378] sm:$0xff] }
  0xc1   :  { %5360 = vmatmul.mubr.msk.f32.gmra.mrb[26].mxu0 %vm1701_vm0, %v1589_v62  ;;  %v768_v56 = vsub.f32 1.0, %v640_v43  ;;  %v4745_v1 = vunpack.c.h.bf16 %v5003_v41  ;;  %v5007_v41 = vld [vmem:[%s7614_s2 + $0xb8] sm:$0xff]   ;;  %v648_v43 = vld [vmem:[%s7612_s1 + $0x370] sm:$0xff] }
  0xc2   :  { %v1592_v12 = vadd.f32 %v4472_v61, %v1464_v5  ;;  %5362 = vmatprep.mubr.msk.f32.mxu0 %vm1701_vm0, %v1590_v60  ;;  %v1593_v30 = vadd.f32 %v4473_v15, %v1465_v16  ;;  %v4488_v61 = vunpack.c.l.bf16 %v4940_v52  ;;  %v4489_v15 = vunpack.c.h.bf16 %v4940_v52  ;;  %v6309_v52 = vld [vmem:[%s7615_s0 + $0xb8] sm:$0xff]  }
  0xc3   :  { %v962_v18 = vpop.permute.xlu1 %961  ;;  %v957_v19 = vpop.permute.xlu0 %956 }
  0xc4   :  { %v1466_v21 = vmul.f32 %v4732_v6, %v957_v19  ;;  %1281 = vperm.xlu1 %5730, %v763_v7   ;;  %1276 = vperm.xlu0 %5729, %v762_v8   ;;  %v1467_v32 = vmul.f32 %v4733_v17, %v962_v18  ;;  %v4748_v6 = vunpack.c.l.bf16 %v5004_v57  ;;  %v771_v7 = vsub.f32 1.0, %v643_v58  ;;  %v2920_v58 = vld [vmem:[%s7616_s5 + $0x8] sm:$0xff] }
  0xc5   :  { %5363 = vmatmul.mubr.msk.f32.gmra.mrb[28].mxu0 %vm1701_vm0, %v1591_v14  ;;  %v770_v8 = vsub.f32 1.0, %v642_v59  ;;  %v4749_v17 = vunpack.c.h.bf16 %v5004_v57  ;;  %v2919_v57 = vld [vmem:[%s7616_s5] sm:$0xff] }
  0xc6   :  { %v1594_v28 = vadd.f32 %v4476_v13, %v1466_v21  ;;  %5365 = vmatprep.mubr.msk.f32.mxu0 %vm1701_vm0, %v1592_v12  ;;  %v1595_v46 = vadd.f32 %v4477_v31, %v1467_v32  ;;  %v4492_v13 = vunpack.c.l.bf16 %v4941_v4  ;;  %v4493_v31 = vunpack.c.h.bf16 %v4941_v4  ;;  %v5008_v59 = vld [vmem:[%s7614_s2 + $0xc0] sm:$0xff]  }
  0xc7   :  { %v972_v34 = vpop.permute.xlu1 %971  ;;  %v967_v35 = vpop.permute.xlu0 %966  ;;  %v4761_v4 = vunpack.c.h.bf16 %v5007_v41 }
  0xc8   :  { %v1468_v37 = vmul.f32 %v4736_v22, %v967_v35  ;;  %1291 = vperm.xlu1 %5730, %v765_v23   ;;  %1286 = vperm.xlu0 %5729, %v764_v24   ;;  %v1469_v48 = vmul.f32 %v4737_v33, %v972_v34  ;;  %v4752_v22 = vunpack.c.l.bf16 %v5005_v9  ;;  %v773_v23 = vsub.f32 1.0, %v645_v10 }
  0xc9   :  { %5366 = vmatmul.mubr.msk.f32.gmra.mrb[30].mxu0 %vm1701_vm0, %v1593_v30  ;;  %v772_v24 = vsub.f32 1.0, %v644_v11  ;;  %v4753_v33 = vunpack.c.h.bf16 %v5005_v9  ;;  %v4764_v9 = vunpack.c.l.bf16 %v5008_v59 }
  0xca   :  { %v1596_v44 = vadd.f32 %v4480_v29, %v1468_v37  ;;  %5368 = vmatprep.mubr.msk.f32.mxu0 %vm1701_vm0, %v1594_v28  ;;  %v1597_v62 = vadd.f32 %v4481_v47, %v1469_v48  ;;  %v4496_v29 = vunpack.c.l.bf16 %v4942_v20  ;;  %v4497_v47 = vunpack.c.h.bf16 %v4942_v20 }
  0xcb   :  { %v982_v50 = vpop.permute.xlu1 %981  ;;  %v977_v51 = vpop.permute.xlu0 %976 }
  0xcc   :  { %v1470_v53 = vmul.f32 %v4740_v38, %v977_v51  ;;  %1301 = vperm.xlu1 %5730, %v767_v39   ;;  %1296 = vperm.xlu0 %5729, %v766_v40   ;;  %v1471_v0 = vmul.f32 %v4741_v49, %v982_v50  ;;  %v4756_v38 = vunpack.c.l.bf16 %v5006_v25  ;;  %v775_v39 = vsub.f32 1.0, %v647_v26  ;;  %v4946_v26 = vld [vmem:[%s7615_s0 + $0xc8] sm:$0xff]  }
  0xcd   :  { %5369 = vmatmul.mubr.msk.f32.gmra.mrb[32].mxu0 %vm1701_vm0, %v1595_v46  ;;  %v774_v40 = vsub.f32 1.0, %v646_v27  ;;  %v4757_v49 = vunpack.c.h.bf16 %v5006_v25 }
  0xce   :  { %v1598_v60 = vadd.f32 %v4484_v45, %v1470_v53  ;;  %5371 = vmatprep.mubr.msk.f32.mxu0 %vm1701_vm0, %v1596_v44  ;;  %v1599_v14 = vadd.f32 %v4485_v63, %v1471_v0  ;;  %v4500_v45 = vunpack.c.l.bf16 %v6292_v36  ;;  %v4504_v0 = vunpack.c.l.bf16 %v6309_v52 }
  0xcf   :  { %v992_v2 = vpop.permute.xlu1 %991  ;;  %v987_v3 = vpop.permute.xlu0 %986 }
  0xd0   :  { %v1472_v5 = vmul.f32 %v4744_v54, %v987_v3  ;;  %1311 = vperm.xlu1 %5730, %v769_v55   ;;  %1306 = vperm.xlu0 %5729, %v768_v56   ;;  %v1473_v16 = vmul.f32 %v4745_v1, %v992_v2  ;;  %v4760_v54 = vunpack.c.l.bf16 %v5007_v41  ;;  %v777_v55 = vsub.f32 1.0, %v649_v42  ;;  %v4947_v42 = vld [vmem:[%s7615_s0 + $0xd0] sm:$0xff]  }
  0xd1   :  { %5372 = vmatmul.mubr.msk.f32.gmra.mrb[34].mxu0 %vm1701_vm0, %v1597_v62  ;;  %v776_v56 = vsub.f32 1.0, %v648_v43  ;;  %v5720_v62 = vpack.c.bf16 %v2920_v58, %v2919_v57  ;;  %v4501_v2 = vunpack.c.h.bf16 %v6292_v36  ;;  %v4948_v58 = vld [vmem:[%s7615_s0 + $0xd8] sm:$0xff]  }
  0xd2   :  { %v1600_v12 = vadd.f32 %v4488_v61, %v1472_v5  ;;  %5374 = vmatprep.mubr.msk.f32.mxu0 %vm1701_vm0, %v1598_v60  ;;  %v1601_v30 = vadd.f32 %v4489_v15, %v1473_v16  ;;  %v651_v60 = vld [vmem:[%s7612_s1 + $0x388] sm:$0xff]  ;;  %v650_v61 = vld [vmem:[%s7612_s1 + $0x380] sm:$0xff]  ;;  %v653_v15 = vld [vmem:[%s7612_s1 + $0x398] sm:$0xff] }
  0xd3   :  { %v1002_v18 = vpop.permute.xlu1 %1001  ;;  %v997_v19 = vpop.permute.xlu0 %996  ;;  %5721 = vmatprep.subr.bf16.mxu1 %v5720_v62  ;;  %v779_v10 = vsub.f32 1.0, %v651_v60  ;;  %v778_v11 = vsub.f32 1.0, %v650_v61  ;;  %v652_v16 = vld [vmem:[%s7612_s1 + $0x390] sm:$0xff] }
  0xd4   :  { %v1474_v21 = vmul.f32 %v4748_v6, %v997_v19  ;;  %1321 = vperm.xlu1 %5730, %v771_v7   ;;  %1316 = vperm.xlu0 %5729, %v770_v8   ;;  %v1475_v32 = vmul.f32 %v4749_v17, %v1002_v18  ;;  %v4945_v7 = vld [vmem:[%s7615_s0 + $0xc0] sm:$0xff]  }
  0xd5   :  { %5375 = vmatmul.mubr.msk.f32.gmra.mrb[36].mxu0 %vm1701_vm0, %v1599_v14  ;;  %v5009_v14 = vld [vmem:[%s7614_s2 + $0xc8] sm:$0xff]   ;;  %5723 = vmatpush3.bf16.msra.mxu1 %v5720_v62  ;;  %v4508_v19 = vunpack.c.l.bf16 %v4945_v7 }
  0xd6   :  { %v1602_v28 = vadd.f32 %v4492_v13, %v1474_v21  ;;  %5377 = vmatprep.mubr.msk.f32.mxu0 %vm1701_vm0, %v1600_v12  ;;  %v1603_v46 = vadd.f32 %v4493_v31, %v1475_v32  ;;  %v2921_v12 = vld [vmem:[%s7616_s5 + $0x10] sm:$0xff]  ;;  %v2922_v13 = vld [vmem:[%s7616_s5 + $0x18] sm:$0xff]  ;;  %v4505_v21 = vunpack.c.h.bf16 %v6309_v52  ;;  %v655_v32 = vld [vmem:[%s7612_s1 + $0x3a8] sm:$0xff] }
  0xd7   :  { %v1012_v34 = vpop.permute.xlu1 %1011  ;;  %v1007_v35 = vpop.permute.xlu0 %1006  ;;  %v5724_v17 = vpack.c.bf16 %v2922_v13, %v2921_v12  ;;  %v5010_v31 = vld [vmem:[%s7614_s2 + $0xd0] sm:$0xff]  }
  0xd8   :  { %v1476_v37 = vmul.f32 %v4752_v22, %v1007_v35  ;;  %1331 = vperm.xlu1 %5730, %v773_v23   ;;  %1326 = vperm.xlu0 %5729, %v772_v24   ;;  %v1477_v48 = vmul.f32 %v4753_v33, %v1012_v34  ;;  %v4765_v23 = vunpack.c.h.bf16 %v5008_v59  ;;  %v654_v33 = vld [vmem:[%s7612_s1 + $0x3a0] sm:$0xff]  ;;  %v4512_v35 = vunpack.c.l.bf16 %v4946_v26 }
  0xd9   :  { %5378 = vmatmul.mubr.msk.f32.gmra.mrb[38].mxu0 %vm1701_vm0, %v1601_v30  ;;  %5725 = vmatprep.subr.bf16.mxu1 %v5724_v17  ;;  %v780_v30 = vsub.f32 1.0, %v652_v16  ;;  %v661_v16 = vld [vmem:[%s7612_s1 + $0x3d8] sm:$0xff] }
  0xda   :  { %v1604_v44 = vadd.f32 %v4496_v29, %v1476_v37  ;;  %5380 = vmatprep.mubr.msk.f32.mxu0 %vm1701_vm0, %v1602_v28  ;;  %v1605_v1 = vadd.f32 %v4497_v47, %v1477_v48  ;;  %v4768_v28 = vunpack.c.l.bf16 %v5009_v14  ;;  %v781_v29 = vsub.f32 1.0, %v653_v15  ;;  %5727 = vmatpush3.bf16.msra.mxu1 %v5724_v17  ;;  %v5011_v47 = vld [vmem:[%s7614_s2 + $0xd8] sm:$0xff]   ;;  %v5013_v15 = vld [vmem:[%s7614_s2 + $0xe8] sm:$0xff]   ;;  %v660_v17 = vld [vmem:[%s7612_s1 + $0x3d0] sm:$0xff] }
  0xdb   :  { %v1022_v50 = vpop.permute.xlu1 %1021  ;;  %v1017_v51 = vpop.permute.xlu0 %1016  ;;  %v4509_v37 = vunpack.c.h.bf16 %v4945_v7  ;;  %v657_v48 = vld [vmem:[%s7612_s1 + $0x3b8] sm:$0xff]  ;;  %v4776_v60 = vunpack.c.l.bf16 %v5011_v47  ;;  %v4777_v7 = vunpack.c.h.bf16 %v5011_v47 }
  0xdc   :  { %v1478_v53 = vmul.f32 %v4756_v38, %v1017_v51  ;;  %1341 = vperm.xlu1 %5730, %v775_v39   ;;  %1336 = vperm.xlu0 %5729, %v774_v40   ;;  %v1479_v3 = vmul.f32 %v4757_v49, %v1022_v50  ;;  %v4769_v39 = vunpack.c.h.bf16 %v5009_v14  ;;  %v656_v49 = vld [vmem:[%s7612_s1 + $0x3b0] sm:$0xff]  ;;  %v4516_v51 = vunpack.c.l.bf16 %v4947_v42  ;;  %v5015_v47 = vld [vmem:[%s7614_s2 + $0xf8] sm:$0xff]  }
  0xdd   :  { %5381 = vmatmul.mubr.msk.f32.gmra.mrb[40].mxu0 %vm1701_vm0, %v1603_v46  ;;  %v782_v46 = vsub.f32 1.0, %v654_v33  ;;  %v785_v61 = vsub.f32 1.0, %v657_v48  ;;  %v784_v62 = vsub.f32 1.0, %v656_v49  ;;  %v662_v33 = vld [vmem:[%s7612_s1 + $0x3e0] sm:$0xff]  ;;  %v665_v48 = vld [vmem:[%s7612_s1 + $0x3f8] sm:$0xff]  ;;  %v664_v49 = vld [vmem:[%s7612_s1 + $0x3f0] sm:$0xff] }
  0xde   :  { %v1606_v63 = vadd.f32 %v4500_v45, %v1478_v53  ;;  %5383 = vmatprep.mubr.msk.f32.mxu0 %vm1701_vm0, %v1604_v44  ;;  %v1607_v20 = vadd.f32 %v4501_v2, %v1479_v3  ;;  %v4772_v44 = vunpack.c.l.bf16 %v5010_v31  ;;  %v783_v45 = vsub.f32 1.0, %v655_v32  ;;  %v663_v32 = vld [vmem:[%s7612_s1 + $0x3e8] sm:$0xff] }
  0xdf   :  { %v1032_v5 = vpop.permute.xlu1 %1031  ;;  %v1027_v6 = vpop.permute.xlu0 %1026  ;;  %v4513_v53 = vunpack.c.h.bf16 %v4946_v26  ;;  %v4520_v3 = vunpack.c.l.bf16 %v4948_v58  ;;  %v4950_v26 = vld [vmem:[%s7615_s0 + $0xe8] sm:$0xff]  }
  0xe0   :  { %v1480_v8 = vmul.f32 %v4760_v54, %v1027_v6  ;;  %1351 = vperm.xlu1 %5730, %v777_v55   ;;  %1346 = vperm.xlu0 %5729, %v776_v56   ;;  %v1481_v22 = vmul.f32 %v4761_v4, %v1032_v5  ;;  %v4773_v55 = vunpack.c.h.bf16 %v5010_v31  ;;  %v4517_v5 = vunpack.c.h.bf16 %v4947_v42  ;;  %v5014_v31 = vld [vmem:[%s7614_s2 + $0xf0] sm:$0xff]  }
  0xe1   :  { %5384 = vmatmul.mubr.msk.f32.gmra.mrb[42].mxu0 %vm1701_vm0, %v1605_v1  ;;  %v658_v1 = vld [vmem:[%s7612_s1 + $0x3c0] sm:$0xff]  ;;  %v4951_v42 = vld [vmem:[%s7615_s0 + $0xf0] sm:$0xff]  }
  0xe2   :  { %v1608_v18 = vadd.f32 %v4504_v0, %v1480_v8  ;;  %5386 = vmatprep.mubr.msk.f32.mxu0 %vm1701_vm0, %v1606_v63  ;;  %v1609_v36 = vadd.f32 %v4505_v21, %v1481_v22  ;;  %v5012_v63 = vld [vmem:[%s7614_s2 + $0xe0] sm:$0xff]   ;;  %v659_v0 = vld [vmem:[%s7612_s1 + $0x3c8] sm:$0xff]  ;;  %v786_v14 = vsub.f32 1.0, %v658_v1  ;;  %v4521_v21 = vunpack.c.h.bf16 %v4948_v58  ;;  %v4952_v58 = vld [vmem:[%s7615_s0 + $0xf8] sm:$0xff]  }
  0xe3   :  { %v1042_v24 = vpop.permute.xlu1 %1041  ;;  %v1037_v25 = vpop.permute.xlu0 %1036  ;;  %v4780_v12 = vunpack.c.l.bf16 %v5012_v63  ;;  %v787_v13 = vsub.f32 1.0, %v659_v0  ;;  %v4536_v1 = vunpack.c.l.bf16 %v4952_v58 }
  0xe4   :  { %v1482_v27 = vmul.f32 %v4764_v9, %v1037_v25  ;;  %1361 = vperm.xlu1 %5730, %v779_v10   ;;  %1356 = vperm.xlu0 %5729, %v778_v11   ;;  %v1483_v38 = vmul.f32 %v4765_v23, %v1042_v24  ;;  %v4949_v10 = vld [vmem:[%s7615_s0 + $0xe0] sm:$0xff]   ;;  %v4781_v23 = vunpack.c.h.bf16 %v5012_v63 }
  0xe5   :  { %5387 = vmatmul.mubr.msk.f32.gmra.mrb[44].mxu0 %vm1701_vm0, %v1607_v20  ;;  %v5016_v63 = vld [vmem:[%s7614_s2 + $0x100] sm:$0xff]  }
  0xe6   :  { %v1610_v34 = vadd.f32 %v4508_v19, %v1482_v27  ;;  %5389 = vmatprep.mubr.msk.f32.mxu0 %vm1701_vm0, %v1608_v18  ;;  %v1611_v52 = vadd.f32 %v4509_v37, %v1483_v38  ;;  %v4524_v19 = vunpack.c.l.bf16 %v4949_v10  ;;  %v4525_v37 = vunpack.c.h.bf16 %v4949_v10 }
  0xe7   :  { %v1052_v40 = vpop.permute.xlu1 %1051  ;;  %v1047_v41 = vpop.permute.xlu0 %1046  ;;  %v4796_v10 = vunpack.c.l.bf16 %v5016_v63 }
  0xe8   :  { %v1484_v43 = vmul.f32 %v4768_v28, %v1047_v41  ;;  %1371 = vperm.xlu1 %5730, %v781_v29   ;;  %1366 = vperm.xlu0 %5729, %v780_v30   ;;  %v1485_v54 = vmul.f32 %v4769_v39, %v1052_v40  ;;  %v4784_v28 = vunpack.c.l.bf16 %v5013_v15  ;;  %v789_v29 = vsub.f32 1.0, %v661_v16 }
  0xe9   :  { %5390 = vmatmul.mubr.msk.f32.gmra.mrb[46].mxu0 %vm1701_vm0, %v1609_v36  ;;  %v788_v30 = vsub.f32 1.0, %v660_v17  ;;  %v4785_v39 = vunpack.c.h.bf16 %v5013_v15  ;;  %v4537_v15 = vunpack.c.h.bf16 %v4952_v58  ;;  %v4797_v17 = vunpack.c.h.bf16 %v5016_v63 }
  0xea   :  { %v1612_v50 = vadd.f32 %v4512_v35, %v1484_v43  ;;  %5392 = vmatprep.mubr.msk.f32.mxu0 %vm1701_vm0, %v1610_v34  ;;  %v1613_v4 = vadd.f32 %v4513_v53, %v1485_v54  ;;  %v4528_v35 = vunpack.c.l.bf16 %v4950_v26  ;;  %v4529_v53 = vunpack.c.h.bf16 %v4950_v26 }
  0xeb   :  { %v1062_v56 = vpop.permute.xlu1 %1061  ;;  %v1057_v57 = vpop.permute.xlu0 %1056 }
  0xec   :  { %v1486_v59 = vmul.f32 %v4772_v44, %v1057_v57  ;;  %1381 = vperm.xlu1 %5730, %v783_v45   ;;  %1376 = vperm.xlu0 %5729, %v782_v46   ;;  %v1487_v6 = vmul.f32 %v4773_v55, %v1062_v56  ;;  %v4788_v44 = vunpack.c.l.bf16 %v5014_v31  ;;  %v791_v45 = vsub.f32 1.0, %v663_v32  ;;  %v4955_v32 = vld [vmem:[%s7615_s0 + $0x110] sm:$0xff]  }
  0xed   :  { %5393 = vmatmul.mubr.msk.f32.gmra.mrb[48].mxu0 %vm1701_vm0, %v1611_v52  ;;  %v790_v46 = vsub.f32 1.0, %v662_v33  ;;  %v4789_v55 = vunpack.c.h.bf16 %v5014_v31 }
  0xee   :  { %v1614_v2 = vadd.f32 %v4516_v51, %v1486_v59  ;;  %5395 = vmatprep.mubr.msk.f32.mxu0 %vm1701_vm0, %v1612_v50  ;;  %v1615_v20 = vadd.f32 %v4517_v5, %v1487_v6  ;;  %v4532_v51 = vunpack.c.l.bf16 %v4951_v42  ;;  %v4793_v5 = vunpack.c.h.bf16 %v5015_v47 }
  0xef   :  { %v1072_v8 = vpop.permute.xlu1 %1071  ;;  %v1067_v9 = vpop.permute.xlu0 %1066 }
  0xf0   :  { %v1488_v11 = vmul.f32 %v4776_v60, %v1067_v9  ;;  %1391 = vperm.xlu1 %5730, %v785_v61   ;;  %1386 = vperm.xlu0 %5729, %v784_v62   ;;  %v1489_v22 = vmul.f32 %v4777_v7, %v1072_v8  ;;  %v4792_v60 = vunpack.c.l.bf16 %v5015_v47  ;;  %v793_v61 = vsub.f32 1.0, %v665_v48  ;;  %v4953_v8 = vld [vmem:[%s7615_s0 + $0x100] sm:$0xff]  }
  0xf1   :  { %5396 = vmatmul.mubr.msk.f32.gmra.mrb[50].mxu0 %vm1701_vm0, %v1613_v4  ;;  %v792_v62 = vsub.f32 1.0, %v664_v49  ;;  %v5020_v47 = vld [vmem:[%s7614_s2 + $0x120] sm:$0xff]  }
  0xf2   :  { %v1616_v18 = vadd.f32 %v4520_v3, %v1488_v11  ;;  %5398 = vmatprep.mubr.msk.f32.mxu0 %vm1701_vm0, %v1614_v2  ;;  %v1617_v36 = vadd.f32 %v4521_v21, %v1489_v22  ;;  %v4533_v3 = vunpack.c.h.bf16 %v4951_v42  ;;  %v5017_v11 = vld [vmem:[%s7614_s2 + $0x108] sm:$0xff]   ;;  %v4812_v58 = vunpack.c.l.bf16 %v5020_v47 }
  0xf3   :  { %v1082_v24 = vpop.permute.xlu1 %1081  ;;  %v1077_v25 = vpop.permute.xlu0 %1076  ;;  %v4800_v22 = vunpack.c.l.bf16 %v5017_v11 }
  0xf4   :  { %v1490_v27 = vmul.f32 %v4780_v12, %v1077_v25  ;;  %1401 = vperm.xlu1 %5730, %v787_v13   ;;  %1396 = vperm.xlu0 %5729, %v786_v14   ;;  %v1491_v38 = vmul.f32 %v4781_v23, %v1082_v24  ;;  %v4540_v13 = vunpack.c.l.bf16 %v4953_v8  ;;  %v5018_v23 = vld [vmem:[%s7614_s2 + $0x110] sm:$0xff]  }
  0xf5   :  { %5399 = vmatmul.mubr.msk.f32.gmra.mrb[52].mxu0 %vm1701_vm0, %v1615_v20  ;;  %v4954_v20 = vld [vmem:[%s7615_s0 + $0x108] sm:$0xff]  }
  0xf6   :  { %v1618_v34 = vadd.f32 %v4524_v19, %v1490_v27  ;;  %5401 = vmatprep.mubr.msk.f32.mxu0 %vm1701_vm0, %v1616_v18  ;;  %v1619_v52 = vadd.f32 %v4525_v37, %v1491_v38  ;;  %v4544_v25 = vunpack.c.l.bf16 %v4954_v20  ;;  %v4541_v27 = vunpack.c.h.bf16 %v4953_v8 }
  0xf7   :  { %v1092_v40 = vpop.permute.xlu1 %1091  ;;  %v1087_v41 = vpop.permute.xlu0 %1086  ;;  %v4548_v37 = vunpack.c.l.bf16 %v4955_v32 }
  0xf8   :  { %v1492_v43 = vmul.f32 %v4784_v28, %v1087_v41  ;;  %1411 = vperm.xlu1 %5730, %v789_v29   ;;  %1406 = vperm.xlu0 %5729, %v788_v30   ;;  %v1493_v54 = vmul.f32 %v4785_v39, %v1092_v40  ;;  %v4801_v29 = vunpack.c.h.bf16 %v5017_v11  ;;  %v4545_v39 = vunpack.c.h.bf16 %v4954_v20 }
  0xf9   :  { %5402 = vmatmul.mubr.msk.f32.gmra.mrb[54].mxu0 %vm1701_vm0, %v1617_v36  ;;  %v4805_v41 = vunpack.c.h.bf16 %v5018_v23 }
  0xfa   :  { %v1620_v50 = vadd.f32 %v4528_v35, %v1492_v43  ;;  %5404 = vmatprep.mubr.msk.f32.mxu0 %vm1701_vm0, %v1618_v34  ;;  %v1621_v2 = vadd.f32 %v4529_v53, %v1493_v54  ;;  %v4804_v34 = vunpack.c.l.bf16 %v5018_v23  ;;  %v5019_v35 = vld [vmem:[%s7614_s2 + $0x118] sm:$0xff]  }
  0xfb   :  { %v1102_v56 = vpop.permute.xlu1 %1101  ;;  %v1097_v57 = vpop.permute.xlu0 %1096  ;;  %v4809_v53 = vunpack.c.h.bf16 %v5019_v35 }
  0xfc   :  { %v1494_v59 = vmul.f32 %v4788_v44, %v1097_v57  ;;  %1421 = vperm.xlu1 %5730, %v791_v45   ;;  %1416 = vperm.xlu0 %5729, %v790_v46   ;;  %v1495_v4 = vmul.f32 %v4789_v55, %v1102_v56  ;;  %v4956_v44 = vld [vmem:[%s7615_s0 + $0x118] sm:$0xff]   ;;  %v4808_v46 = vunpack.c.l.bf16 %v5019_v35  ;;  %v4957_v56 = vld [vmem:[%s7615_s0 + $0x120] sm:$0xff]  }
  0xfd   :  { %5405 = vmatmul.mubr.msk.f32.gmra.mrb[56].mxu0 %vm1701_vm0, %v1619_v52  ;;  %v4552_v49 = vunpack.c.l.bf16 %v4956_v44  ;;  %v4553_v63 = vunpack.c.h.bf16 %v4956_v44  ;;  %v4557_v11 = vunpack.c.h.bf16 %v4957_v56 }
  0xfe   :  { %v1622_v0 = vadd.f32 %v4532_v51, %v1494_v59  ;;  %5407 = vmatprep.mubr.msk.f32.mxu0 %vm1701_vm0, %v1620_v50  ;;  %v1623_v14 = vadd.f32 %v4533_v3, %v1495_v4  ;;  %v4549_v51 = vunpack.c.h.bf16 %v4955_v32  ;;  %v5021_v59 = vld [vmem:[%s7614_s2 + $0x128] sm:$0xff]  }
  0xff   :  { %v1112_v6 = vpop.permute.xlu1 %1111  ;;  %v1107_v7 = vpop.permute.xlu0 %1106  ;;  %v4958_v4 = vld [vmem:[%s7615_s0 + $0x128] sm:$0xff]  }
 0x100   :  { %v1496_v9 = vmul.f32 %v4792_v60, %v1107_v7  ;;  %1431 = vperm.xlu1 %5730, %v793_v61   ;;  %1426 = vperm.xlu0 %5729, %v792_v62   ;;  %v1497_v16 = vmul.f32 %v4793_v5, %v1112_v6  ;;  %v4556_v61 = vunpack.c.l.bf16 %v4957_v56  ;;  %v4816_v6 = vunpack.c.l.bf16 %v5021_v59  ;;  %v5022_v7 = vld [vmem:[%s7614_s2 + $0x130] sm:$0xff]  }
 0x101   :  { %5408 = vmatmul.mubr.msk.f32.gmra.mrb[58].mxu0 %vm1701_vm0, %v1621_v2  ;;  %v4561_v23 = vunpack.c.h.bf16 %v4958_v4 }
 0x102   :  { %v1624_v12 = vadd.f32 %v4536_v1, %v1496_v9  ;;  %5410 = vmatprep.mubr.msk.f32.mxu0 %vm1701_vm0, %v1622_v0  ;;  %v1625_v26 = vadd.f32 %v4537_v15, %v1497_v16  ;;  %v4813_v1 = vunpack.c.h.bf16 %v5020_v47  ;;  %v4560_v9 = vunpack.c.l.bf16 %v4958_v4  ;;  %v4959_v16 = vld [vmem:[%s7615_s0 + $0x130] sm:$0xff]  }
 0x103   :  { %v1122_v18 = vpop.permute.xlu1 %1121  ;;  %v1117_v19 = vpop.permute.xlu0 %1116  ;;  %v4565_v35 = vunpack.c.h.bf16 %v4959_v16 }
 0x104   :  { %v1498_v21 = vmul.f32 %v4796_v10, %v1117_v19  ;;  %v1499_v28 = vmul.f32 %v4797_v17, %v1122_v18  ;;  %v4820_v18 = vunpack.c.l.bf16 %v5022_v7  ;;  %v5023_v19 = vld [vmem:[%s7614_s2 + $0x138] sm:$0xff]  }
 0x105   :  { %5411 = vmatmul.mubr.msk.f32.gmra.mrb[60].mxu0 %vm1701_vm0, %v1623_v14 }
 0x106   :  { %v1626_v24 = vadd.f32 %v4540_v13, %v1498_v21  ;;  %5413 = vmatprep.mubr.msk.f32.mxu0 %vm1701_vm0, %v1624_v12  ;;  %v1627_v38 = vadd.f32 %v4541_v27, %v1499_v28  ;;  %v4817_v13 = vunpack.c.h.bf16 %v5021_v59  ;;  %v4564_v21 = vunpack.c.l.bf16 %v4959_v16  ;;  %v4960_v28 = vld [vmem:[%s7615_s0 + $0x138] sm:$0xff]  }
 0x107   :  { %v1132_v30 = vpop.permute.xlu1 %1131  ;;  %v1127_v31 = vpop.permute.xlu0 %1126  ;;  %v4569_v47 = vunpack.c.h.bf16 %v4960_v28 }
 0x108   :  { %v1500_v33 = vmul.f32 %v4800_v22, %v1127_v31  ;;  %v1501_v40 = vmul.f32 %v4801_v29, %v1132_v30  ;;  %v4824_v30 = vunpack.c.l.bf16 %v5023_v19  ;;  %v5024_v31 = vld [vmem:[%s7614_s2 + $0x140] sm:$0xff]  }
 0x109   :  { %5414 = vmatmul.mubr.msk.f32.gmra.mrb[62].mxu0 %vm1701_vm0, %v1625_v26 }
 0x10a   :  { %v1628_v36 = vadd.f32 %v4544_v25, %v1500_v33  ;;  %5416 = vmatprep.mubr.msk.f32.mxu0 %vm1701_vm0, %v1626_v24  ;;  %v1629_v50 = vadd.f32 %v4545_v39, %v1501_v40  ;;  %v4821_v25 = vunpack.c.h.bf16 %v5022_v7  ;;  %v4568_v33 = vunpack.c.l.bf16 %v4960_v28  ;;  %v4961_v40 = vld [vmem:[%s7615_s0 + $0x140] sm:$0xff]  }
 0x10b   :  { %v1142_v42 = vpop.permute.xlu1 %1141  ;;  %v1137_v43 = vpop.permute.xlu0 %1136  ;;  %v4573_v59 = vunpack.c.h.bf16 %v4961_v40 }
 0x10c   :  { %v1502_v45 = vmul.f32 %v4804_v34, %v1137_v43  ;;  %v1503_v52 = vmul.f32 %v4805_v41, %v1142_v42  ;;  %v4828_v42 = vunpack.c.l.bf16 %v5024_v31  ;;  %v5025_v43 = vld [vmem:[%s7614_s2 + $0x148] sm:$0xff]  }
 0x10d   :  { %5417 = vmatmul.mubr.msk.f32.gmra.mrb[64].mxu0 %vm1701_vm0, %v1627_v38 }
 0x10e   :  { %v1630_v48 = vadd.f32 %v4548_v37, %v1502_v45  ;;  %5419 = vmatprep.mubr.msk.f32.mxu0 %vm1701_vm0, %v1628_v36  ;;  %v1631_v62 = vadd.f32 %v4549_v51, %v1503_v52  ;;  %v4825_v37 = vunpack.c.h.bf16 %v5023_v19  ;;  %v4572_v45 = vunpack.c.l.bf16 %v4961_v40  ;;  %v4962_v52 = vld [vmem:[%s7615_s0 + $0x148] sm:$0xff]  }
 0x10f   :  { %v1152_v54 = vpop.permute.xlu1 %1151  ;;  %v1147_v55 = vpop.permute.xlu0 %1146  ;;  %v4577_v7 = vunpack.c.h.bf16 %v4962_v52 }
 0x110   :  { %v1504_v57 = vmul.f32 %v4808_v46, %v1147_v55  ;;  %v1505_v0 = vmul.f32 %v4809_v53, %v1152_v54  ;;  %v4832_v54 = vunpack.c.l.bf16 %v5025_v43  ;;  %v5026_v55 = vld [vmem:[%s7614_s2 + $0x150] sm:$0xff]  }
 0x111   :  { %5420 = vmatmul.mubr.msk.f32.gmra.mrb[66].mxu0 %vm1701_vm0, %v1629_v50 }
 0x112   :  { %v1632_v60 = vadd.f32 %v4552_v49, %v1504_v57  ;;  %5422 = vmatprep.mubr.msk.f32.mxu0 %vm1701_vm0, %v1630_v48  ;;  %v1633_v10 = vadd.f32 %v4553_v63, %v1505_v0  ;;  %v4829_v49 = vunpack.c.h.bf16 %v5024_v31  ;;  %v4576_v57 = vunpack.c.l.bf16 %v4962_v52  ;;  %v4963_v0 = vld [vmem:[%s7615_s0 + $0x150] sm:$0xff]  }
 0x113   :  { %v1162_v2 = vpop.permute.xlu1 %1161  ;;  %v1157_v3 = vpop.permute.xlu0 %1156  ;;  %v4581_v19 = vunpack.c.h.bf16 %v4963_v0 }
 0x114   :  { %v1506_v5 = vmul.f32 %v4812_v58, %v1157_v3  ;;  %v1507_v12 = vmul.f32 %v4813_v1, %v1162_v2  ;;  %v4836_v2 = vunpack.c.l.bf16 %v5026_v55  ;;  %v5027_v3 = vld [vmem:[%s7614_s2 + $0x158] sm:$0xff]  }
 0x115   :  { %5423 = vmatmul.mubr.msk.f32.gmra.mrb[68].mxu0 %vm1701_vm0, %v1631_v62 }
 0x116   :  { %v1634_v8 = vadd.f32 %v4556_v61, %v1506_v5  ;;  %5425 = vmatprep.mubr.msk.f32.mxu0 %vm1701_vm0, %v1632_v60  ;;  %v1635_v22 = vadd.f32 %v4557_v11, %v1507_v12  ;;  %v4833_v61 = vunpack.c.h.bf16 %v5025_v43  ;;  %v4580_v5 = vunpack.c.l.bf16 %v4963_v0  ;;  %v4964_v12 = vld [vmem:[%s7615_s0 + $0x158] sm:$0xff]  }
 0x117   :  { %v1172_v14 = vpop.permute.xlu1 %1171  ;;  %v1167_v15 = vpop.permute.xlu0 %1166  ;;  %v4585_v31 = vunpack.c.h.bf16 %v4964_v12 }
 0x118   :  { %v1508_v17 = vmul.f32 %v4816_v6, %v1167_v15  ;;  %v1509_v24 = vmul.f32 %v4817_v13, %v1172_v14  ;;  %v4840_v14 = vunpack.c.l.bf16 %v5027_v3  ;;  %v5028_v15 = vld [vmem:[%s7614_s2 + $0x160] sm:$0xff]  }
 0x119   :  { %5426 = vmatmul.mubr.msk.f32.gmra.mrb[70].mxu0 %vm1701_vm0, %v1633_v10 }
 0x11a   :  { %v1636_v20 = vadd.f32 %v4560_v9, %v1508_v17  ;;  %5428 = vmatprep.mubr.msk.f32.mxu0 %vm1701_vm0, %v1634_v8  ;;  %v1637_v34 = vadd.f32 %v4561_v23, %v1509_v24  ;;  %v4837_v9 = vunpack.c.h.bf16 %v5026_v55  ;;  %v4584_v17 = vunpack.c.l.bf16 %v4964_v12  ;;  %v4965_v24 = vld [vmem:[%s7615_s0 + $0x160] sm:$0xff]  }
 0x11b   :  { %v1182_v26 = vpop.permute.xlu1 %1181  ;;  %v1177_v27 = vpop.permute.xlu0 %1176  ;;  %v4589_v43 = vunpack.c.h.bf16 %v4965_v24 }
 0x11c   :  { %v1510_v29 = vmul.f32 %v4820_v18, %v1177_v27  ;;  %v1511_v36 = vmul.f32 %v4821_v25, %v1182_v26  ;;  %v4844_v26 = vunpack.c.l.bf16 %v5028_v15  ;;  %v5029_v27 = vld [vmem:[%s7614_s2 + $0x168] sm:$0xff]  }
 0x11d   :  { %5429 = vmatmul.mubr.msk.f32.gmra.mrb[72].mxu0 %vm1701_vm0, %v1635_v22 }
 0x11e   :  { %v1638_v32 = vadd.f32 %v4564_v21, %v1510_v29  ;;  %5431 = vmatprep.mubr.msk.f32.mxu0 %vm1701_vm0, %v1636_v20  ;;  %v1639_v46 = vadd.f32 %v4565_v35, %v1511_v36  ;;  %v4841_v21 = vunpack.c.h.bf16 %v5027_v3  ;;  %v4588_v29 = vunpack.c.l.bf16 %v4965_v24  ;;  %v4966_v36 = vld [vmem:[%s7615_s0 + $0x168] sm:$0xff]  }
 0x11f   :  { %v1192_v38 = vpop.permute.xlu1 %1191  ;;  %v1187_v39 = vpop.permute.xlu0 %1186  ;;  %v4593_v55 = vunpack.c.h.bf16 %v4966_v36 }
 0x120   :  { %v1512_v41 = vmul.f32 %v4824_v30, %v1187_v39  ;;  %v1513_v48 = vmul.f32 %v4825_v37, %v1192_v38  ;;  %v4848_v38 = vunpack.c.l.bf16 %v5029_v27  ;;  %v5030_v39 = vld [vmem:[%s7614_s2 + $0x170] sm:$0xff]  }
 0x121   :  { %5432 = vmatmul.mubr.msk.f32.gmra.mrb[74].mxu0 %vm1701_vm0, %v1637_v34 }
 0x122   :  { %v1640_v44 = vadd.f32 %v4568_v33, %v1512_v41  ;;  %5434 = vmatprep.mubr.msk.f32.mxu0 %vm1701_vm0, %v1638_v32  ;;  %v1641_v58 = vadd.f32 %v4569_v47, %v1513_v48  ;;  %v4845_v33 = vunpack.c.h.bf16 %v5028_v15  ;;  %v4592_v41 = vunpack.c.l.bf16 %v4966_v36  ;;  %v4967_v48 = vld [vmem:[%s7615_s0 + $0x170] sm:$0xff]  }
 0x123   :  { %v1202_v50 = vpop.permute.xlu1 %1201  ;;  %v1197_v51 = vpop.permute.xlu0 %1196  ;;  %v4597_v3 = vunpack.c.h.bf16 %v4967_v48 }
 0x124   :  { %v1514_v53 = vmul.f32 %v4828_v42, %v1197_v51  ;;  %v1515_v60 = vmul.f32 %v4829_v49, %v1202_v50  ;;  %v4852_v50 = vunpack.c.l.bf16 %v5030_v39  ;;  %v5031_v51 = vld [vmem:[%s7614_s2 + $0x178] sm:$0xff]  }
 0x125   :  { %5435 = vmatmul.mubr.msk.f32.gmra.mrb[76].mxu0 %vm1701_vm0, %v1639_v46 }
 0x126   :  { %v1642_v56 = vadd.f32 %v4572_v45, %v1514_v53  ;;  %5437 = vmatprep.mubr.msk.f32.mxu0 %vm1701_vm0, %v1640_v44  ;;  %v1643_v6 = vadd.f32 %v4573_v59, %v1515_v60  ;;  %v4849_v45 = vunpack.c.h.bf16 %v5029_v27  ;;  %v4596_v53 = vunpack.c.l.bf16 %v4967_v48  ;;  %v4968_v60 = vld [vmem:[%s7615_s0 + $0x178] sm:$0xff]  }
 0x127   :  { %v1212_v62 = vpop.permute.xlu1 %1211  ;;  %v1207_v63 = vpop.permute.xlu0 %1206  ;;  %v4601_v15 = vunpack.c.h.bf16 %v4968_v60 }
 0x128   :  { %v1516_v1 = vmul.f32 %v4832_v54, %v1207_v63  ;;  %v1517_v8 = vmul.f32 %v4833_v61, %v1212_v62  ;;  %v4856_v62 = vunpack.c.l.bf16 %v5031_v51  ;;  %v5032_v63 = vld [vmem:[%s7614_s2 + $0x180] sm:$0xff]  }
 0x129   :  { %5438 = vmatmul.mubr.msk.f32.gmra.mrb[78].mxu0 %vm1701_vm0, %v1641_v58 }
 0x12a   :  { %v1644_v4 = vadd.f32 %v4576_v57, %v1516_v1  ;;  %5440 = vmatprep.mubr.msk.f32.mxu0 %vm1701_vm0, %v1642_v56  ;;  %v1645_v18 = vadd.f32 %v4577_v7, %v1517_v8  ;;  %v4853_v57 = vunpack.c.h.bf16 %v5030_v39  ;;  %v4600_v1 = vunpack.c.l.bf16 %v4968_v60  ;;  %v4969_v8 = vld [vmem:[%s7615_s0 + $0x180] sm:$0xff]  }
 0x12b   :  { %v1222_v10 = vpop.permute.xlu1 %1221  ;;  %v1217_v11 = vpop.permute.xlu0 %1216  ;;  %v4605_v27 = vunpack.c.h.bf16 %v4969_v8 }
 0x12c   :  { %v1518_v13 = vmul.f32 %v4836_v2, %v1217_v11  ;;  %v1519_v20 = vmul.f32 %v4837_v9, %v1222_v10  ;;  %v4860_v10 = vunpack.c.l.bf16 %v5032_v63  ;;  %v5033_v11 = vld [vmem:[%s7614_s2 + $0x188] sm:$0xff]  }
 0x12d   :  { %5441 = vmatmul.mubr.msk.f32.gmra.mrb[80].mxu0 %vm1701_vm0, %v1643_v6 }
 0x12e   :  { %v1646_v16 = vadd.f32 %v4580_v5, %v1518_v13  ;;  %5443 = vmatprep.mubr.msk.f32.mxu0 %vm1701_vm0, %v1644_v4  ;;  %v1647_v30 = vadd.f32 %v4581_v19, %v1519_v20  ;;  %v4857_v5 = vunpack.c.h.bf16 %v5031_v51  ;;  %v4604_v13 = vunpack.c.l.bf16 %v4969_v8  ;;  %v4970_v20 = vld [vmem:[%s7615_s0 + $0x188] sm:$0xff]  }
 0x12f   :  { %v1232_v22 = vpop.permute.xlu1 %1231  ;;  %v1227_v23 = vpop.permute.xlu0 %1226  ;;  %v4609_v39 = vunpack.c.h.bf16 %v4970_v20 }
 0x130   :  { %v1520_v25 = vmul.f32 %v4840_v14, %v1227_v23  ;;  %v1521_v32 = vmul.f32 %v4841_v21, %v1232_v22  ;;  %v4864_v22 = vunpack.c.l.bf16 %v5033_v11  ;;  %v5034_v23 = vld [vmem:[%s7614_s2 + $0x190] sm:$0xff]  }
 0x131   :  { %5444 = vmatmul.mubr.msk.f32.gmra.mrb[82].mxu0 %vm1701_vm0, %v1645_v18 }
 0x132   :  { %v1648_v28 = vadd.f32 %v4584_v17, %v1520_v25  ;;  %5446 = vmatprep.mubr.msk.f32.mxu0 %vm1701_vm0, %v1646_v16  ;;  %v1649_v42 = vadd.f32 %v4585_v31, %v1521_v32  ;;  %v4861_v17 = vunpack.c.h.bf16 %v5032_v63  ;;  %v4608_v25 = vunpack.c.l.bf16 %v4970_v20  ;;  %v4971_v32 = vld [vmem:[%s7615_s0 + $0x190] sm:$0xff]  }
 0x133   :  { %v1242_v34 = vpop.permute.xlu1 %1241  ;;  %v1237_v35 = vpop.permute.xlu0 %1236  ;;  %v4613_v51 = vunpack.c.h.bf16 %v4971_v32 }
 0x134   :  { %v1522_v37 = vmul.f32 %v4844_v26, %v1237_v35  ;;  %v1523_v44 = vmul.f32 %v4845_v33, %v1242_v34  ;;  %v4868_v34 = vunpack.c.l.bf16 %v5034_v23  ;;  %v5035_v35 = vld [vmem:[%s7614_s2 + $0x198] sm:$0xff]  }
 0x135   :  { %5447 = vmatmul.mubr.msk.f32.gmra.mrb[84].mxu0 %vm1701_vm0, %v1647_v30 }
 0x136   :  { %v1650_v40 = vadd.f32 %v4588_v29, %v1522_v37  ;;  %5449 = vmatprep.mubr.msk.f32.mxu0 %vm1701_vm0, %v1648_v28  ;;  %v1651_v54 = vadd.f32 %v4589_v43, %v1523_v44  ;;  %v4865_v29 = vunpack.c.h.bf16 %v5033_v11  ;;  %v4612_v37 = vunpack.c.l.bf16 %v4971_v32  ;;  %v4972_v44 = vld [vmem:[%s7615_s0 + $0x198] sm:$0xff]  }
 0x137   :  { %v1252_v46 = vpop.permute.xlu1 %1251  ;;  %v1247_v47 = vpop.permute.xlu0 %1246  ;;  %v4617_v63 = vunpack.c.h.bf16 %v4972_v44 }
 0x138   :  { %v1524_v49 = vmul.f32 %v4848_v38, %v1247_v47  ;;  %v1525_v56 = vmul.f32 %v4849_v45, %v1252_v46  ;;  %v4872_v46 = vunpack.c.l.bf16 %v5035_v35  ;;  %v5036_v47 = vld [vmem:[%s7614_s2 + $0x1a0] sm:$0xff]  }
 0x139   :  { %5450 = vmatmul.mubr.msk.f32.gmra.mrb[86].mxu0 %vm1701_vm0, %v1649_v42 }
 0x13a   :  { %v1652_v52 = vadd.f32 %v4592_v41, %v1524_v49  ;;  %5452 = vmatprep.mubr.msk.f32.mxu0 %vm1701_vm0, %v1650_v40  ;;  %v1653_v2 = vadd.f32 %v4593_v55, %v1525_v56  ;;  %v4869_v41 = vunpack.c.h.bf16 %v5034_v23  ;;  %v4616_v49 = vunpack.c.l.bf16 %v4972_v44  ;;  %v4973_v56 = vld [vmem:[%s7615_s0 + $0x1a0] sm:$0xff]  }
 0x13b   :  { %v1262_v58 = vpop.permute.xlu1 %1261  ;;  %v1257_v59 = vpop.permute.xlu0 %1256  ;;  %v4621_v11 = vunpack.c.h.bf16 %v4973_v56 }
 0x13c   :  { %v1526_v61 = vmul.f32 %v4852_v50, %v1257_v59  ;;  %v1527_v4 = vmul.f32 %v4853_v57, %v1262_v58  ;;  %v4876_v58 = vunpack.c.l.bf16 %v5036_v47  ;;  %v5037_v59 = vld [vmem:[%s7614_s2 + $0x1a8] sm:$0xff]  }
 0x13d   :  { %5453 = vmatmul.mubr.msk.f32.gmra.mrb[88].mxu0 %vm1701_vm0, %v1651_v54 }
 0x13e   :  { %v1654_v0 = vadd.f32 %v4596_v53, %v1526_v61  ;;  %5455 = vmatprep.mubr.msk.f32.mxu0 %vm1701_vm0, %v1652_v52  ;;  %v1655_v14 = vadd.f32 %v4597_v3, %v1527_v4  ;;  %v4873_v53 = vunpack.c.h.bf16 %v5035_v35  ;;  %v4620_v61 = vunpack.c.l.bf16 %v4973_v56  ;;  %v4974_v4 = vld [vmem:[%s7615_s0 + $0x1a8] sm:$0xff]  }
 0x13f   :  { %v1272_v6 = vpop.permute.xlu1 %1271  ;;  %v1267_v7 = vpop.permute.xlu0 %1266  ;;  %v4625_v23 = vunpack.c.h.bf16 %v4974_v4 }
 0x140   :  { %v1528_v9 = vmul.f32 %v4856_v62, %v1267_v7  ;;  %v1529_v16 = vmul.f32 %v4857_v5, %v1272_v6  ;;  %v4880_v6 = vunpack.c.l.bf16 %v5037_v59  ;;  %v5038_v7 = vld [vmem:[%s7614_s2 + $0x1b0] sm:$0xff]  }
 0x141   :  { %5456 = vmatmul.mubr.msk.f32.gmra.mrb[90].mxu0 %vm1701_vm0, %v1653_v2 }
 0x142   :  { %v1656_v12 = vadd.f32 %v4600_v1, %v1528_v9  ;;  %5458 = vmatprep.mubr.msk.f32.mxu0 %vm1701_vm0, %v1654_v0  ;;  %v1657_v26 = vadd.f32 %v4601_v15, %v1529_v16  ;;  %v4877_v1 = vunpack.c.h.bf16 %v5036_v47  ;;  %v4624_v9 = vunpack.c.l.bf16 %v4974_v4  ;;  %v4975_v16 = vld [vmem:[%s7615_s0 + $0x1b0] sm:$0xff]   ;;  %v5041_v47 = vld [vmem:[%s7614_s2 + $0x1c8] sm:$0xff]  }
 0x143   :  { %v1282_v18 = vpop.permute.xlu1 %1281  ;;  %v1277_v19 = vpop.permute.xlu0 %1276 }
 0x144   :  { %v1530_v21 = vmul.f32 %v4860_v10, %v1277_v19  ;;  %v1531_v28 = vmul.f32 %v4861_v17, %v1282_v18  ;;  %v4884_v18 = vunpack.c.l.bf16 %v5038_v7  ;;  %v5039_v19 = vld [vmem:[%s7614_s2 + $0x1b8] sm:$0xff]  }
 0x145   :  { %5459 = vmatmul.mubr.msk.f32.gmra.mrb[92].mxu0 %vm1701_vm0, %v1655_v14 }
 0x146   :  { %v1658_v24 = vadd.f32 %v4604_v13, %v1530_v21  ;;  %5461 = vmatprep.mubr.msk.f32.mxu0 %vm1701_vm0, %v1656_v12  ;;  %v1659_v38 = vadd.f32 %v4605_v27, %v1531_v28  ;;  %v4881_v13 = vunpack.c.h.bf16 %v5037_v59  ;;  %v4628_v21 = vunpack.c.l.bf16 %v4975_v16  ;;  %v4976_v28 = vld [vmem:[%s7615_s0 + $0x1b8] sm:$0xff]  }
 0x147   :  { %v1292_v30 = vpop.permute.xlu1 %1291  ;;  %v1287_v31 = vpop.permute.xlu0 %1286 }
 0x148   :  { %v1532_v33 = vmul.f32 %v4864_v22, %v1287_v31  ;;  %v1533_v40 = vmul.f32 %v4865_v29, %v1292_v30  ;;  %v4888_v30 = vunpack.c.l.bf16 %v5039_v19  ;;  %v5040_v31 = vld [vmem:[%s7614_s2 + $0x1c0] sm:$0xff]  }
 0x149   :  { %5462 = vmatmul.mubr.msk.f32.gmra.mrb[94].mxu0 %vm1701_vm0, %v1657_v26  ;;  %v4892_v44 = vunpack.c.l.bf16 %v5040_v31 }
 0x14a   :  { %v1660_v36 = vadd.f32 %v4608_v25, %v1532_v33  ;;  %5464 = vmatprep.mubr.msk.f32.mxu0 %vm1701_vm0, %v1658_v24  ;;  %v1661_v50 = vadd.f32 %v4609_v39, %v1533_v40  ;;  %v4885_v25 = vunpack.c.h.bf16 %v5038_v7  ;;  %v4632_v33 = vunpack.c.l.bf16 %v4976_v28 }
 0x14b   :  { %v1302_v42 = vpop.permute.xlu1 %1301  ;;  %v1297_v43 = vpop.permute.xlu0 %1296 }
 0x14c   :  { %v1534_v45 = vmul.f32 %v4868_v34, %v1297_v43  ;;  %v1535_v52 = vmul.f32 %v4869_v41, %v1302_v42  ;;  %v6638_v34 = vld [vmem:[%s7617_s4] ss:$0 sm:$0xff] }
 0x14d   :  { %5465 = vmatmul.mubr.msk.f32.gmra.mrb[96].mxu0 %vm1701_vm0, %v1659_v38  ;;  %v4889_v38 = vunpack.c.h.bf16 %v5039_v19  ;;  %v4977_v41 = vld [vmem:[%s7615_s0 + $0x1c0] sm:$0xff]   ;;  %v5043_v19 = vld [vmem:[%s7614_s2 + $0x1d8] sm:$0xff]  }
 0x14e   :  { %v1662_v48 = vadd.f32 %v4612_v37, %v1534_v45  ;;  %5467 = vmatprep.mubr.msk.f32.mxu0 %vm1701_vm0, %v1660_v36  ;;  %v1663_v62 = vadd.f32 %v4613_v51, %v1535_v52  ;;  %v4629_v36 = vunpack.c.h.bf16 %v4975_v16  ;;  %v4633_v52 = vunpack.c.h.bf16 %v4976_v28 }
 0x14f   :  { %v1312_v54 = vpop.permute.xlu1 %1311  ;;  %v1307_v55 = vpop.permute.xlu0 %1306 }
 0x150   :  { %v1536_v57 = vmul.f32 %v4872_v46, %v1307_v55  ;;  %v1537_v0 = vmul.f32 %v4873_v53, %v1312_v54  ;;  %v4893_v54 = vunpack.c.h.bf16 %v5040_v31 }
 0x151   :  { %5468 = vmatmul.mubr.msk.f32.gmra.mrb[98].mxu0 %vm1701_vm0, %v1661_v50  ;;  %v4636_v50 = vunpack.c.l.bf16 %v4977_v41 }
 0x152   :  { %v1664_v60 = vadd.f32 %v4616_v49, %v1536_v57  ;;  %5470 = vmatprep.mubr.msk.f32.mxu0 %vm1701_vm0, %v1662_v48  ;;  %v1665_v10 = vadd.f32 %v4617_v63, %v1537_v0  ;;  %v4978_v57 = vld [vmem:[%s7615_s0 + $0x1c8] sm:$0xff]  }
 0x153   :  { %v1322_v2 = vpop.permute.xlu1 %1321  ;;  %v1317_v3 = vpop.permute.xlu0 %1316  ;;  %v4640_v4 = vunpack.c.l.bf16 %v4978_v57 }
 0x154   :  { %v1538_v5 = vmul.f32 %v4876_v58, %v1317_v3  ;;  %v1539_v12 = vmul.f32 %v4877_v1, %v1322_v2  ;;  %v5042_v1 = vld [vmem:[%s7614_s2 + $0x1d0] sm:$0xff]  }
 0x155   :  { %5471 = vmatmul.mubr.msk.f32.gmra.mrb[100].mxu0 %vm1701_vm0, %v1663_v62 }
 0x156   :  { %v1666_v8 = vadd.f32 %v4620_v61, %v1538_v5  ;;  %5473 = vmatprep.mubr.msk.f32.mxu0 %vm1701_vm0, %v1664_v60  ;;  %v1667_v22 = vadd.f32 %v4621_v11, %v1539_v12  ;;  %v4896_v61 = vunpack.c.l.bf16 %v5041_v47  ;;  %v4979_v11 = vld [vmem:[%s7615_s0 + $0x1d0] sm:$0xff]  }
 0x157   :  { %v1332_v14 = vpop.permute.xlu1 %1331  ;;  %v1327_v15 = vpop.permute.xlu0 %1326 }
 0x158   :  { %v1540_v17 = vmul.f32 %v4880_v6, %v1327_v15  ;;  %v1541_v24 = vmul.f32 %v4881_v13, %v1332_v14  ;;  %v4637_v6 = vunpack.c.h.bf16 %v4977_v41  ;;  %v4900_v15 = vunpack.c.l.bf16 %v5042_v1 }
 0x159   :  { %5474 = vmatmul.mubr.msk.f32.gmra.mrb[102].mxu0 %vm1701_vm0, %v1665_v10 }
 0x15a   :  { %v1668_v20 = vadd.f32 %v4624_v9, %v1540_v17  ;;  %5476 = vmatprep.mubr.msk.f32.mxu0 %vm1701_vm0, %v1666_v8  ;;  %v1669_v35 = vadd.f32 %v4625_v23, %v1541_v24  ;;  %v4897_v8 = vunpack.c.h.bf16 %v5041_v47  ;;  %v4641_v24 = vunpack.c.h.bf16 %v4978_v57 }
 0x15b   :  { %v1342_v26 = vpop.permute.xlu1 %1341  ;;  %v1337_v27 = vpop.permute.xlu0 %1336 }
 0x15c   :  { %v1542_v29 = vmul.f32 %v4884_v18, %v1337_v27  ;;  %v1543_v37 = vmul.f32 %v4885_v25, %v1342_v26  ;;  %v4901_v26 = vunpack.c.h.bf16 %v5042_v1 }
 0x15d   :  { %5477 = vmatmul.mubr.msk.f32.gmra.mrb[104].mxu0 %vm1701_vm0, %v1667_v22  ;;  %v4644_v22 = vunpack.c.l.bf16 %v4979_v11 }
 0x15e   :  { %v1670_v32 = vadd.f32 %v4628_v21, %v1542_v29  ;;  %5479 = vmatprep.mubr.msk.f32.mxu0 %vm1701_vm0, %v1668_v20  ;;  %v1671_v51 = vadd.f32 %v4629_v36, %v1543_v37  ;;  %v4980_v29 = vld [vmem:[%s7615_s0 + $0x1d8] sm:$0xff]  }
 0x15f   :  { %v1352_v39 = vpop.permute.xlu1 %1351  ;;  %v1347_v40 = vpop.permute.xlu0 %1346  ;;  %v4648_v41 = vunpack.c.l.bf16 %v4980_v29 }
 0x160   :  { %v1544_v42 = vmul.f32 %v4888_v30, %v1347_v40  ;;  %v5322_v43 = vpop.f32.mrb[0].mxu0  ;;  %v1545_v53 = vmul.f32 %v4889_v38, %v1352_v39  ;;  %v5044_v38 = vld [vmem:[%s7614_s2 + $0x1e0] sm:$0xff]  }
 0x161   :  { %v2158_v45 = vadd.f32 %v5322_v43, %v6638_v34  ;;  %v2152_v46 = vpop.f32.mrb[1].mxu0  ;;  %5480 = vmatmul.mubr.msk.f32.gmra.mrb[106].mxu0 %vm1701_vm0, %v1669_v35  ;;  %v4645_v43 = vunpack.c.h.bf16 %v4979_v11 }
 0x162   :  { %v1672_v48 = vadd.f32 %v4632_v33, %v1544_v42  ;;  %v2153_v49 = vadd.f32 %v6638_v34, %v2152_v46  ;;  %5482 = vmatprep.mubr.msk.f32.mxu0 %vm1701_vm0, %v1670_v32  ;;  %v1673_v5 = vadd.f32 %v4633_v52, %v1545_v53  ;;  %v4904_v33 = vunpack.c.l.bf16 %v5043_v19 }
 0x163   :  { %v1362_v55 = vpop.permute.xlu1 %1361  ;;  %v1357_v56 = vpop.permute.xlu0 %1356  ;;  %v2792_v62 = vmax.f32 %v2158_v45, 0.0  ;;  %v4905_v45 = vunpack.c.h.bf16 %v5043_v19  ;;  %v4908_v52 = vunpack.c.l.bf16 %v5044_v38 }
 0x164   :  { %v2791_v58 = vmax.f32 %v2153_v49, 0.0  ;;  %v1546_v59 = vmul.f32 %v4892_v44, %v1357_v56  ;;  %v5325_v60 = vpop.f32.mrb[2].mxu0  ;;  %v1547_v7 = vmul.f32 %v4893_v54, %v1362_v55  ;;  %v5045_v56 = vld [vmem:[%s7614_s2 + $0x1e8] sm:$0xff]  }
 0x165   :  { %v2168_v63 = vadd.f32 %v5325_v60, %v6638_v34  ;;  %v2162_v0 = vpop.f32.mrb[3].mxu0  ;;  %5483 = vmatmul.mubr.msk.f32.gmra.mrb[108].mxu0 %vm1701_vm0, %v1671_v51 }
 0x166   :  { %v1674_v2 = vadd.f32 %v4636_v50, %v1546_v59  ;;  %v2163_v3 = vadd.f32 %v6638_v34, %v2162_v0  ;;  %5485 = vmatprep.mubr.msk.f32.mxu0 %vm1701_vm0, %v1672_v48  ;;  %5520 = vmatprep.mubr.msk.f32.mxu1 %vm1701_vm0, %v2791_v58  ;;  %v1675_v23 = vadd.f32 %v4637_v6, %v1547_v7  ;;  %v4981_v48 = vld [vmem:[%s7615_s0 + $0x1e0] sm:$0xff]   ;;  %v4912_v6 = vunpack.c.l.bf16 %v5045_v56 }
 0x167   :  { %5521 = vmatmul.mubr.msk.f32.vlgmr.msra.gmra.mrb[0].mxu1 %vm1701_vm0, %v2792_v62  ;;  %v1372_v9 = vpop.permute.xlu1 %1371  ;;  %v1367_v10 = vpop.permute.xlu0 %1366  ;;  %v2794_v16 = vmax.f32 %v2168_v63, 0.0  ;;  %v4652_v59 = vunpack.c.l.bf16 %v4981_v48  ;;  %v4909_v63 = vunpack.c.h.bf16 %v5044_v38 }
 0x168   :  { %v2793_v12 = vmax.f32 %v2163_v3, 0.0  ;;  %v1548_v13 = vmul.f32 %v4896_v61, %v1367_v10  ;;  %v5328_v14 = vpop.f32.mrb[4].mxu0  ;;  %v1549_v25 = vmul.f32 %v4897_v8, %v1372_v9  ;;  %v4649_v61 = vunpack.c.h.bf16 %v4980_v29  ;;  %v5046_v10 = vld [vmem:[%s7614_s2 + $0x1f0] sm:$0xff]  }
 0x169   :  { %v2178_v17 = vadd.f32 %v5328_v14, %v6638_v34  ;;  %v2172_v18 = vpop.f32.mrb[5].mxu0  ;;  %5486 = vmatmul.mubr.msk.f32.gmra.mrb[110].mxu0 %vm1701_vm0, %v1673_v5 }
 0x16a   :  { %v1676_v20 = vadd.f32 %v4640_v4, %v1548_v13  ;;  %v2173_v21 = vadd.f32 %v6638_v34, %v2172_v18  ;;  %5488 = vmatprep.mubr.msk.f32.mxu0 %vm1701_vm0, %v1674_v2  ;;  %5523 = vmatprep.mubr.msk.f32.mxu1 %vm1701_vm0, %v2793_v12  ;;  %v1677_v42 = vadd.f32 %v4641_v24, %v1549_v25  ;;  %v4982_v2 = vld [vmem:[%s7615_s0 + $0x1e8] sm:$0xff]   ;;  %v4916_v24 = vunpack.c.l.bf16 %v5046_v10 }
 0x16b   :  { %5524 = vmatmul.mubr.msk.f32.gmra.mrb[2].mxu1 %vm1701_vm0, %v2794_v16  ;;  %v1382_v27 = vpop.permute.xlu1 %1381  ;;  %v1377_v28 = vpop.permute.xlu0 %1376  ;;  %v2796_v35 = vmax.f32 %v2178_v17, 0.0  ;;  %v4656_v13 = vunpack.c.l.bf16 %v4982_v2  ;;  %v4913_v17 = vunpack.c.h.bf16 %v5045_v56 }
 0x16c   :  { %v2795_v30 = vmax.f32 %v2173_v21, 0.0  ;;  %v1550_v31 = vmul.f32 %v4900_v15, %v1377_v28  ;;  %v5331_v32 = vpop.f32.mrb[6].mxu0  ;;  %v1551_v44 = vmul.f32 %v4901_v26, %v1382_v27  ;;  %v4653_v15 = vunpack.c.h.bf16 %v4981_v48  ;;  %v5047_v28 = vld [vmem:[%s7614_s2 + $0x1f8] sm:$0xff]  }
 0x16d   :  { %v2188_v36 = vadd.f32 %v5331_v32, %v6638_v34  ;;  %v2182_v37 = vpop.f32.mrb[7].mxu0  ;;  %5489 = vmatmul.mubr.msk.f32.gmra.mrb[112].mxu0 %vm1701_vm0, %v1675_v23 }
 0x16e   :  { %v1678_v39 = vadd.f32 %v4644_v22, %v1550_v31  ;;  %v2183_v40 = vadd.f32 %v6638_v34, %v2182_v37  ;;  %5491 = vmatprep.mubr.msk.f32.mxu0 %vm1701_vm0, %v1676_v20  ;;  %5526 = vmatprep.mubr.msk.f32.mxu1 %vm1701_vm0, %v2795_v30  ;;  %v1679_v60 = vadd.f32 %v4645_v43, %v1551_v44  ;;  %v4983_v20 = vld [vmem:[%s7615_s0 + $0x1f0] sm:$0xff]   ;;  %v4920_v43 = vunpack.c.l.bf16 %v5047_v28 }
 0x16f   :  { %5527 = vmatmul.mubr.msk.f32.gmra.mrb[4].mxu1 %vm1701_vm0, %v2796_v35  ;;  %v1392_v46 = vpop.permute.xlu1 %1391  ;;  %v1387_v47 = vpop.permute.xlu0 %1386  ;;  %v2798_v53 = vmax.f32 %v2188_v36, 0.0  ;;  %v4660_v31 = vunpack.c.l.bf16 %v4983_v20  ;;  %v4917_v36 = vunpack.c.h.bf16 %v5046_v10 }
 0x170   :  { %v2797_v49 = vmax.f32 %v2183_v40, 0.0  ;;  %v1552_v50 = vmul.f32 %v4904_v33, %v1387_v47  ;;  %v5334_v51 = vpop.f32.mrb[8].mxu0  ;;  %v1553_v62 = vmul.f32 %v4905_v45, %v1392_v46  ;;  %v4657_v33 = vunpack.c.h.bf16 %v4982_v2 }
 0x171   :  { %v2198_v54 = vadd.f32 %v5334_v51, %v6638_v34  ;;  %v2192_v55 = vpop.f32.mrb[9].mxu0  ;;  %5492 = vmatmul.mubr.msk.f32.gmra.mrb[114].mxu0 %vm1701_vm0, %v1677_v42  ;;  %v4661_v51 = vunpack.c.h.bf16 %v4983_v20 }
 0x172   :  { %v1680_v57 = vadd.f32 %v4648_v41, %v1552_v50  ;;  %v2193_v58 = vadd.f32 %v6638_v34, %v2192_v55  ;;  %5494 = vmatprep.mubr.msk.f32.mxu0 %vm1701_vm0, %v1678_v39  ;;  %5529 = vmatprep.mubr.msk.f32.mxu1 %vm1701_vm0, %v2797_v49  ;;  %v1681_v14 = vadd.f32 %v4649_v61, %v1553_v62  ;;  %v4984_v39 = vld [vmem:[%s7615_s0 + $0x1f8] sm:$0xff]  }
 0x173   :  { %5530 = vmatmul.mubr.msk.f32.gmra.mrb[6].mxu1 %vm1701_vm0, %v2798_v53  ;;  %v1402_v0 = vpop.permute.xlu1 %1401  ;;  %v1397_v1 = vpop.permute.xlu0 %1396  ;;  %v2800_v7 = vmax.f32 %v2198_v54, 0.0  ;;  %v4664_v49 = vunpack.c.l.bf16 %v4984_v39  ;;  %v4921_v53 = vunpack.c.h.bf16 %v5047_v28 }
 0x174   :  { %v2799_v3 = vmax.f32 %v2193_v58, 0.0  ;;  %v1554_v4 = vmul.f32 %v4908_v52, %v1397_v1  ;;  %v5337_v5 = vpop.f32.mrb[10].mxu0  ;;  %v1555_v16 = vmul.f32 %v4909_v63, %v1402_v0  ;;  %v4665_v1 = vunpack.c.h.bf16 %v4984_v39 }
 0x175   :  { %v2208_v8 = vadd.f32 %v5337_v5, %v6638_v34  ;;  %v2202_v9 = vpop.f32.mrb[11].mxu0  ;;  %5495 = vmatmul.mubr.msk.f32.gmra.mrb[116].mxu0 %vm1701_vm0, %v1679_v60 }
 0x176   :  { %v1682_v11 = vadd.f32 %v4652_v59, %v1554_v4  ;;  %v2203_v12 = vadd.f32 %v6638_v34, %v2202_v9  ;;  %5497 = vmatprep.mubr.msk.f32.mxu0 %vm1701_vm0, %v1680_v57  ;;  %5532 = vmatprep.mubr.msk.f32.mxu1 %vm1701_vm0, %v2799_v3  ;;  %v1683_v32 = vadd.f32 %v4653_v15, %v1555_v16 }
 0x177   :  { %5533 = vmatmul.mubr.msk.f32.gmra.mrb[8].mxu1 %vm1701_vm0, %v2800_v7  ;;  %v1412_v18 = vpop.permute.xlu1 %1411  ;;  %v1407_v19 = vpop.permute.xlu0 %1406  ;;  %v2802_v25 = vmax.f32 %v2208_v8, 0.0 }
 0x178   :  { %v2801_v21 = vmax.f32 %v2203_v12, 0.0  ;;  %v1556_v22 = vmul.f32 %v4912_v6, %v1407_v19  ;;  %v5340_v23 = vpop.f32.mrb[12].mxu0  ;;  %v1557_v35 = vmul.f32 %v4913_v17, %v1412_v18 }
 0x179   :  { %v2218_v26 = vadd.f32 %v5340_v23, %v6638_v34  ;;  %v2212_v27 = vpop.f32.mrb[13].mxu0  ;;  %5498 = vmatmul.mubr.msk.f32.gmra.mrb[118].mxu0 %vm1701_vm0, %v1681_v14 }
 0x17a   :  { %v1684_v29 = vadd.f32 %v4656_v13, %v1556_v22  ;;  %v2213_v30 = vadd.f32 %v6638_v34, %v2212_v27  ;;  %5500 = vmatprep.mubr.msk.f32.mxu0 %vm1701_vm0, %v1682_v11  ;;  %5535 = vmatprep.mubr.msk.f32.mxu1 %vm1701_vm0, %v2801_v21  ;;  %v1685_v50 = vadd.f32 %v4657_v33, %v1557_v35 }
 0x17b   :  { %5536 = vmatmul.mubr.msk.f32.gmra.mrb[10].mxu1 %vm1701_vm0, %v2802_v25  ;;  %v1422_v37 = vpop.permute.xlu1 %1421  ;;  %v1417_v38 = vpop.permute.xlu0 %1416  ;;  %v2804_v44 = vmax.f32 %v2218_v26, 0.0 }
 0x17c   :  { %v2803_v40 = vmax.f32 %v2213_v30, 0.0  ;;  %v1558_v41 = vmul.f32 %v4916_v24, %v1417_v38  ;;  %v5343_v42 = vpop.f32.mrb[14].mxu0  ;;  %v1559_v52 = vmul.f32 %v4917_v36, %v1422_v37 }
 0x17d   :  { %v2228_v45 = vadd.f32 %v5343_v42, %v6638_v34  ;;  %v2222_v46 = vpop.f32.mrb[15].mxu0  ;;  %5501 = vmatmul.mubr.msk.f32.gmra.mrb[120].mxu0 %vm1701_vm0, %v1683_v32 }
 0x17e   :  { %v1686_v47 = vadd.f32 %v4660_v31, %v1558_v41  ;;  %v2223_v48 = vadd.f32 %v6638_v34, %v2222_v46  ;;  %5503 = vmatprep.mubr.msk.f32.mxu0 %vm1701_vm0, %v1684_v29  ;;  %5538 = vmatprep.mubr.msk.f32.mxu1 %vm1701_vm0, %v2803_v40  ;;  %v1687_v0 = vadd.f32 %v4661_v51, %v1559_v52 }
 0x17f   :  { %5539 = vmatmul.mubr.msk.f32.gmra.mrb[12].mxu1 %vm1701_vm0, %v2804_v44  ;;  %v1427_v54 = vpop.permute.xlu0 %1426  ;;  %v1432_v56 = vpop.permute.xlu1 %1431  ;;  %v2806_v59 = vmax.f32 %v2228_v45, 0.0 }
 0x180   :  { %v2805_v55 = vmax.f32 %v2223_v48, 0.0  ;;  %v1560_v57 = vmul.f32 %v4920_v43, %v1427_v54  ;;  %v5346_v58 = vpop.f32.mrb[16].mxu0  ;;  %v1561_v2 = vmul.f32 %v4921_v53, %v1432_v56 }
 0x181   :  { %v2238_v60 = vadd.f32 %v5346_v58, %v6638_v34  ;;  %v2232_v61 = vpop.f32.mrb[17].mxu0  ;;  %5504 = vmatmul.mubr.msk.f32.gmra.mrb[122].mxu0 %vm1701_vm0, %v1685_v50 }
 0x182   :  { %v1688_v62 = vadd.f32 %v4664_v49, %v1560_v57  ;;  %v2233_v63 = vadd.f32 %v6638_v34, %v2232_v61  ;;  %5506 = vmatprep.mubr.msk.f32.mxu0 %vm1701_vm0, %v1686_v47  ;;  %5541 = vmatprep.mubr.msk.f32.mxu1 %vm1701_vm0, %v2805_v55  ;;  %v1689_v9 = vadd.f32 %v4665_v1, %v1561_v2 }
 0x183   :  { %5542 = vmatmul.mubr.msk.f32.gmra.mrb[14].mxu1 %vm1701_vm0, %v2806_v59  ;;  %v2808_v5 = vmax.f32 %v2238_v60, 0.0 }
 0x184   :  { %v2807_v3 = vmax.f32 %v2233_v63, 0.0  ;;  %v5349_v4 = vpop.f32.mrb[18].mxu0 }
 0x185   :  { %v2248_v6 = vadd.f32 %v5349_v4, %v6638_v34  ;;  %v2242_v7 = vpop.f32.mrb[19].mxu0  ;;  %5507 = vmatmul.mubr.msk.f32.gmra.mrb[124].mxu0 %vm1701_vm0, %v1687_v0 }
 0x186   :  { %v2243_v8 = vadd.f32 %v6638_v34, %v2242_v7  ;;  %5509 = vmatprep.mubr.msk.f32.mxu0 %vm1701_vm0, %v1688_v62  ;;  %5544 = vmatprep.mubr.msk.f32.mxu1 %vm1701_vm0, %v2807_v3 }
 0x187   :  { %5545 = vmatmul.mubr.msk.f32.gmra.mrb[16].mxu1 %vm1701_vm0, %v2808_v5  ;;  %v2810_v12 = vmax.f32 %v2248_v6, 0.0 }
 0x188   :  { %v2809_v10 = vmax.f32 %v2243_v8, 0.0  ;;  %v5352_v11 = vpop.f32.mrb[20].mxu0 }
 0x189   :  { %v2258_v13 = vadd.f32 %v5352_v11, %v6638_v34  ;;  %v2252_v14 = vpop.f32.mrb[21].mxu0  ;;  %5510 = vmatmul.mubr.msk.f32.gmra.mrb[126].mxu0 %vm1701_vm0, %v1689_v9 }
 0x18a   :  { %v2253_v15 = vadd.f32 %v6638_v34, %v2252_v14  ;;  %5547 = vmatprep.mubr.msk.f32.mxu1 %vm1701_vm0, %v2809_v10 }
 0x18b   :  { %5548 = vmatmul.mubr.msk.f32.gmra.mrb[18].mxu1 %vm1701_vm0, %v2810_v12  ;;  %v2812_v18 = vmax.f32 %v2258_v13, 0.0 }
 0x18c   :  { %v2811_v16 = vmax.f32 %v2253_v15, 0.0  ;;  %v5355_v17 = vpop.f32.mrb[22].mxu0 }
 0x18d   :  { %v2268_v19 = vadd.f32 %v5355_v17, %v6638_v34  ;;  %v2262_v20 = vpop.f32.mrb[23].mxu0 }
 0x18e   :  { %v2263_v21 = vadd.f32 %v6638_v34, %v2262_v20  ;;  %5550 = vmatprep.mubr.msk.f32.mxu1 %vm1701_vm0, %v2811_v16 }
 0x18f   :  { %5551 = vmatmul.mubr.msk.f32.gmra.mrb[20].mxu1 %vm1701_vm0, %v2812_v18  ;;  %v2814_v24 = vmax.f32 %v2268_v19, 0.0 }
 0x190   :  { %v2813_v22 = vmax.f32 %v2263_v21, 0.0  ;;  %v5358_v23 = vpop.f32.mrb[24].mxu0 }
 0x191   :  { %v2278_v25 = vadd.f32 %v5358_v23, %v6638_v34  ;;  %v2272_v26 = vpop.f32.mrb[25].mxu0 }
 0x192   :  { %v2273_v27 = vadd.f32 %v6638_v34, %v2272_v26  ;;  %5553 = vmatprep.mubr.msk.f32.mxu1 %vm1701_vm0, %v2813_v22 }
 0x193   :  { %5554 = vmatmul.mubr.msk.f32.gmra.mrb[22].mxu1 %vm1701_vm0, %v2814_v24  ;;  %v2816_v30 = vmax.f32 %v2278_v25, 0.0 }
 0x194   :  { %v2815_v28 = vmax.f32 %v2273_v27, 0.0  ;;  %v5361_v29 = vpop.f32.mrb[26].mxu0 }
 0x195   :  { %v2288_v31 = vadd.f32 %v5361_v29, %v6638_v34  ;;  %v2282_v32 = vpop.f32.mrb[27].mxu0 }
 0x196   :  { %v2283_v33 = vadd.f32 %v6638_v34, %v2282_v32  ;;  %5556 = vmatprep.mubr.msk.f32.mxu1 %vm1701_vm0, %v2815_v28 }
 0x197   :  { %5557 = vmatmul.mubr.msk.f32.gmra.mrb[24].mxu1 %vm1701_vm0, %v2816_v30  ;;  %v2818_v37 = vmax.f32 %v2288_v31, 0.0 }
 0x198   :  { %v2817_v35 = vmax.f32 %v2283_v33, 0.0  ;;  %v5364_v36 = vpop.f32.mrb[28].mxu0 }
 0x199   :  { %v2298_v38 = vadd.f32 %v5364_v36, %v6638_v34  ;;  %v2292_v39 = vpop.f32.mrb[29].mxu0 }
 0x19a   :  { %v2293_v40 = vadd.f32 %v6638_v34, %v2292_v39  ;;  %5559 = vmatprep.mubr.msk.f32.mxu1 %vm1701_vm0, %v2817_v35 }
 0x19b   :  { %5560 = vmatmul.mubr.msk.f32.gmra.mrb[26].mxu1 %vm1701_vm0, %v2818_v37  ;;  %v2820_v43 = vmax.f32 %v2298_v38, 0.0 }
 0x19c   :  { %v2819_v41 = vmax.f32 %v2293_v40, 0.0  ;;  %v5367_v42 = vpop.f32.mrb[30].mxu0 }
 0x19d   :  { %v2308_v44 = vadd.f32 %v5367_v42, %v6638_v34  ;;  %v2302_v45 = vpop.f32.mrb[31].mxu0 }
 0x19e   :  { %v2303_v46 = vadd.f32 %v6638_v34, %v2302_v45  ;;  %5562 = vmatprep.mubr.msk.f32.mxu1 %vm1701_vm0, %v2819_v41 }
 0x19f   :  { %5563 = vmatmul.mubr.msk.f32.gmra.mrb[28].mxu1 %vm1701_vm0, %v2820_v43  ;;  %v2822_v49 = vmax.f32 %v2308_v44, 0.0 }
 0x1a0   :  { %v2821_v47 = vmax.f32 %v2303_v46, 0.0  ;;  %v5370_v48 = vpop.f32.mrb[32].mxu0 }
 0x1a1   :  { %v2318_v50 = vadd.f32 %v5370_v48, %v6638_v34  ;;  %v2312_v51 = vpop.f32.mrb[33].mxu0 }
 0x1a2   :  { %v2313_v52 = vadd.f32 %v6638_v34, %v2312_v51  ;;  %5565 = vmatprep.mubr.msk.f32.mxu1 %vm1701_vm0, %v2821_v47 }
 0x1a3   :  { %5566 = vmatmul.mubr.msk.f32.gmra.mrb[30].mxu1 %vm1701_vm0, %v2822_v49  ;;  %v2824_v55 = vmax.f32 %v2318_v50, 0.0 }
 0x1a4   :  { %v2823_v53 = vmax.f32 %v2313_v52, 0.0  ;;  %v5373_v54 = vpop.f32.mrb[34].mxu0 }
 0x1a5   :  { %v2328_v56 = vadd.f32 %v5373_v54, %v6638_v34  ;;  %v2322_v57 = vpop.f32.mrb[35].mxu0 }
 0x1a6   :  { %v2323_v58 = vadd.f32 %v6638_v34, %v2322_v57  ;;  %5568 = vmatprep.mubr.msk.f32.mxu1 %vm1701_vm0, %v2823_v53 }
 0x1a7   :  { %5569 = vmatmul.mubr.msk.f32.gmra.mrb[32].mxu1 %vm1701_vm0, %v2824_v55  ;;  %v2826_v61 = vmax.f32 %v2328_v56, 0.0 }
 0x1a8   :  { %v2825_v59 = vmax.f32 %v2323_v58, 0.0  ;;  %v5376_v60 = vpop.f32.mrb[36].mxu0 }
 0x1a9   :  { %v2338_v62 = vadd.f32 %v5376_v60, %v6638_v34  ;;  %v2332_v63 = vpop.f32.mrb[37].mxu0 }
 0x1aa   :  { %v2333_v0 = vadd.f32 %v6638_v34, %v2332_v63  ;;  %5571 = vmatprep.mubr.msk.f32.mxu1 %vm1701_vm0, %v2825_v59 }
 0x1ab   :  { %5572 = vmatmul.mubr.msk.f32.gmra.mrb[34].mxu1 %vm1701_vm0, %v2826_v61  ;;  %v2828_v3 = vmax.f32 %v2338_v62, 0.0 }
 0x1ac   :  { %v2827_v1 = vmax.f32 %v2333_v0, 0.0  ;;  %v5379_v2 = vpop.f32.mrb[38].mxu0 }
 0x1ad   :  { %v2348_v4 = vadd.f32 %v5379_v2, %v6638_v34  ;;  %v2342_v5 = vpop.f32.mrb[39].mxu0 }
 0x1ae   :  { %v2343_v6 = vadd.f32 %v6638_v34, %v2342_v5  ;;  %5574 = vmatprep.mubr.msk.f32.mxu1 %vm1701_vm0, %v2827_v1 }
 0x1af   :  { %5575 = vmatmul.mubr.msk.f32.gmra.mrb[36].mxu1 %vm1701_vm0, %v2828_v3  ;;  %v2830_v9 = vmax.f32 %v2348_v4, 0.0 }
 0x1b0   :  { %v2829_v7 = vmax.f32 %v2343_v6, 0.0  ;;  %v5382_v8 = vpop.f32.mrb[40].mxu0 }
 0x1b1   :  { %v2358_v10 = vadd.f32 %v5382_v8, %v6638_v34  ;;  %v2352_v11 = vpop.f32.mrb[41].mxu0 }
 0x1b2   :  { %v2353_v12 = vadd.f32 %v6638_v34, %v2352_v11  ;;  %5577 = vmatprep.mubr.msk.f32.mxu1 %vm1701_vm0, %v2829_v7 }
 0x1b3   :  { %5578 = vmatmul.mubr.msk.f32.gmra.mrb[38].mxu1 %vm1701_vm0, %v2830_v9  ;;  %v2832_v15 = vmax.f32 %v2358_v10, 0.0 }
 0x1b4   :  { %v2831_v13 = vmax.f32 %v2353_v12, 0.0  ;;  %v5385_v14 = vpop.f32.mrb[42].mxu0 }
 0x1b5   :  { %v2368_v16 = vadd.f32 %v5385_v14, %v6638_v34  ;;  %v2362_v17 = vpop.f32.mrb[43].mxu0 }
 0x1b6   :  { %v2363_v18 = vadd.f32 %v6638_v34, %v2362_v17  ;;  %5580 = vmatprep.mubr.msk.f32.mxu1 %vm1701_vm0, %v2831_v13 }
 0x1b7   :  { %5581 = vmatmul.mubr.msk.f32.gmra.mrb[40].mxu1 %vm1701_vm0, %v2832_v15  ;;  %v2834_v21 = vmax.f32 %v2368_v16, 0.0 }
 0x1b8   :  { %v2833_v19 = vmax.f32 %v2363_v18, 0.0  ;;  %v5388_v20 = vpop.f32.mrb[44].mxu0 }
 0x1b9   :  { %v2378_v22 = vadd.f32 %v5388_v20, %v6638_v34  ;;  %v2372_v23 = vpop.f32.mrb[45].mxu0 }
 0x1ba   :  { %v2373_v24 = vadd.f32 %v6638_v34, %v2372_v23  ;;  %5583 = vmatprep.mubr.msk.f32.mxu1 %vm1701_vm0, %v2833_v19 }
 0x1bb   :  { %5584 = vmatmul.mubr.msk.f32.gmra.mrb[42].mxu1 %vm1701_vm0, %v2834_v21  ;;  %v2836_v27 = vmax.f32 %v2378_v22, 0.0 }
 0x1bc   :  { %v2835_v25 = vmax.f32 %v2373_v24, 0.0  ;;  %v5391_v26 = vpop.f32.mrb[46].mxu0 }
 0x1bd   :  { %v2388_v28 = vadd.f32 %v5391_v26, %v6638_v34  ;;  %v2382_v29 = vpop.f32.mrb[47].mxu0 }
 0x1be   :  { %v2383_v30 = vadd.f32 %v6638_v34, %v2382_v29  ;;  %5586 = vmatprep.mubr.msk.f32.mxu1 %vm1701_vm0, %v2835_v25 }
 0x1bf   :  { %5587 = vmatmul.mubr.msk.f32.gmra.mrb[44].mxu1 %vm1701_vm0, %v2836_v27  ;;  %v2838_v33 = vmax.f32 %v2388_v28, 0.0 }
 0x1c0   :  { %v2837_v31 = vmax.f32 %v2383_v30, 0.0  ;;  %v5394_v32 = vpop.f32.mrb[48].mxu0 }
 0x1c1   :  { %v2398_v35 = vadd.f32 %v5394_v32, %v6638_v34  ;;  %v2392_v36 = vpop.f32.mrb[49].mxu0 }
 0x1c2   :  { %v2393_v37 = vadd.f32 %v6638_v34, %v2392_v36  ;;  %5589 = vmatprep.mubr.msk.f32.mxu1 %vm1701_vm0, %v2837_v31 }
 0x1c3   :  { %5590 = vmatmul.mubr.msk.f32.gmra.mrb[46].mxu1 %vm1701_vm0, %v2838_v33  ;;  %v2840_v40 = vmax.f32 %v2398_v35, 0.0 }
 0x1c4   :  { %v2839_v38 = vmax.f32 %v2393_v37, 0.0  ;;  %v5397_v39 = vpop.f32.mrb[50].mxu0 }
 0x1c5   :  { %v2408_v41 = vadd.f32 %v5397_v39, %v6638_v34  ;;  %v2402_v42 = vpop.f32.mrb[51].mxu0 }
 0x1c6   :  { %v2403_v43 = vadd.f32 %v6638_v34, %v2402_v42  ;;  %5592 = vmatprep.mubr.msk.f32.mxu1 %vm1701_vm0, %v2839_v38 }
 0x1c7   :  { %5593 = vmatmul.mubr.msk.f32.gmra.mrb[48].mxu1 %vm1701_vm0, %v2840_v40  ;;  %v2842_v46 = vmax.f32 %v2408_v41, 0.0 }
 0x1c8   :  { %v2841_v44 = vmax.f32 %v2403_v43, 0.0  ;;  %v5400_v45 = vpop.f32.mrb[52].mxu0 }
 0x1c9   :  { %v2418_v47 = vadd.f32 %v5400_v45, %v6638_v34  ;;  %v2412_v48 = vpop.f32.mrb[53].mxu0 }
 0x1ca   :  { %v2413_v49 = vadd.f32 %v6638_v34, %v2412_v48  ;;  %5595 = vmatprep.mubr.msk.f32.mxu1 %vm1701_vm0, %v2841_v44 }
 0x1cb   :  { %5596 = vmatmul.mubr.msk.f32.gmra.mrb[50].mxu1 %vm1701_vm0, %v2842_v46  ;;  %v2844_v52 = vmax.f32 %v2418_v47, 0.0 }
 0x1cc   :  { %v2843_v50 = vmax.f32 %v2413_v49, 0.0  ;;  %v5403_v51 = vpop.f32.mrb[54].mxu0 }
 0x1cd   :  { %v2428_v53 = vadd.f32 %v5403_v51, %v6638_v34  ;;  %v2422_v54 = vpop.f32.mrb[55].mxu0 }
 0x1ce   :  { %v2423_v55 = vadd.f32 %v6638_v34, %v2422_v54  ;;  %5598 = vmatprep.mubr.msk.f32.mxu1 %vm1701_vm0, %v2843_v50 }
 0x1cf   :  { %5599 = vmatmul.mubr.msk.f32.gmra.mrb[52].mxu1 %vm1701_vm0, %v2844_v52  ;;  %v2846_v58 = vmax.f32 %v2428_v53, 0.0 }
 0x1d0   :  { %v2845_v56 = vmax.f32 %v2423_v55, 0.0  ;;  %v5406_v57 = vpop.f32.mrb[56].mxu0 }
 0x1d1   :  { %v2438_v59 = vadd.f32 %v5406_v57, %v6638_v34  ;;  %v2432_v60 = vpop.f32.mrb[57].mxu0 }
 0x1d2   :  { %v2433_v61 = vadd.f32 %v6638_v34, %v2432_v60  ;;  %5601 = vmatprep.mubr.msk.f32.mxu1 %vm1701_vm0, %v2845_v56 }
 0x1d3   :  { %5602 = vmatmul.mubr.msk.f32.gmra.mrb[54].mxu1 %vm1701_vm0, %v2846_v58  ;;  %v2848_v0 = vmax.f32 %v2438_v59, 0.0 }
 0x1d4   :  { %v2847_v62 = vmax.f32 %v2433_v61, 0.0  ;;  %v5409_v63 = vpop.f32.mrb[58].mxu0 }
 0x1d5   :  { %v2448_v1 = vadd.f32 %v5409_v63, %v6638_v34  ;;  %v2442_v2 = vpop.f32.mrb[59].mxu0 }
 0x1d6   :  { %v2443_v3 = vadd.f32 %v6638_v34, %v2442_v2  ;;  %5604 = vmatprep.mubr.msk.f32.mxu1 %vm1701_vm0, %v2847_v62 }
 0x1d7   :  { %5605 = vmatmul.mubr.msk.f32.gmra.mrb[56].mxu1 %vm1701_vm0, %v2848_v0  ;;  %v2850_v6 = vmax.f32 %v2448_v1, 0.0 }
 0x1d8   :  { %v2849_v4 = vmax.f32 %v2443_v3, 0.0  ;;  %v5412_v5 = vpop.f32.mrb[60].mxu0 }
 0x1d9   :  { %v2458_v7 = vadd.f32 %v5412_v5, %v6638_v34  ;;  %v2452_v8 = vpop.f32.mrb[61].mxu0 }
 0x1da   :  { %v2453_v9 = vadd.f32 %v6638_v34, %v2452_v8  ;;  %5607 = vmatprep.mubr.msk.f32.mxu1 %vm1701_vm0, %v2849_v4 }
 0x1db   :  { %5608 = vmatmul.mubr.msk.f32.gmra.mrb[58].mxu1 %vm1701_vm0, %v2850_v6  ;;  %v2852_v12 = vmax.f32 %v2458_v7, 0.0 }
 0x1dc   :  { %v2851_v10 = vmax.f32 %v2453_v9, 0.0  ;;  %v5415_v11 = vpop.f32.mrb[62].mxu0 }
 0x1dd   :  { %v2468_v13 = vadd.f32 %v5415_v11, %v6638_v34  ;;  %v2462_v14 = vpop.f32.mrb[63].mxu0 }
 0x1de   :  { %v2463_v15 = vadd.f32 %v6638_v34, %v2462_v14  ;;  %5610 = vmatprep.mubr.msk.f32.mxu1 %vm1701_vm0, %v2851_v10 }
 0x1df   :  { %5611 = vmatmul.mubr.msk.f32.gmra.mrb[60].mxu1 %vm1701_vm0, %v2852_v12  ;;  %v2854_v18 = vmax.f32 %v2468_v13, 0.0 }
 0x1e0   :  { %v2853_v16 = vmax.f32 %v2463_v15, 0.0  ;;  %v5418_v17 = vpop.f32.mrb[64].mxu0 }
 0x1e1   :  { %v2478_v19 = vadd.f32 %v5418_v17, %v6638_v34  ;;  %v2472_v20 = vpop.f32.mrb[65].mxu0 }
 0x1e2   :  { %v2473_v21 = vadd.f32 %v6638_v34, %v2472_v20  ;;  %5613 = vmatprep.mubr.msk.f32.mxu1 %vm1701_vm0, %v2853_v16 }
 0x1e3   :  { %5614 = vmatmul.mubr.msk.f32.gmra.mrb[62].mxu1 %vm1701_vm0, %v2854_v18  ;;  %v2856_v24 = vmax.f32 %v2478_v19, 0.0 }
 0x1e4   :  { %v2855_v22 = vmax.f32 %v2473_v21, 0.0  ;;  %v5421_v23 = vpop.f32.mrb[66].mxu0 }
 0x1e5   :  { %v2488_v25 = vadd.f32 %v5421_v23, %v6638_v34  ;;  %v2482_v26 = vpop.f32.mrb[67].mxu0 }
 0x1e6   :  { %v2483_v27 = vadd.f32 %v6638_v34, %v2482_v26  ;;  %5616 = vmatprep.mubr.msk.f32.mxu1 %vm1701_vm0, %v2855_v22 }
 0x1e7   :  { %5617 = vmatmul.mubr.msk.f32.gmra.mrb[64].mxu1 %vm1701_vm0, %v2856_v24  ;;  %v2858_v30 = vmax.f32 %v2488_v25, 0.0 }
 0x1e8   :  { %v2857_v28 = vmax.f32 %v2483_v27, 0.0  ;;  %v5424_v29 = vpop.f32.mrb[68].mxu0 }
 0x1e9   :  { %v2498_v31 = vadd.f32 %v5424_v29, %v6638_v34  ;;  %v2492_v32 = vpop.f32.mrb[69].mxu0 }
 0x1ea   :  { %v2493_v33 = vadd.f32 %v6638_v34, %v2492_v32  ;;  %5619 = vmatprep.mubr.msk.f32.mxu1 %vm1701_vm0, %v2857_v28 }
 0x1eb   :  { %5620 = vmatmul.mubr.msk.f32.gmra.mrb[66].mxu1 %vm1701_vm0, %v2858_v30  ;;  %v2860_v37 = vmax.f32 %v2498_v31, 0.0 }
 0x1ec   :  { %v2859_v35 = vmax.f32 %v2493_v33, 0.0  ;;  %v5427_v36 = vpop.f32.mrb[70].mxu0 }
 0x1ed   :  { %v2508_v38 = vadd.f32 %v5427_v36, %v6638_v34  ;;  %v2502_v39 = vpop.f32.mrb[71].mxu0 }
 0x1ee   :  { %v2503_v40 = vadd.f32 %v6638_v34, %v2502_v39  ;;  %5622 = vmatprep.mubr.msk.f32.mxu1 %vm1701_vm0, %v2859_v35 }
 0x1ef   :  { %5623 = vmatmul.mubr.msk.f32.gmra.mrb[68].mxu1 %vm1701_vm0, %v2860_v37  ;;  %v2862_v43 = vmax.f32 %v2508_v38, 0.0 }
 0x1f0   :  { %v2861_v41 = vmax.f32 %v2503_v40, 0.0  ;;  %v5430_v42 = vpop.f32.mrb[72].mxu0 }
 0x1f1   :  { %v2518_v44 = vadd.f32 %v5430_v42, %v6638_v34  ;;  %v2512_v45 = vpop.f32.mrb[73].mxu0 }
 0x1f2   :  { %v2513_v46 = vadd.f32 %v6638_v34, %v2512_v45  ;;  %5625 = vmatprep.mubr.msk.f32.mxu1 %vm1701_vm0, %v2861_v41 }
 0x1f3   :  { %5626 = vmatmul.mubr.msk.f32.gmra.mrb[70].mxu1 %vm1701_vm0, %v2862_v43  ;;  %v2864_v49 = vmax.f32 %v2518_v44, 0.0 }
 0x1f4   :  { %v2863_v47 = vmax.f32 %v2513_v46, 0.0  ;;  %v5433_v48 = vpop.f32.mrb[74].mxu0 }
 0x1f5   :  { %v2528_v50 = vadd.f32 %v5433_v48, %v6638_v34  ;;  %v2522_v51 = vpop.f32.mrb[75].mxu0 }
 0x1f6   :  { %v2523_v52 = vadd.f32 %v6638_v34, %v2522_v51  ;;  %5628 = vmatprep.mubr.msk.f32.mxu1 %vm1701_vm0, %v2863_v47 }
 0x1f7   :  { %5629 = vmatmul.mubr.msk.f32.gmra.mrb[72].mxu1 %vm1701_vm0, %v2864_v49  ;;  %v2866_v55 = vmax.f32 %v2528_v50, 0.0 }
 0x1f8   :  { %v2865_v53 = vmax.f32 %v2523_v52, 0.0  ;;  %v5436_v54 = vpop.f32.mrb[76].mxu0 }
 0x1f9   :  { %v2538_v56 = vadd.f32 %v5436_v54, %v6638_v34  ;;  %v2532_v57 = vpop.f32.mrb[77].mxu0 }
 0x1fa   :  { %v2533_v58 = vadd.f32 %v6638_v34, %v2532_v57  ;;  %5631 = vmatprep.mubr.msk.f32.mxu1 %vm1701_vm0, %v2865_v53  ;;  %v6899_v53 = vld [vmem:[%s7617_s4] ss:$0 sm:$0xff] }
 0x1fb   :  { %5632 = vmatmul.mubr.msk.f32.gmra.mrb[74].mxu1 %vm1701_vm0, %v2866_v55  ;;  %v2868_v61 = vmax.f32 %v2538_v56, 0.0 }
 0x1fc   :  { %v2867_v59 = vmax.f32 %v2533_v58, 0.0  ;;  %v5439_v60 = vpop.f32.mrb[78].mxu0 }
 0x1fd   :  { %v2548_v62 = vadd.f32 %v5439_v60, %v6638_v34  ;;  %v2542_v63 = vpop.f32.mrb[79].mxu0 }
 0x1fe   :  { %v2543_v0 = vadd.f32 %v6638_v34, %v2542_v63  ;;  %5634 = vmatprep.mubr.msk.f32.mxu1 %vm1701_vm0, %v2867_v59 }
 0x1ff   :  { %5635 = vmatmul.mubr.msk.f32.gmra.mrb[76].mxu1 %vm1701_vm0, %v2868_v61  ;;  %v2870_v3 = vmax.f32 %v2548_v62, 0.0 }
 0x200   :  { %v2869_v1 = vmax.f32 %v2543_v0, 0.0  ;;  %v5442_v2 = vpop.f32.mrb[80].mxu0 }
 0x201   :  { %v2558_v4 = vadd.f32 %v5442_v2, %v6638_v34  ;;  %v2552_v5 = vpop.f32.mrb[81].mxu0 }
 0x202   :  { %v2553_v6 = vadd.f32 %v6638_v34, %v2552_v5  ;;  %5637 = vmatprep.mubr.msk.f32.mxu1 %vm1701_vm0, %v2869_v1 }
 0x203   :  { %5638 = vmatmul.mubr.msk.f32.gmra.mrb[78].mxu1 %vm1701_vm0, %v2870_v3  ;;  %v2872_v9 = vmax.f32 %v2558_v4, 0.0 }
 0x204   :  { %v2871_v7 = vmax.f32 %v2553_v6, 0.0  ;;  %v5445_v8 = vpop.f32.mrb[82].mxu0 }
 0x205   :  { %v2568_v10 = vadd.f32 %v5445_v8, %v6638_v34  ;;  %v2562_v11 = vpop.f32.mrb[83].mxu0 }
 0x206   :  { %v2563_v12 = vadd.f32 %v6638_v34, %v2562_v11  ;;  %5640 = vmatprep.mubr.msk.f32.mxu1 %vm1701_vm0, %v2871_v7 }
 0x207   :  { %5641 = vmatmul.mubr.msk.f32.gmra.mrb[80].mxu1 %vm1701_vm0, %v2872_v9  ;;  %v2874_v15 = vmax.f32 %v2568_v10, 0.0 }
 0x208   :  { %v2873_v13 = vmax.f32 %v2563_v12, 0.0  ;;  %v5448_v14 = vpop.f32.mrb[84].mxu0 }
 0x209   :  { %v2578_v16 = vadd.f32 %v5448_v14, %v6638_v34  ;;  %v2572_v17 = vpop.f32.mrb[85].mxu0 }
 0x20a   :  { %v2573_v18 = vadd.f32 %v6638_v34, %v2572_v17  ;;  %5643 = vmatprep.mubr.msk.f32.mxu1 %vm1701_vm0, %v2873_v13 }
 0x20b   :  { %5644 = vmatmul.mubr.msk.f32.gmra.mrb[82].mxu1 %vm1701_vm0, %v2874_v15  ;;  %v2876_v21 = vmax.f32 %v2578_v16, 0.0 }
 0x20c   :  { %v2875_v19 = vmax.f32 %v2573_v18, 0.0  ;;  %v5451_v20 = vpop.f32.mrb[86].mxu0 }
 0x20d   :  { %v2588_v22 = vadd.f32 %v5451_v20, %v6638_v34  ;;  %v2582_v23 = vpop.f32.mrb[87].mxu0 }
 0x20e   :  { %v2583_v24 = vadd.f32 %v6638_v34, %v2582_v23  ;;  %5646 = vmatprep.mubr.msk.f32.mxu1 %vm1701_vm0, %v2875_v19 }
 0x20f   :  { %5647 = vmatmul.mubr.msk.f32.gmra.mrb[84].mxu1 %vm1701_vm0, %v2876_v21  ;;  %v2878_v27 = vmax.f32 %v2588_v22, 0.0 }
 0x210   :  { %v2877_v25 = vmax.f32 %v2583_v24, 0.0  ;;  %v5454_v26 = vpop.f32.mrb[88].mxu0  ;;  %v6928_v24 = vld [vmem:[%s7618_s6] ss:$0 sm:$0xff] }
 0x211   :  { %v2598_v28 = vadd.f32 %v5454_v26, %v6638_v34  ;;  %v2592_v29 = vpop.f32.mrb[89].mxu0 }
 0x212   :  { %v2593_v30 = vadd.f32 %v6638_v34, %v2592_v29  ;;  %5649 = vmatprep.mubr.msk.f32.mxu1 %vm1701_vm0, %v2877_v25 }
 0x213   :  { %5650 = vmatmul.mubr.msk.f32.gmra.mrb[86].mxu1 %vm1701_vm0, %v2878_v27  ;;  %v2880_v33 = vmax.f32 %v2598_v28, 0.0 }
 0x214   :  { %v2879_v31 = vmax.f32 %v2593_v30, 0.0  ;;  %v5457_v32 = vpop.f32.mrb[90].mxu0 }
 0x215   :  { %v2608_v35 = vadd.f32 %v5457_v32, %v6638_v34  ;;  %v2602_v36 = vpop.f32.mrb[91].mxu0 }
 0x216   :  { %v2603_v37 = vadd.f32 %v6638_v34, %v2602_v36  ;;  %5652 = vmatprep.mubr.msk.f32.mxu1 %vm1701_vm0, %v2879_v31 }
 0x217   :  { %5653 = vmatmul.mubr.msk.f32.gmra.mrb[88].mxu1 %vm1701_vm0, %v2880_v33  ;;  %v2882_v40 = vmax.f32 %v2608_v35, 0.0 }
 0x218   :  { %v2881_v38 = vmax.f32 %v2603_v37, 0.0  ;;  %v5460_v39 = vpop.f32.mrb[92].mxu0 }
 0x219   :  { %v2618_v41 = vadd.f32 %v5460_v39, %v6638_v34  ;;  %v2612_v42 = vpop.f32.mrb[93].mxu0 }
 0x21a   :  { %v2613_v43 = vadd.f32 %v6638_v34, %v2612_v42  ;;  %5655 = vmatprep.mubr.msk.f32.mxu1 %vm1701_vm0, %v2881_v38 }
 0x21b   :  { %5656 = vmatmul.mubr.msk.f32.gmra.mrb[90].mxu1 %vm1701_vm0, %v2882_v40  ;;  %v2884_v46 = vmax.f32 %v2618_v41, 0.0 }
 0x21c   :  { %v2883_v44 = vmax.f32 %v2613_v43, 0.0  ;;  %v5463_v45 = vpop.f32.mrb[94].mxu0 }
 0x21d   :  { %v2628_v47 = vadd.f32 %v5463_v45, %v6638_v34  ;;  %v2622_v48 = vpop.f32.mrb[95].mxu0 }
 0x21e   :  { %v2623_v49 = vadd.f32 %v6638_v34, %v2622_v48  ;;  %5658 = vmatprep.mubr.msk.f32.mxu1 %vm1701_vm0, %v2883_v44 }
 0x21f   :  { %5659 = vmatmul.mubr.msk.f32.gmra.mrb[92].mxu1 %vm1701_vm0, %v2884_v46  ;;  %v2886_v52 = vmax.f32 %v2628_v47, 0.0 }
 0x220   :  { %v2885_v50 = vmax.f32 %v2623_v49, 0.0  ;;  %v5466_v51 = vpop.f32.mrb[96].mxu0 }
 0x221   :  { %v2638_v54 = vadd.f32 %v6899_v53, %v5466_v51  ;;  %v2632_v55 = vpop.f32.mrb[97].mxu0 }
 0x222   :  { %v2633_v56 = vadd.f32 %v6899_v53, %v2632_v55  ;;  %5661 = vmatprep.mubr.msk.f32.mxu1 %vm1701_vm0, %v2885_v50 }
 0x223   :  { %5662 = vmatmul.mubr.msk.f32.gmra.mrb[94].mxu1 %vm1701_vm0, %v2886_v52  ;;  %v2888_v58 = vmax.f32 %v2638_v54, 0.0 }
 0x224   :  { %v2887_v34 = vmax.f32 %v2633_v56, 0.0  ;;  %v5469_v57 = vpop.f32.mrb[98].mxu0 }
 0x225   :  { %v2648_v59 = vadd.f32 %v6899_v53, %v5469_v57  ;;  %v2642_v60 = vpop.f32.mrb[99].mxu0 }
 0x226   :  { %v2643_v61 = vadd.f32 %v6899_v53, %v2642_v60  ;;  %5664 = vmatprep.mubr.msk.f32.mxu1 %vm1701_vm0, %v2887_v34 }
 0x227   :  { %5665 = vmatmul.mubr.msk.f32.gmra.mrb[96].mxu1 %vm1701_vm0, %v2888_v58  ;;  %v2890_v0 = vmax.f32 %v2648_v59, 0.0 }
 0x228   :  { %v2889_v62 = vmax.f32 %v2643_v61, 0.0  ;;  %v5472_v63 = vpop.f32.mrb[100].mxu0 }
 0x229   :  { %v2658_v1 = vadd.f32 %v6899_v53, %v5472_v63  ;;  %v2652_v2 = vpop.f32.mrb[101].mxu0 }
 0x22a   :  { %v2653_v3 = vadd.f32 %v6899_v53, %v2652_v2  ;;  %5667 = vmatprep.mubr.msk.f32.mxu1 %vm1701_vm0, %v2889_v62 }
 0x22b   :  { %5668 = vmatmul.mubr.msk.f32.gmra.mrb[98].mxu1 %vm1701_vm0, %v2890_v0  ;;  %v2892_v6 = vmax.f32 %v2658_v1, 0.0 }
 0x22c   :  { %v2891_v4 = vmax.f32 %v2653_v3, 0.0  ;;  %v5475_v5 = vpop.f32.mrb[102].mxu0 }
 0x22d   :  { %v2668_v7 = vadd.f32 %v6899_v53, %v5475_v5  ;;  %v2662_v8 = vpop.f32.mrb[103].mxu0 }
 0x22e   :  { %v2663_v9 = vadd.f32 %v6899_v53, %v2662_v8  ;;  %5670 = vmatprep.mubr.msk.f32.mxu1 %vm1701_vm0, %v2891_v4 }
 0x22f   :  { %5671 = vmatmul.mubr.msk.f32.gmra.mrb[100].mxu1 %vm1701_vm0, %v2892_v6  ;;  %v2894_v12 = vmax.f32 %v2668_v7, 0.0 }
 0x230   :  { %v2893_v10 = vmax.f32 %v2663_v9, 0.0  ;;  %v5478_v11 = vpop.f32.mrb[104].mxu0 }
 0x231   :  { %v2678_v13 = vadd.f32 %v6899_v53, %v5478_v11  ;;  %v2672_v14 = vpop.f32.mrb[105].mxu0 }
 0x232   :  { %v2673_v15 = vadd.f32 %v6899_v53, %v2672_v14  ;;  %5673 = vmatprep.mubr.msk.f32.mxu1 %vm1701_vm0, %v2893_v10 }
 0x233   :  { %5674 = vmatmul.mubr.msk.f32.gmra.mrb[102].mxu1 %vm1701_vm0, %v2894_v12  ;;  %v2896_v18 = vmax.f32 %v2678_v13, 0.0 }
 0x234   :  { %v2895_v16 = vmax.f32 %v2673_v15, 0.0  ;;  %v5481_v17 = vpop.f32.mrb[106].mxu0 }
 0x235   :  { %v2688_v19 = vadd.f32 %v6899_v53, %v5481_v17  ;;  %v2682_v20 = vpop.f32.mrb[107].mxu0 }
 0x236   :  { %v2683_v21 = vadd.f32 %v6899_v53, %v2682_v20  ;;  %5676 = vmatprep.mubr.msk.f32.mxu1 %vm1701_vm0, %v2895_v16 }
 0x237   :  { %5677 = vmatmul.mubr.msk.f32.gmra.mrb[104].mxu1 %vm1701_vm0, %v2896_v18  ;;  %v2898_v25 = vmax.f32 %v2688_v19, 0.0 }
 0x238   :  { %v2897_v22 = vmax.f32 %v2683_v21, 0.0  ;;  %v5484_v23 = vpop.f32.mrb[108].mxu0 }
 0x239   :  { %v2698_v26 = vadd.f32 %v6899_v53, %v5484_v23  ;;  %v2692_v27 = vpop.f32.mrb[109].mxu0 }
 0x23a   :  { %v2693_v28 = vadd.f32 %v6899_v53, %v2692_v27  ;;  %v5522_v29 = vpop.f32.mrb[0].mxu1  ;;  %5679 = vmatprep.mubr.msk.f32.mxu1 %vm1701_vm0, %v2897_v22 }
 0x23b   :  { %v3386_v30 = vadd.f32 %v5522_v29, %v6928_v24  ;;  %v3380_v31 = vpop.f32.mrb[1].mxu1  ;;  %5680 = vmatmul.mubr.msk.f32.gmra.mrb[106].mxu1 %vm1701_vm0, %v2898_v25  ;;  %v2900_v36 = vmax.f32 %v2698_v26, 0.0 }
 0x23c   :  { %v2899_v32 = vmax.f32 %v2693_v28, 0.0  ;;  %v3381_v33 = vadd.f32 %v6928_v24, %v3380_v31  ;;  %v5487_v35 = vpop.f32.mrb[110].mxu0 }
 0x23d   :  { %4021 = vst.msk [vmem:[%s7619_s7 + $0x8] sm:$0xff] %vm4019_vm1, %v3386_v30  ;;  %v2708_v37 = vadd.f32 %v6899_v53, %v5487_v35  ;;  %v2702_v38 = vpop.f32.mrb[111].mxu0 }
 0x23e   :  { %4020 = vst.msk [vmem:[%s7619_s7] sm:$0xff] %vm4019_vm1, %v3381_v33  ;;  %v2703_v39 = vadd.f32 %v6899_v53, %v2702_v38  ;;  %v5525_v40 = vpop.f32.mrb[2].mxu1  ;;  %5682 = vmatprep.mubr.msk.f32.mxu1 %vm1701_vm0, %v2899_v32 }
 0x23f   :  { %v3396_v41 = vadd.f32 %v5525_v40, %v6928_v24  ;;  %v3390_v42 = vpop.f32.mrb[3].mxu1  ;;  %5683 = vmatmul.mubr.msk.f32.gmra.mrb[108].mxu1 %vm1701_vm0, %v2900_v36  ;;  %v2902_v46 = vmax.f32 %v2708_v37, 0.0 }
 0x240   :  { %v2901_v43 = vmax.f32 %v2703_v39, 0.0  ;;  %v3391_v44 = vadd.f32 %v6928_v24, %v3390_v42  ;;  %v5490_v45 = vpop.f32.mrb[112].mxu0 }
 0x241   :  { %4023 = vst.msk [vmem:[%s7619_s7 + $0x18] sm:$0xff] %vm4019_vm1, %v3396_v41  ;;  %v2718_v47 = vadd.f32 %v6899_v53, %v5490_v45  ;;  %v2712_v48 = vpop.f32.mrb[113].mxu0 }
 0x242   :  { %4022 = vst.msk [vmem:[%s7619_s7 + $0x10] sm:$0xff] %vm4019_vm1, %v3391_v44  ;;  %v2713_v49 = vadd.f32 %v6899_v53, %v2712_v48  ;;  %v5528_v50 = vpop.f32.mrb[4].mxu1  ;;  %5685 = vmatprep.mubr.msk.f32.mxu1 %vm1701_vm0, %v2901_v43 }
 0x243   :  { %v3406_v51 = vadd.f32 %v5528_v50, %v6928_v24  ;;  %v3400_v52 = vpop.f32.mrb[5].mxu1  ;;  %5686 = vmatmul.mubr.msk.f32.gmra.mrb[110].mxu1 %vm1701_vm0, %v2902_v46  ;;  %v2904_v34 = vmax.f32 %v2718_v47, 0.0 }
 0x244   :  { %v2903_v54 = vmax.f32 %v2713_v49, 0.0  ;;  %v3401_v55 = vadd.f32 %v6928_v24, %v3400_v52  ;;  %v5493_v56 = vpop.f32.mrb[114].mxu0 }
 0x245   :  { %4025 = vst.msk [vmem:[%s7619_s7 + $0x28] sm:$0xff] %vm4019_vm1, %v3406_v51  ;;  %v2728_v57 = vadd.f32 %v6899_v53, %v5493_v56  ;;  %v2722_v58 = vpop.f32.mrb[115].mxu0 }
 0x246   :  { %4024 = vst.msk [vmem:[%s7619_s7 + $0x20] sm:$0xff] %vm4019_vm1, %v3401_v55  ;;  %v2723_v59 = vadd.f32 %v6899_v53, %v2722_v58  ;;  %v5531_v60 = vpop.f32.mrb[6].mxu1  ;;  %5688 = vmatprep.mubr.msk.f32.mxu1 %vm1701_vm0, %v2903_v54 }
 0x247   :  { %v3416_v61 = vadd.f32 %v5531_v60, %v6928_v24  ;;  %v3410_v62 = vpop.f32.mrb[7].mxu1  ;;  %5689 = vmatmul.mubr.msk.f32.gmra.mrb[112].mxu1 %vm1701_vm0, %v2904_v34  ;;  %v2906_v2 = vmax.f32 %v2728_v57, 0.0 }
 0x248   :  { %v2905_v63 = vmax.f32 %v2723_v59, 0.0  ;;  %v3411_v0 = vadd.f32 %v6928_v24, %v3410_v62  ;;  %v5496_v1 = vpop.f32.mrb[116].mxu0 }
 0x249   :  { %4027 = vst.msk [vmem:[%s7619_s7 + $0x38] sm:$0xff] %vm4019_vm1, %v3416_v61  ;;  %v2738_v3 = vadd.f32 %v6899_v53, %v5496_v1  ;;  %v2732_v4 = vpop.f32.mrb[117].mxu0 }
 0x24a   :  { %4026 = vst.msk [vmem:[%s7619_s7 + $0x30] sm:$0xff] %vm4019_vm1, %v3411_v0  ;;  %v2733_v5 = vadd.f32 %v6899_v53, %v2732_v4  ;;  %v5534_v6 = vpop.f32.mrb[8].mxu1  ;;  %5691 = vmatprep.mubr.msk.f32.mxu1 %vm1701_vm0, %v2905_v63 }
 0x24b   :  { %v3426_v7 = vadd.f32 %v5534_v6, %v6928_v24  ;;  %v3420_v8 = vpop.f32.mrb[9].mxu1  ;;  %5692 = vmatmul.mubr.msk.f32.gmra.mrb[114].mxu1 %vm1701_vm0, %v2906_v2  ;;  %v2908_v12 = vmax.f32 %v2738_v3, 0.0 }
 0x24c   :  { %v2907_v9 = vmax.f32 %v2733_v5, 0.0  ;;  %v3421_v10 = vadd.f32 %v6928_v24, %v3420_v8  ;;  %v5499_v11 = vpop.f32.mrb[118].mxu0 }
 0x24d   :  { %4029 = vst.msk [vmem:[%s7619_s7 + $0x48] sm:$0xff] %vm4019_vm1, %v3426_v7  ;;  %v2748_v13 = vadd.f32 %v6899_v53, %v5499_v11  ;;  %v2742_v14 = vpop.f32.mrb[119].mxu0 }
 0x24e   :  { %4028 = vst.msk [vmem:[%s7619_s7 + $0x40] sm:$0xff] %vm4019_vm1, %v3421_v10  ;;  %v2743_v15 = vadd.f32 %v6899_v53, %v2742_v14  ;;  %v5537_v16 = vpop.f32.mrb[10].mxu1  ;;  %5694 = vmatprep.mubr.msk.f32.mxu1 %vm1701_vm0, %v2907_v9 }
 0x24f   :  { %v3436_v17 = vadd.f32 %v5537_v16, %v6928_v24  ;;  %v3430_v18 = vpop.f32.mrb[11].mxu1  ;;  %5695 = vmatmul.mubr.msk.f32.gmra.mrb[116].mxu1 %vm1701_vm0, %v2908_v12  ;;  %v2910_v22 = vmax.f32 %v2748_v13, 0.0 }
 0x250   :  { %v2909_v19 = vmax.f32 %v2743_v15, 0.0  ;;  %v3431_v20 = vadd.f32 %v6928_v24, %v3430_v18  ;;  %v5502_v21 = vpop.f32.mrb[120].mxu0 }
 0x251   :  { %4031 = vst.msk [vmem:[%s7619_s7 + $0x58] sm:$0xff] %vm4019_vm1, %v3436_v17  ;;  %v2758_v23 = vadd.f32 %v6899_v53, %v5502_v21  ;;  %v2752_v25 = vpop.f32.mrb[121].mxu0 }
 0x252   :  { %4030 = vst.msk [vmem:[%s7619_s7 + $0x50] sm:$0xff] %vm4019_vm1, %v3431_v20  ;;  %v2753_v26 = vadd.f32 %v6899_v53, %v2752_v25  ;;  %v5540_v27 = vpop.f32.mrb[12].mxu1  ;;  %5697 = vmatprep.mubr.msk.f32.mxu1 %vm1701_vm0, %v2909_v19 }
 0x253   :  { %v3446_v28 = vadd.f32 %v5540_v27, %v6928_v24  ;;  %v3440_v29 = vpop.f32.mrb[13].mxu1  ;;  %5698 = vmatmul.mubr.msk.f32.gmra.mrb[118].mxu1 %vm1701_vm0, %v2910_v22  ;;  %v2912_v33 = vmax.f32 %v2758_v23, 0.0 }
 0x254   :  { %v2911_v30 = vmax.f32 %v2753_v26, 0.0  ;;  %v3441_v31 = vadd.f32 %v6928_v24, %v3440_v29  ;;  %v5505_v32 = vpop.f32.mrb[122].mxu0 }
 0x255   :  { %4033 = vst.msk [vmem:[%s7619_s7 + $0x68] sm:$0xff] %vm4019_vm1, %v3446_v28  ;;  %v2768_v35 = vadd.f32 %v6899_v53, %v5505_v32  ;;  %v2762_v36 = vpop.f32.mrb[123].mxu0 }
 0x256   :  { %4032 = vst.msk [vmem:[%s7619_s7 + $0x60] sm:$0xff] %vm4019_vm1, %v3441_v31  ;;  %v2763_v37 = vadd.f32 %v6899_v53, %v2762_v36  ;;  %v5543_v38 = vpop.f32.mrb[14].mxu1  ;;  %5700 = vmatprep.mubr.msk.f32.mxu1 %vm1701_vm0, %v2911_v30 }
 0x257   :  { %v3456_v39 = vadd.f32 %v5543_v38, %v6928_v24  ;;  %v3450_v40 = vpop.f32.mrb[15].mxu1  ;;  %5701 = vmatmul.mubr.msk.f32.gmra.mrb[120].mxu1 %vm1701_vm0, %v2912_v33  ;;  %v2914_v44 = vmax.f32 %v2768_v35, 0.0 }
 0x258   :  { %v2913_v41 = vmax.f32 %v2763_v37, 0.0  ;;  %v3451_v42 = vadd.f32 %v6928_v24, %v3450_v40  ;;  %v5508_v43 = vpop.f32.mrb[124].mxu0 }
 0x259   :  { %4035 = vst.msk [vmem:[%s7619_s7 + $0x78] sm:$0xff] %vm4019_vm1, %v3456_v39  ;;  %v2778_v45 = vadd.f32 %v6899_v53, %v5508_v43  ;;  %v2772_v46 = vpop.f32.mrb[125].mxu0 }
 0x25a   :  { %4034 = vst.msk [vmem:[%s7619_s7 + $0x70] sm:$0xff] %vm4019_vm1, %v3451_v42  ;;  %v2773_v47 = vadd.f32 %v6899_v53, %v2772_v46  ;;  %v5546_v48 = vpop.f32.mrb[16].mxu1  ;;  %5703 = vmatprep.mubr.msk.f32.mxu1 %vm1701_vm0, %v2913_v41 }
 0x25b   :  { %v3466_v49 = vadd.f32 %v5546_v48, %v6928_v24  ;;  %v3460_v50 = vpop.f32.mrb[17].mxu1  ;;  %5704 = vmatmul.mubr.msk.f32.gmra.mrb[122].mxu1 %vm1701_vm0, %v2914_v44  ;;  %v2916_v55 = vmax.f32 %v2778_v45, 0.0 }
 0x25c   :  { %v2915_v51 = vmax.f32 %v2773_v47, 0.0  ;;  %v3461_v52 = vadd.f32 %v6928_v24, %v3460_v50  ;;  %v5511_v54 = vpop.f32.mrb[126].mxu0 }
 0x25d   :  { %4037 = vst.msk [vmem:[%s7619_s7 + $0x88] sm:$0xff] %vm4019_vm1, %v3466_v49  ;;  %v2788_v56 = vadd.f32 %v6899_v53, %v5511_v54  ;;  %v2782_v34 = vpop.f32.mrb[127].mxu0 }
 0x25e   :  { %4036 = vst.msk [vmem:[%s7619_s7 + $0x80] sm:$0xff] %vm4019_vm1, %v3461_v52  ;;  %v2783_v57 = vadd.f32 %v6899_v53, %v2782_v34  ;;  %v5549_v58 = vpop.f32.mrb[18].mxu1  ;;  %5706 = vmatprep.mubr.msk.f32.mxu1 %vm1701_vm0, %v2915_v51 }
 0x25f   :  { %v3476_v59 = vadd.f32 %v5549_v58, %v6928_v24  ;;  %v3470_v60 = vpop.f32.mrb[19].mxu1  ;;  %5707 = vmatmul.mubr.msk.f32.gmra.mrb[124].mxu1 %vm1701_vm0, %v2916_v55  ;;  %v2918_v63 = vmax.f32 %v2788_v56, 0.0 }
 0x260   :  { %v2917_v61 = vmax.f32 %v2783_v57, 0.0  ;;  %v3471_v62 = vadd.f32 %v6928_v24, %v3470_v60 }
 0x261   :  { %4039 = vst.msk [vmem:[%s7619_s7 + $0x98] sm:$0xff] %vm4019_vm1, %v3476_v59 }
 0x262   :  { %4038 = vst.msk [vmem:[%s7619_s7 + $0x90] sm:$0xff] %vm4019_vm1, %v3471_v62  ;;  %v5552_v53 = vpop.f32.mrb[20].mxu1  ;;  %5709 = vmatprep.mubr.msk.f32.mxu1 %vm1701_vm0, %v2917_v61 }
 0x263   :  { %v3486_v0 = vadd.f32 %v5552_v53, %v6928_v24  ;;  %v3480_v1 = vpop.f32.mrb[21].mxu1  ;;  %5710 = vmatmul.mubr.msk.f32.gmra.mrb[126].mxu1 %vm1701_vm0, %v2918_v63 }
 0x264   :  { %v3481_v2 = vadd.f32 %v6928_v24, %v3480_v1 }
 0x265   :  { %4041 = vst.msk [vmem:[%s7619_s7 + $0xa8] sm:$0xff] %vm4019_vm1, %v3486_v0 }
 0x266   :  { %4040 = vst.msk [vmem:[%s7619_s7 + $0xa0] sm:$0xff] %vm4019_vm1, %v3481_v2  ;;  %v5555_v3 = vpop.f32.mrb[22].mxu1 }
 0x267   :  { %v3496_v4 = vadd.f32 %v5555_v3, %v6928_v24  ;;  %v3490_v5 = vpop.f32.mrb[23].mxu1 }
 0x268   :  { %v3491_v6 = vadd.f32 %v6928_v24, %v3490_v5 }
 0x269   :  { %4043 = vst.msk [vmem:[%s7619_s7 + $0xb8] sm:$0xff] %vm4019_vm1, %v3496_v4 }
 0x26a   :  { %4042 = vst.msk [vmem:[%s7619_s7 + $0xb0] sm:$0xff] %vm4019_vm1, %v3491_v6  ;;  %v5558_v7 = vpop.f32.mrb[24].mxu1 }
 0x26b   :  { %v3506_v8 = vadd.f32 %v5558_v7, %v6928_v24  ;;  %v3500_v9 = vpop.f32.mrb[25].mxu1 }
 0x26c   :  { %v3501_v10 = vadd.f32 %v6928_v24, %v3500_v9 }
 0x26d   :  { %4045 = vst.msk [vmem:[%s7619_s7 + $0xc8] sm:$0xff] %vm4019_vm1, %v3506_v8 }
 0x26e   :  { %4044 = vst.msk [vmem:[%s7619_s7 + $0xc0] sm:$0xff] %vm4019_vm1, %v3501_v10  ;;  %v5561_v11 = vpop.f32.mrb[26].mxu1 }
 0x26f   :  { %v3516_v12 = vadd.f32 %v5561_v11, %v6928_v24  ;;  %v3510_v13 = vpop.f32.mrb[27].mxu1 }
 0x270   :  { %v3511_v14 = vadd.f32 %v6928_v24, %v3510_v13 }
 0x271   :  { %4047 = vst.msk [vmem:[%s7619_s7 + $0xd8] sm:$0xff] %vm4019_vm1, %v3516_v12 }
 0x272   :  { %4046 = vst.msk [vmem:[%s7619_s7 + $0xd0] sm:$0xff] %vm4019_vm1, %v3511_v14  ;;  %v5564_v15 = vpop.f32.mrb[28].mxu1 }
 0x273   :  { %v3526_v16 = vadd.f32 %v5564_v15, %v6928_v24  ;;  %v3520_v17 = vpop.f32.mrb[29].mxu1 }
 0x274   :  { %v3521_v18 = vadd.f32 %v6928_v24, %v3520_v17 }
 0x275   :  { %4049 = vst.msk [vmem:[%s7619_s7 + $0xe8] sm:$0xff] %vm4019_vm1, %v3526_v16 }
 0x276   :  { %4048 = vst.msk [vmem:[%s7619_s7 + $0xe0] sm:$0xff] %vm4019_vm1, %v3521_v18  ;;  %v5567_v19 = vpop.f32.mrb[30].mxu1 }
 0x277   :  { %v3536_v20 = vadd.f32 %v5567_v19, %v6928_v24  ;;  %v3530_v21 = vpop.f32.mrb[31].mxu1 }
 0x278   :  { %v3531_v22 = vadd.f32 %v6928_v24, %v3530_v21 }
 0x279   :  { %4051 = vst.msk [vmem:[%s7619_s7 + $0xf8] sm:$0xff] %vm4019_vm1, %v3536_v20 }
 0x27a   :  { %4050 = vst.msk [vmem:[%s7619_s7 + $0xf0] sm:$0xff] %vm4019_vm1, %v3531_v22  ;;  %v5570_v23 = vpop.f32.mrb[32].mxu1 }
 0x27b   :  { %v3546_v25 = vadd.f32 %v5570_v23, %v6928_v24  ;;  %v3540_v26 = vpop.f32.mrb[33].mxu1 }
 0x27c   :  { %v3541_v27 = vadd.f32 %v6928_v24, %v3540_v26 }
 0x27d   :  { %4053 = vst.msk [vmem:[%s7619_s7 + $0x108] sm:$0xff] %vm4019_vm1, %v3546_v25 }
 0x27e   :  { %4052 = vst.msk [vmem:[%s7619_s7 + $0x100] sm:$0xff] %vm4019_vm1, %v3541_v27  ;;  %v5573_v28 = vpop.f32.mrb[34].mxu1 }
 0x27f   :  { %v3556_v29 = vadd.f32 %v5573_v28, %v6928_v24  ;;  %v3550_v30 = vpop.f32.mrb[35].mxu1 }
 0x280   :  { %v3551_v31 = vadd.f32 %v6928_v24, %v3550_v30 }
 0x281   :  { %4055 = vst.msk [vmem:[%s7619_s7 + $0x118] sm:$0xff] %vm4019_vm1, %v3556_v29 }
 0x282   :  { %4054 = vst.msk [vmem:[%s7619_s7 + $0x110] sm:$0xff] %vm4019_vm1, %v3551_v31  ;;  %v5576_v32 = vpop.f32.mrb[36].mxu1 }
 0x283   :  { %v3566_v33 = vadd.f32 %v5576_v32, %v6928_v24  ;;  %v3560_v35 = vpop.f32.mrb[37].mxu1 }
 0x284   :  { %v3561_v36 = vadd.f32 %v6928_v24, %v3560_v35 }
 0x285   :  { %4057 = vst.msk [vmem:[%s7619_s7 + $0x128] sm:$0xff] %vm4019_vm1, %v3566_v33 }
 0x286   :  { %4056 = vst.msk [vmem:[%s7619_s7 + $0x120] sm:$0xff] %vm4019_vm1, %v3561_v36  ;;  %v5579_v37 = vpop.f32.mrb[38].mxu1 }
 0x287   :  { %v3576_v38 = vadd.f32 %v5579_v37, %v6928_v24  ;;  %v3570_v39 = vpop.f32.mrb[39].mxu1 }
 0x288   :  { %v3571_v40 = vadd.f32 %v6928_v24, %v3570_v39 }
 0x289   :  { %4059 = vst.msk [vmem:[%s7619_s7 + $0x138] sm:$0xff] %vm4019_vm1, %v3576_v38 }
 0x28a   :  { %4058 = vst.msk [vmem:[%s7619_s7 + $0x130] sm:$0xff] %vm4019_vm1, %v3571_v40  ;;  %v5582_v41 = vpop.f32.mrb[40].mxu1 }
 0x28b   :  { %v3586_v42 = vadd.f32 %v5582_v41, %v6928_v24  ;;  %v3580_v43 = vpop.f32.mrb[41].mxu1 }
 0x28c   :  { %v3581_v44 = vadd.f32 %v6928_v24, %v3580_v43 }
 0x28d   :  { %4061 = vst.msk [vmem:[%s7619_s7 + $0x148] sm:$0xff] %vm4019_vm1, %v3586_v42 }
 0x28e   :  { %4060 = vst.msk [vmem:[%s7619_s7 + $0x140] sm:$0xff] %vm4019_vm1, %v3581_v44  ;;  %v5585_v45 = vpop.f32.mrb[42].mxu1 }
 0x28f   :  { %v3596_v46 = vadd.f32 %v5585_v45, %v6928_v24  ;;  %v3590_v47 = vpop.f32.mrb[43].mxu1 }
 0x290   :  { %v3591_v48 = vadd.f32 %v6928_v24, %v3590_v47 }
 0x291   :  { %4063 = vst.msk [vmem:[%s7619_s7 + $0x158] sm:$0xff] %vm4019_vm1, %v3596_v46 }
 0x292   :  { %4062 = vst.msk [vmem:[%s7619_s7 + $0x150] sm:$0xff] %vm4019_vm1, %v3591_v48  ;;  %v5588_v49 = vpop.f32.mrb[44].mxu1 }
 0x293   :  { %v3606_v50 = vadd.f32 %v5588_v49, %v6928_v24  ;;  %v3600_v51 = vpop.f32.mrb[45].mxu1 }
 0x294   :  { %v3601_v52 = vadd.f32 %v6928_v24, %v3600_v51 }
 0x295   :  { %4065 = vst.msk [vmem:[%s7619_s7 + $0x168] sm:$0xff] %vm4019_vm1, %v3606_v50 }
 0x296   :  { %4064 = vst.msk [vmem:[%s7619_s7 + $0x160] sm:$0xff] %vm4019_vm1, %v3601_v52  ;;  %v5591_v54 = vpop.f32.mrb[46].mxu1 }
 0x297   :  { %v3616_v55 = vadd.f32 %v5591_v54, %v6928_v24  ;;  %v3610_v56 = vpop.f32.mrb[47].mxu1 }
 0x298   :  { %v3611_v34 = vadd.f32 %v6928_v24, %v3610_v56 }
 0x299   :  { %4067 = vst.msk [vmem:[%s7619_s7 + $0x178] sm:$0xff] %vm4019_vm1, %v3616_v55 }
 0x29a   :  { %4066 = vst.msk [vmem:[%s7619_s7 + $0x170] sm:$0xff] %vm4019_vm1, %v3611_v34  ;;  %v5594_v57 = vpop.f32.mrb[48].mxu1 }
 0x29b   :  { %v3626_v58 = vadd.f32 %v5594_v57, %v6928_v24  ;;  %v3620_v59 = vpop.f32.mrb[49].mxu1 }
 0x29c   :  { %v3621_v60 = vadd.f32 %v6928_v24, %v3620_v59 }
 0x29d   :  { %4069 = vst.msk [vmem:[%s7619_s7 + $0x188] sm:$0xff] %vm4019_vm1, %v3626_v58 }
 0x29e   :  { %4068 = vst.msk [vmem:[%s7619_s7 + $0x180] sm:$0xff] %vm4019_vm1, %v3621_v60  ;;  %v5597_v61 = vpop.f32.mrb[50].mxu1 }
 0x29f   :  { %v3636_v62 = vadd.f32 %v5597_v61, %v6928_v24  ;;  %v3630_v63 = vpop.f32.mrb[51].mxu1 }
 0x2a0   :  { %v3631_v53 = vadd.f32 %v6928_v24, %v3630_v63 }
 0x2a1   :  { %4071 = vst.msk [vmem:[%s7619_s7 + $0x198] sm:$0xff] %vm4019_vm1, %v3636_v62 }
 0x2a2   :  { %4070 = vst.msk [vmem:[%s7619_s7 + $0x190] sm:$0xff] %vm4019_vm1, %v3631_v53  ;;  %v5600_v0 = vpop.f32.mrb[52].mxu1 }
 0x2a3   :  { %v3646_v1 = vadd.f32 %v5600_v0, %v6928_v24  ;;  %v3640_v2 = vpop.f32.mrb[53].mxu1 }
 0x2a4   :  { %v3641_v3 = vadd.f32 %v6928_v24, %v3640_v2 }
 0x2a5   :  { %4073 = vst.msk [vmem:[%s7619_s7 + $0x1a8] sm:$0xff] %vm4019_vm1, %v3646_v1 }
 0x2a6   :  { %4072 = vst.msk [vmem:[%s7619_s7 + $0x1a0] sm:$0xff] %vm4019_vm1, %v3641_v3  ;;  %v5603_v4 = vpop.f32.mrb[54].mxu1 }
 0x2a7   :  { %v3656_v5 = vadd.f32 %v5603_v4, %v6928_v24  ;;  %v3650_v6 = vpop.f32.mrb[55].mxu1 }
 0x2a8   :  { %v3651_v7 = vadd.f32 %v6928_v24, %v3650_v6 }
 0x2a9   :  { %4075 = vst.msk [vmem:[%s7619_s7 + $0x1b8] sm:$0xff] %vm4019_vm1, %v3656_v5 }
 0x2aa   :  { %4074 = vst.msk [vmem:[%s7619_s7 + $0x1b0] sm:$0xff] %vm4019_vm1, %v3651_v7  ;;  %v5606_v8 = vpop.f32.mrb[56].mxu1 }
 0x2ab   :  { %v3666_v9 = vadd.f32 %v5606_v8, %v6928_v24  ;;  %v3660_v10 = vpop.f32.mrb[57].mxu1 }
 0x2ac   :  { %v3661_v11 = vadd.f32 %v6928_v24, %v3660_v10 }
 0x2ad   :  { %4077 = vst.msk [vmem:[%s7619_s7 + $0x1c8] sm:$0xff] %vm4019_vm1, %v3666_v9 }
 0x2ae   :  { %4076 = vst.msk [vmem:[%s7619_s7 + $0x1c0] sm:$0xff] %vm4019_vm1, %v3661_v11  ;;  %v5609_v12 = vpop.f32.mrb[58].mxu1 }
 0x2af   :  { %v3676_v13 = vadd.f32 %v5609_v12, %v6928_v24  ;;  %v3670_v14 = vpop.f32.mrb[59].mxu1 }
 0x2b0   :  { %v3671_v15 = vadd.f32 %v6928_v24, %v3670_v14 }
 0x2b1   :  { %4079 = vst.msk [vmem:[%s7619_s7 + $0x1d8] sm:$0xff] %vm4019_vm1, %v3676_v13 }
 0x2b2   :  { %4078 = vst.msk [vmem:[%s7619_s7 + $0x1d0] sm:$0xff] %vm4019_vm1, %v3671_v15  ;;  %v5612_v16 = vpop.f32.mrb[60].mxu1 }
 0x2b3   :  { %v3686_v17 = vadd.f32 %v5612_v16, %v6928_v24  ;;  %v3680_v18 = vpop.f32.mrb[61].mxu1 }
 0x2b4   :  { %v3681_v19 = vadd.f32 %v6928_v24, %v3680_v18 }
 0x2b5   :  { %4081 = vst.msk [vmem:[%s7619_s7 + $0x1e8] sm:$0xff] %vm4019_vm1, %v3686_v17 }
 0x2b6   :  { %4080 = vst.msk [vmem:[%s7619_s7 + $0x1e0] sm:$0xff] %vm4019_vm1, %v3681_v19  ;;  %v5615_v20 = vpop.f32.mrb[62].mxu1 }
 0x2b7   :  { %v3696_v21 = vadd.f32 %v5615_v20, %v6928_v24  ;;  %v3690_v22 = vpop.f32.mrb[63].mxu1 }
 0x2b8   :  { %v3691_v23 = vadd.f32 %v6928_v24, %v3690_v22 }
 0x2b9   :  { %4083 = vst.msk [vmem:[%s7619_s7 + $0x1f8] sm:$0xff] %vm4019_vm1, %v3696_v21 }
 0x2ba   :  { %4082 = vst.msk [vmem:[%s7619_s7 + $0x1f0] sm:$0xff] %vm4019_vm1, %v3691_v23  ;;  %v5618_v25 = vpop.f32.mrb[64].mxu1 }
 0x2bb   :  { %v3706_v26 = vadd.f32 %v5618_v25, %v6928_v24  ;;  %v3700_v27 = vpop.f32.mrb[65].mxu1 }
 0x2bc   :  { %v3701_v28 = vadd.f32 %v6928_v24, %v3700_v27 }
 0x2bd   :  { %4085 = vst.msk [vmem:[%s7619_s7 + $0x208] sm:$0xff] %vm4019_vm1, %v3706_v26 }
 0x2be   :  { %4084 = vst.msk [vmem:[%s7619_s7 + $0x200] sm:$0xff] %vm4019_vm1, %v3701_v28  ;;  %v5621_v29 = vpop.f32.mrb[66].mxu1 }
 0x2bf   :  { %v3716_v30 = vadd.f32 %v5621_v29, %v6928_v24  ;;  %v3710_v31 = vpop.f32.mrb[67].mxu1 }
 0x2c0   :  { %v3711_v32 = vadd.f32 %v6928_v24, %v3710_v31 }
 0x2c1   :  { %4087 = vst.msk [vmem:[%s7619_s7 + $0x218] sm:$0xff] %vm4019_vm1, %v3716_v30 }
 0x2c2   :  { %4086 = vst.msk [vmem:[%s7619_s7 + $0x210] sm:$0xff] %vm4019_vm1, %v3711_v32  ;;  %v5624_v33 = vpop.f32.mrb[68].mxu1 }
 0x2c3   :  { %v3726_v35 = vadd.f32 %v5624_v33, %v6928_v24  ;;  %v3720_v36 = vpop.f32.mrb[69].mxu1 }
 0x2c4   :  { %v3721_v37 = vadd.f32 %v6928_v24, %v3720_v36 }
 0x2c5   :  { %4089 = vst.msk [vmem:[%s7619_s7 + $0x228] sm:$0xff] %vm4019_vm1, %v3726_v35 }
 0x2c6   :  { %4088 = vst.msk [vmem:[%s7619_s7 + $0x220] sm:$0xff] %vm4019_vm1, %v3721_v37  ;;  %v5627_v38 = vpop.f32.mrb[70].mxu1 }
 0x2c7   :  { %v3736_v39 = vadd.f32 %v5627_v38, %v6928_v24  ;;  %v3730_v40 = vpop.f32.mrb[71].mxu1 }
 0x2c8   :  { %v3731_v41 = vadd.f32 %v6928_v24, %v3730_v40 }
 0x2c9   :  { %4091 = vst.msk [vmem:[%s7619_s7 + $0x238] sm:$0xff] %vm4019_vm1, %v3736_v39 }
 0x2ca   :  { %4090 = vst.msk [vmem:[%s7619_s7 + $0x230] sm:$0xff] %vm4019_vm1, %v3731_v41  ;;  %v5630_v42 = vpop.f32.mrb[72].mxu1 }
 0x2cb   :  { %v3746_v43 = vadd.f32 %v5630_v42, %v6928_v24  ;;  %v3740_v44 = vpop.f32.mrb[73].mxu1 }
 0x2cc   :  { %v3741_v45 = vadd.f32 %v6928_v24, %v3740_v44 }
 0x2cd   :  { %4093 = vst.msk [vmem:[%s7619_s7 + $0x248] sm:$0xff] %vm4019_vm1, %v3746_v43 }
 0x2ce   :  { %4092 = vst.msk [vmem:[%s7619_s7 + $0x240] sm:$0xff] %vm4019_vm1, %v3741_v45  ;;  %v5633_v46 = vpop.f32.mrb[74].mxu1 }
 0x2cf   :  { %v3756_v47 = vadd.f32 %v5633_v46, %v6928_v24  ;;  %v3750_v48 = vpop.f32.mrb[75].mxu1 }
 0x2d0   :  { %v3751_v49 = vadd.f32 %v6928_v24, %v3750_v48 }
 0x2d1   :  { %4095 = vst.msk [vmem:[%s7619_s7 + $0x258] sm:$0xff] %vm4019_vm1, %v3756_v47 }
 0x2d2   :  { %4094 = vst.msk [vmem:[%s7619_s7 + $0x250] sm:$0xff] %vm4019_vm1, %v3751_v49  ;;  %v5636_v50 = vpop.f32.mrb[76].mxu1 }
 0x2d3   :  { %v3766_v51 = vadd.f32 %v5636_v50, %v6928_v24  ;;  %v3760_v52 = vpop.f32.mrb[77].mxu1 }
 0x2d4   :  { %v3761_v54 = vadd.f32 %v6928_v24, %v3760_v52 }
 0x2d5   :  { %4097 = vst.msk [vmem:[%s7619_s7 + $0x268] sm:$0xff] %vm4019_vm1, %v3766_v51 }
 0x2d6   :  { %4096 = vst.msk [vmem:[%s7619_s7 + $0x260] sm:$0xff] %vm4019_vm1, %v3761_v54  ;;  %v5639_v55 = vpop.f32.mrb[78].mxu1 }
 0x2d7   :  { %v3776_v56 = vadd.f32 %v5639_v55, %v6928_v24  ;;  %v3770_v34 = vpop.f32.mrb[79].mxu1 }
 0x2d8   :  { %v3771_v57 = vadd.f32 %v6928_v24, %v3770_v34 }
 0x2d9   :  { %4099 = vst.msk [vmem:[%s7619_s7 + $0x278] sm:$0xff] %vm4019_vm1, %v3776_v56 }
 0x2da   :  { %4098 = vst.msk [vmem:[%s7619_s7 + $0x270] sm:$0xff] %vm4019_vm1, %v3771_v57  ;;  %v5642_v58 = vpop.f32.mrb[80].mxu1 }
 0x2db   :  { %v3786_v59 = vadd.f32 %v5642_v58, %v6928_v24  ;;  %v3780_v60 = vpop.f32.mrb[81].mxu1 }
 0x2dc   :  { %v3781_v61 = vadd.f32 %v6928_v24, %v3780_v60 }
 0x2dd   :  { %4101 = vst.msk [vmem:[%s7619_s7 + $0x288] sm:$0xff] %vm4019_vm1, %v3786_v59 }
 0x2de   :  { %4100 = vst.msk [vmem:[%s7619_s7 + $0x280] sm:$0xff] %vm4019_vm1, %v3781_v61  ;;  %v5645_v62 = vpop.f32.mrb[82].mxu1 }
 0x2df   :  { %v3796_v63 = vadd.f32 %v5645_v62, %v6928_v24  ;;  %v3790_v53 = vpop.f32.mrb[83].mxu1 }
 0x2e0   :  { %v3791_v0 = vadd.f32 %v6928_v24, %v3790_v53 }
 0x2e1   :  { %4103 = vst.msk [vmem:[%s7619_s7 + $0x298] sm:$0xff] %vm4019_vm1, %v3796_v63 }
 0x2e2   :  { %4102 = vst.msk [vmem:[%s7619_s7 + $0x290] sm:$0xff] %vm4019_vm1, %v3791_v0  ;;  %v5648_v1 = vpop.f32.mrb[84].mxu1 }
 0x2e3   :  { %v3806_v2 = vadd.f32 %v5648_v1, %v6928_v24  ;;  %v3800_v3 = vpop.f32.mrb[85].mxu1 }
 0x2e4   :  { %v3801_v4 = vadd.f32 %v6928_v24, %v3800_v3 }
 0x2e5   :  { %4105 = vst.msk [vmem:[%s7619_s7 + $0x2a8] sm:$0xff] %vm4019_vm1, %v3806_v2 }
 0x2e6   :  { %4104 = vst.msk [vmem:[%s7619_s7 + $0x2a0] sm:$0xff] %vm4019_vm1, %v3801_v4  ;;  %v5651_v5 = vpop.f32.mrb[86].mxu1 }
 0x2e7   :  { %v3816_v6 = vadd.f32 %v5651_v5, %v6928_v24  ;;  %v3810_v7 = vpop.f32.mrb[87].mxu1 }
 0x2e8   :  { %v3811_v8 = vadd.f32 %v6928_v24, %v3810_v7 }
 0x2e9   :  { %4107 = vst.msk [vmem:[%s7619_s7 + $0x2b8] sm:$0xff] %vm4019_vm1, %v3816_v6 }
 0x2ea   :  { %4106 = vst.msk [vmem:[%s7619_s7 + $0x2b0] sm:$0xff] %vm4019_vm1, %v3811_v8  ;;  %v5654_v9 = vpop.f32.mrb[88].mxu1 }
 0x2eb   :  { %v3826_v10 = vadd.f32 %v5654_v9, %v6928_v24  ;;  %v3820_v11 = vpop.f32.mrb[89].mxu1 }
 0x2ec   :  { %v3821_v12 = vadd.f32 %v6928_v24, %v3820_v11 }
 0x2ed   :  { %4109 = vst.msk [vmem:[%s7619_s7 + $0x2c8] sm:$0xff] %vm4019_vm1, %v3826_v10 }
 0x2ee   :  { %4108 = vst.msk [vmem:[%s7619_s7 + $0x2c0] sm:$0xff] %vm4019_vm1, %v3821_v12  ;;  %v5657_v13 = vpop.f32.mrb[90].mxu1 }
 0x2ef   :  { %v3836_v14 = vadd.f32 %v5657_v13, %v6928_v24  ;;  %v3830_v15 = vpop.f32.mrb[91].mxu1 }
 0x2f0   :  { %v3831_v16 = vadd.f32 %v6928_v24, %v3830_v15 }
 0x2f1   :  { %4111 = vst.msk [vmem:[%s7619_s7 + $0x2d8] sm:$0xff] %vm4019_vm1, %v3836_v14 }
 0x2f2   :  { %4110 = vst.msk [vmem:[%s7619_s7 + $0x2d0] sm:$0xff] %vm4019_vm1, %v3831_v16  ;;  %v5660_v17 = vpop.f32.mrb[92].mxu1 }
 0x2f3   :  { %v3846_v18 = vadd.f32 %v5660_v17, %v6928_v24  ;;  %v3840_v19 = vpop.f32.mrb[93].mxu1 }
 0x2f4   :  { %v3841_v20 = vadd.f32 %v6928_v24, %v3840_v19 }
 0x2f5   :  { %4113 = vst.msk [vmem:[%s7619_s7 + $0x2e8] sm:$0xff] %vm4019_vm1, %v3846_v18 }
 0x2f6   :  { %4112 = vst.msk [vmem:[%s7619_s7 + $0x2e0] sm:$0xff] %vm4019_vm1, %v3841_v20  ;;  %v5663_v21 = vpop.f32.mrb[94].mxu1 }
 0x2f7   :  { %v3856_v22 = vadd.f32 %v5663_v21, %v6928_v24  ;;  %v3850_v23 = vpop.f32.mrb[95].mxu1 }
 0x2f8   :  { %v3851_v25 = vadd.f32 %v6928_v24, %v3850_v23 }
 0x2f9   :  { %4115 = vst.msk [vmem:[%s7619_s7 + $0x2f8] sm:$0xff] %vm4019_vm1, %v3856_v22 }
 0x2fa   :  { %4114 = vst.msk [vmem:[%s7619_s7 + $0x2f0] sm:$0xff] %vm4019_vm1, %v3851_v25  ;;  %v5666_v26 = vpop.f32.mrb[96].mxu1 }
 0x2fb   :  { %v3866_v27 = vadd.f32 %v5666_v26, %v6928_v24  ;;  %v3860_v28 = vpop.f32.mrb[97].mxu1 }
 0x2fc   :  { %v3861_v29 = vadd.f32 %v6928_v24, %v3860_v28 }
 0x2fd   :  { %4117 = vst.msk [vmem:[%s7619_s7 + $0x308] sm:$0xff] %vm4019_vm1, %v3866_v27 }
 0x2fe   :  { %4116 = vst.msk [vmem:[%s7619_s7 + $0x300] sm:$0xff] %vm4019_vm1, %v3861_v29  ;;  %v5669_v30 = vpop.f32.mrb[98].mxu1 }
 0x2ff   :  { %v3876_v31 = vadd.f32 %v5669_v30, %v6928_v24  ;;  %v3870_v32 = vpop.f32.mrb[99].mxu1 }
 0x300   :  { %v3871_v33 = vadd.f32 %v6928_v24, %v3870_v32 }
 0x301   :  { %4119 = vst.msk [vmem:[%s7619_s7 + $0x318] sm:$0xff] %vm4019_vm1, %v3876_v31 }
 0x302   :  { %4118 = vst.msk [vmem:[%s7619_s7 + $0x310] sm:$0xff] %vm4019_vm1, %v3871_v33  ;;  %v5672_v35 = vpop.f32.mrb[100].mxu1 }
 0x303   :  { %v3886_v36 = vadd.f32 %v5672_v35, %v6928_v24  ;;  %v3880_v37 = vpop.f32.mrb[101].mxu1 }
 0x304   :  { %v3881_v38 = vadd.f32 %v6928_v24, %v3880_v37 }
 0x305   :  { %4121 = vst.msk [vmem:[%s7619_s7 + $0x328] sm:$0xff] %vm4019_vm1, %v3886_v36 }
 0x306   :  { %4120 = vst.msk [vmem:[%s7619_s7 + $0x320] sm:$0xff] %vm4019_vm1, %v3881_v38  ;;  %v5675_v39 = vpop.f32.mrb[102].mxu1 }
 0x307   :  { %v3896_v40 = vadd.f32 %v5675_v39, %v6928_v24  ;;  %v3890_v41 = vpop.f32.mrb[103].mxu1 }
 0x308   :  { %v3891_v42 = vadd.f32 %v6928_v24, %v3890_v41 }
 0x309   :  { %4123 = vst.msk [vmem:[%s7619_s7 + $0x338] sm:$0xff] %vm4019_vm1, %v3896_v40 }
 0x30a   :  { %4122 = vst.msk [vmem:[%s7619_s7 + $0x330] sm:$0xff] %vm4019_vm1, %v3891_v42  ;;  %v5678_v43 = vpop.f32.mrb[104].mxu1 }
 0x30b   :  { %v3906_v44 = vadd.f32 %v5678_v43, %v6928_v24  ;;  %v3900_v45 = vpop.f32.mrb[105].mxu1 }
 0x30c   :  { %v3901_v46 = vadd.f32 %v6928_v24, %v3900_v45 }
 0x30d   :  { %4125 = vst.msk [vmem:[%s7619_s7 + $0x348] sm:$0xff] %vm4019_vm1, %v3906_v44 }
 0x30e   :  { %4124 = vst.msk [vmem:[%s7619_s7 + $0x340] sm:$0xff] %vm4019_vm1, %v3901_v46  ;;  %v5681_v47 = vpop.f32.mrb[106].mxu1 }
 0x30f   :  { %v3916_v48 = vadd.f32 %v5681_v47, %v6928_v24  ;;  %v3910_v49 = vpop.f32.mrb[107].mxu1 }
 0x310   :  { %v3911_v50 = vadd.f32 %v6928_v24, %v3910_v49 }
 0x311   :  { %4127 = vst.msk [vmem:[%s7619_s7 + $0x358] sm:$0xff] %vm4019_vm1, %v3916_v48 }
 0x312   :  { %4126 = vst.msk [vmem:[%s7619_s7 + $0x350] sm:$0xff] %vm4019_vm1, %v3911_v50  ;;  %v5684_v51 = vpop.f32.mrb[108].mxu1 }
 0x313   :  { %v3926_v52 = vadd.f32 %v5684_v51, %v6928_v24  ;;  %v3920_v54 = vpop.f32.mrb[109].mxu1 }
 0x314   :  { %v3921_v55 = vadd.f32 %v6928_v24, %v3920_v54 }
 0x315   :  { %4129 = vst.msk [vmem:[%s7619_s7 + $0x368] sm:$0xff] %vm4019_vm1, %v3926_v52 }
 0x316   :  { %4128 = vst.msk [vmem:[%s7619_s7 + $0x360] sm:$0xff] %vm4019_vm1, %v3921_v55  ;;  %v5687_v56 = vpop.f32.mrb[110].mxu1 }
 0x317   :  { %v3936_v34 = vadd.f32 %v5687_v56, %v6928_v24  ;;  %v3930_v57 = vpop.f32.mrb[111].mxu1 }
 0x318   :  { %v3931_v58 = vadd.f32 %v6928_v24, %v3930_v57 }
 0x319   :  { %4131 = vst.msk [vmem:[%s7619_s7 + $0x378] sm:$0xff] %vm4019_vm1, %v3936_v34 }
 0x31a   :  { %4130 = vst.msk [vmem:[%s7619_s7 + $0x370] sm:$0xff] %vm4019_vm1, %v3931_v58  ;;  %v5690_v59 = vpop.f32.mrb[112].mxu1 }
 0x31b   :  { %v3946_v60 = vadd.f32 %v5690_v59, %v6928_v24  ;;  %v3940_v61 = vpop.f32.mrb[113].mxu1 }
 0x31c   :  { %v3941_v62 = vadd.f32 %v6928_v24, %v3940_v61 }
 0x31d   :  { %4133 = vst.msk [vmem:[%s7619_s7 + $0x388] sm:$0xff] %vm4019_vm1, %v3946_v60 }
 0x31e   :  { %4132 = vst.msk [vmem:[%s7619_s7 + $0x380] sm:$0xff] %vm4019_vm1, %v3941_v62  ;;  %v5693_v63 = vpop.f32.mrb[114].mxu1 }
 0x31f   :  { %v3956_v53 = vadd.f32 %v5693_v63, %v6928_v24  ;;  %v3950_v0 = vpop.f32.mrb[115].mxu1 }
 0x320   :  { %v3951_v1 = vadd.f32 %v6928_v24, %v3950_v0 }
 0x321   :  { %4135 = vst.msk [vmem:[%s7619_s7 + $0x398] sm:$0xff] %vm4019_vm1, %v3956_v53 }
 0x322   :  { %4134 = vst.msk [vmem:[%s7619_s7 + $0x390] sm:$0xff] %vm4019_vm1, %v3951_v1  ;;  %v5696_v2 = vpop.f32.mrb[116].mxu1 }
 0x323   :  { %v3966_v3 = vadd.f32 %v5696_v2, %v6928_v24  ;;  %v3960_v4 = vpop.f32.mrb[117].mxu1 }
 0x324   :  { %v3961_v5 = vadd.f32 %v6928_v24, %v3960_v4 }
 0x325   :  { %4137 = vst.msk [vmem:[%s7619_s7 + $0x3a8] sm:$0xff] %vm4019_vm1, %v3966_v3 }
 0x326   :  { %4136 = vst.msk [vmem:[%s7619_s7 + $0x3a0] sm:$0xff] %vm4019_vm1, %v3961_v5  ;;  %v5699_v6 = vpop.f32.mrb[118].mxu1 }
 0x327   :  { %v3976_v7 = vadd.f32 %v5699_v6, %v6928_v24  ;;  %v3970_v8 = vpop.f32.mrb[119].mxu1 }
 0x328   :  { %v3971_v9 = vadd.f32 %v6928_v24, %v3970_v8 }
 0x329   :  { %4139 = vst.msk [vmem:[%s7619_s7 + $0x3b8] sm:$0xff] %vm4019_vm1, %v3976_v7 }
 0x32a   :  { %4138 = vst.msk [vmem:[%s7619_s7 + $0x3b0] sm:$0xff] %vm4019_vm1, %v3971_v9  ;;  %v5702_v10 = vpop.f32.mrb[120].mxu1 }
 0x32b   :  { %v3986_v11 = vadd.f32 %v5702_v10, %v6928_v24  ;;  %v3980_v12 = vpop.f32.mrb[121].mxu1 }
 0x32c   :  { %v3981_v13 = vadd.f32 %v6928_v24, %v3980_v12 }
 0x32d   :  { %4141 = vst.msk [vmem:[%s7619_s7 + $0x3c8] sm:$0xff] %vm4019_vm1, %v3986_v11 }
 0x32e   :  { %4140 = vst.msk [vmem:[%s7619_s7 + $0x3c0] sm:$0xff] %vm4019_vm1, %v3981_v13  ;;  %v5705_v14 = vpop.f32.mrb[122].mxu1 }
 0x32f   :  { %v3996_v15 = vadd.f32 %v5705_v14, %v6928_v24  ;;  %v3990_v16 = vpop.f32.mrb[123].mxu1 }
 0x330   :  { %v3991_v17 = vadd.f32 %v6928_v24, %v3990_v16 }
 0x331   :  { %4143 = vst.msk [vmem:[%s7619_s7 + $0x3d8] sm:$0xff] %vm4019_vm1, %v3996_v15 }
 0x332   :  { %4142 = vst.msk [vmem:[%s7619_s7 + $0x3d0] sm:$0xff] %vm4019_vm1, %v3991_v17  ;;  %v5708_v18 = vpop.f32.mrb[124].mxu1 }
 0x333   :  { %v4006_v19 = vadd.f32 %v5708_v18, %v6928_v24  ;;  %v4000_v20 = vpop.f32.mrb[125].mxu1 }
 0x334   :  { %v4001_v21 = vadd.f32 %v6928_v24, %v4000_v20 }
 0x335   :  { %4145 = vst.msk [vmem:[%s7619_s7 + $0x3e8] sm:$0xff] %vm4019_vm1, %v4006_v19 }
 0x336   :  { %4144 = vst.msk [vmem:[%s7619_s7 + $0x3e0] sm:$0xff] %vm4019_vm1, %v4001_v21  ;;  %v5711_v22 = vpop.f32.mrb[126].mxu1 }
 0x337   :  { %v4016_v23 = vadd.f32 %v5711_v22, %v6928_v24  ;;  %v4010_v25 = vpop.f32.mrb[127].mxu1 }
 0x338   :  { %v4011_v26 = vadd.f32 %v6928_v24, %v4010_v25 }
 0x339   :  { %4147 = vst.msk [vmem:[%s7619_s7 + $0x3f8] sm:$0xff] %vm4019_vm1, %v4016_v23 }
 0x33a   :  { %4146 = vst.msk [vmem:[%s7619_s7 + $0x3f0] sm:$0xff] %vm4019_vm1, %v4011_v26 }

</bundles_post_ra>
